<compile_context>
chip_gen: v7x
topology: tpu7x:2x2x1
jax: 0.10.0
libtpu: 0.0.40
codegen_flags: <defaults>
</compile_context>

<pallas_src>
import functools

import jax
import jax.numpy as jnp
import numpy as np
from jax import lax
from jax.experimental import pallas as pl
from jax.experimental.pallas import tpu as pltpu


# ---------------------------------------------------------------------------
# Fused Maxout kernel (one batch element per grid step)
# ---------------------------------------------------------------------------
def _maxout_kernel(x_ref, w1_ref, b1_ref, w2_ref, b2_ref, o_ref,
                   *, H, W, C, KH, KW, num_max):
    """x_ref : (1, Hp, Wp*C)  zero-padded input, channel-fastest packed rows
       wX_ref: (num_max*KH*KW, W*C)  per-tap weights, pre-tiled across W
       bX_ref: (num_max, W*C)        biases, pre-tiled across W
       o_ref : (1, H, W*C)
    """
    WC = W * C
    x = x_ref[0]                                             # (Hp, Wp*C)

    # The KH*KW shifted windows are shared by every (conv, m) pair -> slice once.
    taps = [x[ki:ki + H, kj * C: kj * C + WC]                # (H, W*C)
            for ki in range(KH) for kj in range(KW)]

    def branch(w_ref, b_ref):
        y = None
        for m in range(num_max):
            acc = jnp.zeros((H, WC), jnp.float32) + b_ref[m:m + 1, :]
            base = m * KH * KW
            for t in range(KH * KW):
                acc = acc + taps[t] * w_ref[base + t: base + t + 1, :]
            y = acc if y is None else jnp.maximum(y, acc)
        return y

    o_ref[0] = branch(w1_ref, b1_ref) - branch(w2_ref, b2_ref)


# ---------------------------------------------------------------------------
# One-time parameter re-layout (PyTorch grouped-conv weights -> lane-dense)
# ---------------------------------------------------------------------------
def prepare_maxout_params(w1_pt, b1_pt, w2_pt, b2_pt, in_nc, num_max, W):
    """wX_pt: (in_nc*num_max, 1, KH, KW), bX_pt: (in_nc*num_max,).
    PyTorch grouped-conv output channel o = c*num_max + m (group-major), which
    is exactly the window layout MaxPool3d((num_max,1,1)) reduces over.
    Returns per-conv weights (num_max*KH*KW, W*in_nc) and biases
    (num_max, W*in_nc), tiled along W to match the packed (H, W*C) rows.
    """
    KH, KW = int(w1_pt.shape[-2]), int(w1_pt.shape[-1])

    def prep(w_pt, b_pt):
        w = w_pt.reshape(in_nc, num_max, KH, KW)             # [c, m, ki, kj]
        w = jnp.transpose(w, (1, 2, 3, 0))                   # (m, ki, kj, c)
        w = w.reshape(num_max * KH * KW, in_nc).astype(jnp.float32)
        b = b_pt.reshape(in_nc, num_max).T.astype(jnp.float32)   # (m, c)
        return jnp.tile(w, (1, W)), jnp.tile(b, (1, W))

    w1, b1 = prep(w1_pt, b1_pt)
    w2, b2 = prep(w2_pt, b2_pt)
    return dict(w1=w1, b1=b1, w2=w2, b2=b2,
                KH=KH, KW=KW, num_max=num_max, in_nc=in_nc)


# ---------------------------------------------------------------------------
# Forward (public API mirrors PyTorch NCHW)
# ---------------------------------------------------------------------------
def maxout_forward(params, x_nchw, u_nchw=None):
    C = params['in_nc']
    num_max = params['num_max']
    KH, KW = params['KH'], params['KW']
    pad = KH // 2
    B, _, H, W = x_nchw.shape
    WC = W * C
    Hp, Wp = H + 2 * pad, W + 2 * pad

    # TODO(synk): training-mode Dropout2d (random whole-channel zeroing with
    # 1/(1-p) rescale) is not implemented; this is the eval-mode forward where
    # Dropout2d is the identity.
    xin = x_nchw if u_nchw is None else x_nchw + u_nchw

    x = jnp.transpose(xin, (0, 2, 3, 1)).astype(jnp.float32)           # NHWC
    xp = jnp.pad(x, ((0, 0), (pad, pad), (pad, pad), (0, 0)))
    xp = xp.reshape(B, Hp, Wp * C)              # lane axis carries W*C (dense)

    kern = functools.partial(_maxout_kernel, H=H, W=W, C=C,
                             KH=KH, KW=KW, num_max=num_max)
    out = pl.pallas_call(
        kern,
        out_shape=jax.ShapeDtypeStruct((B, H, WC), jnp.float32),
        grid=(B,),
        in_specs=[
            pl.BlockSpec((1, Hp, Wp * C), lambda b: (b, 0, 0)),
            pl.BlockSpec((num_max * KH * KW, WC), lambda b: (0, 0)),
            pl.BlockSpec((num_max, WC), lambda b: (0, 0)),
            pl.BlockSpec((num_max * KH * KW, WC), lambda b: (0, 0)),
            pl.BlockSpec((num_max, WC), lambda b: (0, 0)),
        ],
        out_specs=pl.BlockSpec((1, H, WC), lambda b: (b, 0, 0)),
        compiler_params=pltpu.CompilerParams(
            dimension_semantics=("parallel",)),
    )(xp, params['w1'], params['b1'], params['w2'], params['b2'])

    out = out.reshape(B, H, W, C)
    return jnp.transpose(out, (0, 3, 1, 2))                            # NCHW


# ---------------------------------------------------------------------------
# Pure-JAX reference (PyTorch semantics) for correctness check
# ---------------------------------------------------------------------------
def _ref_forward(x, u, w1, b1, w2, b2, in_nc, num_max, pad):
    xi = x if u is None else x + u

    def gconv(w, b):
        y = lax.conv_general_dilated(
            xi, w, window_strides=(1, 1),
            padding=[(pad, pad), (pad, pad)],
            dimension_numbers=('NCHW', 'OIHW', 'NCHW'),
            feature_group_count=in_nc)
        return y + b[None, :, None, None]

    B, _, H, W = x.shape
    y1 = gconv(w1, b1).reshape(B, in_nc, num_max, H, W).max(axis=2)
    y2 = gconv(w2, b2).reshape(B, in_nc, num_max, H, W).max(axis=2)
    return y1 - y2


if __name__ == "__main__":
    B, in_nc, num_max, K = 2, 8, 4, 3
    H = W = 16                     # W * in_nc = 128 -> fully lane-dense rows

    key = jax.random.PRNGKey(0)
    k1, k2, k3, k4, k5, k6 = jax.random.split(key, 6)
    w1_pt = 0.1 * jax.random.normal(k1, (in_nc * num_max, 1, K, K), jnp.float32)
    b1_pt = 0.1 * jax.random.normal(k2, (in_nc * num_max,), jnp.float32)
    w2_pt = 0.1 * jax.random.normal(k3, (in_nc * num_max, 1, K, K), jnp.float32)
    b2_pt = 0.1 * jax.random.normal(k4, (in_nc * num_max,), jnp.float32)
    x = jax.random.normal(k5, (B, in_nc, H, W), jnp.float32)
    u = jax.random.normal(k6, (B, in_nc, H, W), jnp.float32)

    params = prepare_maxout_params(w1_pt, b1_pt, w2_pt, b2_pt, in_nc, num_max, W)

    # forward(x)   (u is None)
    fwd = jax.jit(lambda xx: maxout_forward(params, xx))
    out = jax.block_until_ready(fwd(x))
    assert out.shape == (B, in_nc, H, W)
    ref = _ref_forward(x, None, w1_pt, b1_pt, w2_pt, b2_pt, in_nc, num_max, K // 2)
    np.testing.assert_allclose(np.asarray(out), np.asarray(ref),
                               atol=1e-4, rtol=1e-4)

    # forward(x, u)
    fwd_u = jax.jit(lambda xx, uu: maxout_forward(params, xx, uu))
    out_u = jax.block_until_ready(fwd_u(x, u))
    ref_u = _ref_forward(x, u, w1_pt, b1_pt, w2_pt, b2_pt, in_nc, num_max, K // 2)
    np.testing.assert_allclose(np.asarray(out_u), np.asarray(ref_u),
                               atol=1e-4, rtol=1e-4)

    assert bool(jnp.all(jnp.isfinite(out)))
    print("KERNEL_OK")
</pallas_src>

<mosaic_0001>
module attributes {stable_mosaic.version = 11 : i64} {
  func.func @_maxout_kernel(%arg0: i32, %arg1: memref<1x18x144xf32, #tpu.memory_space<vmem>>, %arg2: memref<36x128xf32, #tpu.memory_space<vmem>>, %arg3: memref<4x128xf32, #tpu.memory_space<vmem>>, %arg4: memref<36x128xf32, #tpu.memory_space<vmem>>, %arg5: memref<4x128xf32, #tpu.memory_space<vmem>>, %arg6: memref<1x16x128xf32, #tpu.memory_space<vmem>>) attributes {dimension_semantics = [#tpu.dimension_semantics<parallel>], iteration_bounds = array<i64: 2>, scalar_prefetch = 0 : i64, scratch_operands = 0 : i64, tpu.core_type = #tpu.core_type<tc>, window_params = [{transform_indices = @transform_0, window_bounds = array<i64: 1, 18, 144>}, {pipeline_mode = #tpu.pipeline_mode<synchronous>, transform_indices = @transform_1, window_bounds = array<i64: 36, 128>}, {pipeline_mode = #tpu.pipeline_mode<synchronous>, transform_indices = @transform_2, window_bounds = array<i64: 4, 128>}, {pipeline_mode = #tpu.pipeline_mode<synchronous>, transform_indices = @transform_3, window_bounds = array<i64: 36, 128>}, {pipeline_mode = #tpu.pipeline_mode<synchronous>, transform_indices = @transform_4, window_bounds = array<i64: 4, 128>}, {transform_indices = @transform_5, window_bounds = array<i64: 1, 16, 128>}]} {
    %c0 = arith.constant 0 : index
    %c0_0 = arith.constant 0 : index
    %c0_1 = arith.constant 0 : index
    %0 = vector.load %arg1[%c0, %c0_0, %c0_1] : memref<1x18x144xf32, #tpu.memory_space<vmem>>, vector<1x18x144xf32>
    %1 = vector.shape_cast %0 : vector<1x18x144xf32> to vector<18x144xf32>
    %2 = vector.extract_strided_slice %1 {offsets = [0, 0], sizes = [16, 128], strides = [1, 1]} : vector<18x144xf32> to vector<16x128xf32>
    %3 = vector.extract_strided_slice %1 {offsets = [0, 8], sizes = [16, 128], strides = [1, 1]} : vector<18x144xf32> to vector<16x128xf32>
    %4 = vector.extract_strided_slice %1 {offsets = [0, 16], sizes = [16, 128], strides = [1, 1]} : vector<18x144xf32> to vector<16x128xf32>
    %5 = vector.extract_strided_slice %1 {offsets = [1, 0], sizes = [16, 128], strides = [1, 1]} : vector<18x144xf32> to vector<16x128xf32>
    %6 = vector.extract_strided_slice %1 {offsets = [1, 8], sizes = [16, 128], strides = [1, 1]} : vector<18x144xf32> to vector<16x128xf32>
    %7 = vector.extract_strided_slice %1 {offsets = [1, 16], sizes = [16, 128], strides = [1, 1]} : vector<18x144xf32> to vector<16x128xf32>
    %8 = vector.extract_strided_slice %1 {offsets = [2, 0], sizes = [16, 128], strides = [1, 1]} : vector<18x144xf32> to vector<16x128xf32>
    %9 = vector.extract_strided_slice %1 {offsets = [2, 8], sizes = [16, 128], strides = [1, 1]} : vector<18x144xf32> to vector<16x128xf32>
    %10 = vector.extract_strided_slice %1 {offsets = [2, 16], sizes = [16, 128], strides = [1, 1]} : vector<18x144xf32> to vector<16x128xf32>
    %cst = arith.constant 0.000000e+00 : f32
    %11 = vector.broadcast %cst : f32 to vector<16x128xf32>
    %c0_2 = arith.constant 0 : index
    %c0_3 = arith.constant 0 : index
    %12 = vector.load %arg3[%c0_2, %c0_3] : memref<4x128xf32, #tpu.memory_space<vmem>>, vector<1x128xf32>
    %13 = vector.broadcast %12 : vector<1x128xf32> to vector<16x128xf32>
    %14 = arith.addf %11, %13 : vector<16x128xf32>
    %c0_4 = arith.constant 0 : index
    %c0_5 = arith.constant 0 : index
    %15 = vector.load %arg2[%c0_4, %c0_5] : memref<36x128xf32, #tpu.memory_space<vmem>>, vector<1x128xf32>
    %16 = vector.broadcast %15 : vector<1x128xf32> to vector<16x128xf32>
    %17 = arith.mulf %2, %16 : vector<16x128xf32>
    %18 = arith.addf %14, %17 : vector<16x128xf32>
    %c1 = arith.constant 1 : index
    %c0_6 = arith.constant 0 : index
    %19 = vector.load %arg2[%c1, %c0_6] : memref<36x128xf32, #tpu.memory_space<vmem>>, vector<1x128xf32>
    %20 = vector.broadcast %19 : vector<1x128xf32> to vector<16x128xf32>
    %21 = arith.mulf %3, %20 : vector<16x128xf32>
    %22 = arith.addf %18, %21 : vector<16x128xf32>
    %c2 = arith.constant 2 : index
    %c0_7 = arith.constant 0 : index
    %23 = vector.load %arg2[%c2, %c0_7] : memref<36x128xf32, #tpu.memory_space<vmem>>, vector<1x128xf32>
    %24 = vector.broadcast %23 : vector<1x128xf32> to vector<16x128xf32>
    %25 = arith.mulf %4, %24 : vector<16x128xf32>
    %26 = arith.addf %22, %25 : vector<16x128xf32>
    %c3 = arith.constant 3 : index
    %c0_8 = arith.constant 0 : index
    %27 = vector.load %arg2[%c3, %c0_8] : memref<36x128xf32, #tpu.memory_space<vmem>>, vector<1x128xf32>
    %28 = vector.broadcast %27 : vector<1x128xf32> to vector<16x128xf32>
    %29 = arith.mulf %5, %28 : vector<16x128xf32>
    %30 = arith.addf %26, %29 : vector<16x128xf32>
    %c4 = arith.constant 4 : index
    %c0_9 = arith.constant 0 : index
    %31 = vector.load %arg2[%c4, %c0_9] : memref<36x128xf32, #tpu.memory_space<vmem>>, vector<1x128xf32>
    %32 = vector.broadcast %31 : vector<1x128xf32> to vector<16x128xf32>
    %33 = arith.mulf %6, %32 : vector<16x128xf32>
    %34 = arith.addf %30, %33 : vector<16x128xf32>
    %c5 = arith.constant 5 : index
    %c0_10 = arith.constant 0 : index
    %35 = vector.load %arg2[%c5, %c0_10] : memref<36x128xf32, #tpu.memory_space<vmem>>, vector<1x128xf32>
    %36 = vector.broadcast %35 : vector<1x128xf32> to vector<16x128xf32>
    %37 = arith.mulf %7, %36 : vector<16x128xf32>
    %38 = arith.addf %34, %37 : vector<16x128xf32>
    %c6 = arith.constant 6 : index
    %c0_11 = arith.constant 0 : index
    %39 = vector.load %arg2[%c6, %c0_11] : memref<36x128xf32, #tpu.memory_space<vmem>>, vector<1x128xf32>
    %40 = vector.broadcast %39 : vector<1x128xf32> to vector<16x128xf32>
    %41 = arith.mulf %8, %40 : vector<16x128xf32>
    %42 = arith.addf %38, %41 : vector<16x128xf32>
    %c7 = arith.constant 7 : index
    %c0_12 = arith.constant 0 : index
    %43 = vector.load %arg2[%c7, %c0_12] : memref<36x128xf32, #tpu.memory_space<vmem>>, vector<1x128xf32>
    %44 = vector.broadcast %43 : vector<1x128xf32> to vector<16x128xf32>
    %45 = arith.mulf %9, %44 : vector<16x128xf32>
    %46 = arith.addf %42, %45 : vector<16x128xf32>
    %c8 = arith.constant 8 : index
    %c0_13 = arith.constant 0 : index
    %47 = vector.load %arg2[%c8, %c0_13] : memref<36x128xf32, #tpu.memory_space<vmem>>, vector<1x128xf32>
    %48 = vector.broadcast %47 : vector<1x128xf32> to vector<16x128xf32>
    %49 = arith.mulf %10, %48 : vector<16x128xf32>
    %50 = arith.addf %46, %49 : vector<16x128xf32>
    %cst_14 = arith.constant 0.000000e+00 : f32
    %51 = vector.broadcast %cst_14 : f32 to vector<16x128xf32>
    %c1_15 = arith.constant 1 : index
    %c0_16 = arith.constant 0 : index
    %52 = vector.load %arg3[%c1_15, %c0_16] : memref<4x128xf32, #tpu.memory_space<vmem>>, vector<1x128xf32>
    %53 = vector.broadcast %52 : vector<1x128xf32> to vector<16x128xf32>
    %54 = arith.addf %51, %53 : vector<16x128xf32>
    %c9 = arith.constant 9 : index
    %c0_17 = arith.constant 0 : index
    %55 = vector.load %arg2[%c9, %c0_17] : memref<36x128xf32, #tpu.memory_space<vmem>>, vector<1x128xf32>
    %56 = vector.broadcast %55 : vector<1x128xf32> to vector<16x128xf32>
    %57 = arith.mulf %2, %56 : vector<16x128xf32>
    %58 = arith.addf %54, %57 : vector<16x128xf32>
    %c10 = arith.constant 10 : index
    %c0_18 = arith.constant 0 : index
    %59 = vector.load %arg2[%c10, %c0_18] : memref<36x128xf32, #tpu.memory_space<vmem>>, vector<1x128xf32>
    %60 = vector.broadcast %59 : vector<1x128xf32> to vector<16x128xf32>
    %61 = arith.mulf %3, %60 : vector<16x128xf32>
    %62 = arith.addf %58, %61 : vector<16x128xf32>
    %c11 = arith.constant 11 : index
    %c0_19 = arith.constant 0 : index
    %63 = vector.load %arg2[%c11, %c0_19] : memref<36x128xf32, #tpu.memory_space<vmem>>, vector<1x128xf32>
    %64 = vector.broadcast %63 : vector<1x128xf32> to vector<16x128xf32>
    %65 = arith.mulf %4, %64 : vector<16x128xf32>
    %66 = arith.addf %62, %65 : vector<16x128xf32>
    %c12 = arith.constant 12 : index
    %c0_20 = arith.constant 0 : index
    %67 = vector.load %arg2[%c12, %c0_20] : memref<36x128xf32, #tpu.memory_space<vmem>>, vector<1x128xf32>
    %68 = vector.broadcast %67 : vector<1x128xf32> to vector<16x128xf32>
    %69 = arith.mulf %5, %68 : vector<16x128xf32>
    %70 = arith.addf %66, %69 : vector<16x128xf32>
    %c13 = arith.constant 13 : index
    %c0_21 = arith.constant 0 : index
    %71 = vector.load %arg2[%c13, %c0_21] : memref<36x128xf32, #tpu.memory_space<vmem>>, vector<1x128xf32>
    %72 = vector.broadcast %71 : vector<1x128xf32> to vector<16x128xf32>
    %73 = arith.mulf %6, %72 : vector<16x128xf32>
    %74 = arith.addf %70, %73 : vector<16x128xf32>
    %c14 = arith.constant 14 : index
    %c0_22 = arith.constant 0 : index
    %75 = vector.load %arg2[%c14, %c0_22] : memref<36x128xf32, #tpu.memory_space<vmem>>, vector<1x128xf32>
    %76 = vector.broadcast %75 : vector<1x128xf32> to vector<16x128xf32>
    %77 = arith.mulf %7, %76 : vector<16x128xf32>
    %78 = arith.addf %74, %77 : vector<16x128xf32>
    %c15 = arith.constant 15 : index
    %c0_23 = arith.constant 0 : index
    %79 = vector.load %arg2[%c15, %c0_23] : memref<36x128xf32, #tpu.memory_space<vmem>>, vector<1x128xf32>
    %80 = vector.broadcast %79 : vector<1x128xf32> to vector<16x128xf32>
    %81 = arith.mulf %8, %80 : vector<16x128xf32>
    %82 = arith.addf %78, %81 : vector<16x128xf32>
    %c16 = arith.constant 16 : index
    %c0_24 = arith.constant 0 : index
    %83 = vector.load %arg2[%c16, %c0_24] : memref<36x128xf32, #tpu.memory_space<vmem>>, vector<1x128xf32>
    %84 = vector.broadcast %83 : vector<1x128xf32> to vector<16x128xf32>
    %85 = arith.mulf %9, %84 : vector<16x128xf32>
    %86 = arith.addf %82, %85 : vector<16x128xf32>
    %c17 = arith.constant 17 : index
    %c0_25 = arith.constant 0 : index
    %87 = vector.load %arg2[%c17, %c0_25] : memref<36x128xf32, #tpu.memory_space<vmem>>, vector<1x128xf32>
    %88 = vector.broadcast %87 : vector<1x128xf32> to vector<16x128xf32>
    %89 = arith.mulf %10, %88 : vector<16x128xf32>
    %90 = arith.addf %86, %89 : vector<16x128xf32>
    %91 = arith.maximumf %50, %90 : vector<16x128xf32>
    %cst_26 = arith.constant 0.000000e+00 : f32
    %92 = vector.broadcast %cst_26 : f32 to vector<16x128xf32>
    %c2_27 = arith.constant 2 : index
    %c0_28 = arith.constant 0 : index
    %93 = vector.load %arg3[%c2_27, %c0_28] : memref<4x128xf32, #tpu.memory_space<vmem>>, vector<1x128xf32>
    %94 = vector.broadcast %93 : vector<1x128xf32> to vector<16x128xf32>
    %95 = arith.addf %92, %94 : vector<16x128xf32>
    %c18 = arith.constant 18 : index
    %c0_29 = arith.constant 0 : index
    %96 = vector.load %arg2[%c18, %c0_29] : memref<36x128xf32, #tpu.memory_space<vmem>>, vector<1x128xf32>
    %97 = vector.broadcast %96 : vector<1x128xf32> to vector<16x128xf32>
    %98 = arith.mulf %2, %97 : vector<16x128xf32>
    %99 = arith.addf %95, %98 : vector<16x128xf32>
    %c19 = arith.constant 19 : index
    %c0_30 = arith.constant 0 : index
    %100 = vector.load %arg2[%c19, %c0_30] : memref<36x128xf32, #tpu.memory_space<vmem>>, vector<1x128xf32>
    %101 = vector.broadcast %100 : vector<1x128xf32> to vector<16x128xf32>
    %102 = arith.mulf %3, %101 : vector<16x128xf32>
    %103 = arith.addf %99, %102 : vector<16x128xf32>
    %c20 = arith.constant 20 : index
    %c0_31 = arith.constant 0 : index
    %104 = vector.load %arg2[%c20, %c0_31] : memref<36x128xf32, #tpu.memory_space<vmem>>, vector<1x128xf32>
    %105 = vector.broadcast %104 : vector<1x128xf32> to vector<16x128xf32>
    %106 = arith.mulf %4, %105 : vector<16x128xf32>
    %107 = arith.addf %103, %106 : vector<16x128xf32>
    %c21 = arith.constant 21 : index
    %c0_32 = arith.constant 0 : index
    %108 = vector.load %arg2[%c21, %c0_32] : memref<36x128xf32, #tpu.memory_space<vmem>>, vector<1x128xf32>
    %109 = vector.broadcast %108 : vector<1x128xf32> to vector<16x128xf32>
    %110 = arith.mulf %5, %109 : vector<16x128xf32>
    %111 = arith.addf %107, %110 : vector<16x128xf32>
    %c22 = arith.constant 22 : index
    %c0_33 = arith.constant 0 : index
    %112 = vector.load %arg2[%c22, %c0_33] : memref<36x128xf32, #tpu.memory_space<vmem>>, vector<1x128xf32>
    %113 = vector.broadcast %112 : vector<1x128xf32> to vector<16x128xf32>
    %114 = arith.mulf %6, %113 : vector<16x128xf32>
    %115 = arith.addf %111, %114 : vector<16x128xf32>
    %c23 = arith.constant 23 : index
    %c0_34 = arith.constant 0 : index
    %116 = vector.load %arg2[%c23, %c0_34] : memref<36x128xf32, #tpu.memory_space<vmem>>, vector<1x128xf32>
    %117 = vector.broadcast %116 : vector<1x128xf32> to vector<16x128xf32>
    %118 = arith.mulf %7, %117 : vector<16x128xf32>
    %119 = arith.addf %115, %118 : vector<16x128xf32>
    %c24 = arith.constant 24 : index
    %c0_35 = arith.constant 0 : index
    %120 = vector.load %arg2[%c24, %c0_35] : memref<36x128xf32, #tpu.memory_space<vmem>>, vector<1x128xf32>
    %121 = vector.broadcast %120 : vector<1x128xf32> to vector<16x128xf32>
    %122 = arith.mulf %8, %121 : vector<16x128xf32>
    %123 = arith.addf %119, %122 : vector<16x128xf32>
    %c25 = arith.constant 25 : index
    %c0_36 = arith.constant 0 : index
    %124 = vector.load %arg2[%c25, %c0_36] : memref<36x128xf32, #tpu.memory_space<vmem>>, vector<1x128xf32>
    %125 = vector.broadcast %124 : vector<1x128xf32> to vector<16x128xf32>
    %126 = arith.mulf %9, %125 : vector<16x128xf32>
    %127 = arith.addf %123, %126 : vector<16x128xf32>
    %c26 = arith.constant 26 : index
    %c0_37 = arith.constant 0 : index
    %128 = vector.load %arg2[%c26, %c0_37] : memref<36x128xf32, #tpu.memory_space<vmem>>, vector<1x128xf32>
    %129 = vector.broadcast %128 : vector<1x128xf32> to vector<16x128xf32>
    %130 = arith.mulf %10, %129 : vector<16x128xf32>
    %131 = arith.addf %127, %130 : vector<16x128xf32>
    %132 = arith.maximumf %91, %131 : vector<16x128xf32>
    %cst_38 = arith.constant 0.000000e+00 : f32
    %133 = vector.broadcast %cst_38 : f32 to vector<16x128xf32>
    %c3_39 = arith.constant 3 : index
    %c0_40 = arith.constant 0 : index
    %134 = vector.load %arg3[%c3_39, %c0_40] : memref<4x128xf32, #tpu.memory_space<vmem>>, vector<1x128xf32>
    %135 = vector.broadcast %134 : vector<1x128xf32> to vector<16x128xf32>
    %136 = arith.addf %133, %135 : vector<16x128xf32>
    %c27 = arith.constant 27 : index
    %c0_41 = arith.constant 0 : index
    %137 = vector.load %arg2[%c27, %c0_41] : memref<36x128xf32, #tpu.memory_space<vmem>>, vector<1x128xf32>
    %138 = vector.broadcast %137 : vector<1x128xf32> to vector<16x128xf32>
    %139 = arith.mulf %2, %138 : vector<16x128xf32>
    %140 = arith.addf %136, %139 : vector<16x128xf32>
    %c28 = arith.constant 28 : index
    %c0_42 = arith.constant 0 : index
    %141 = vector.load %arg2[%c28, %c0_42] : memref<36x128xf32, #tpu.memory_space<vmem>>, vector<1x128xf32>
    %142 = vector.broadcast %141 : vector<1x128xf32> to vector<16x128xf32>
    %143 = arith.mulf %3, %142 : vector<16x128xf32>
    %144 = arith.addf %140, %143 : vector<16x128xf32>
    %c29 = arith.constant 29 : index
    %c0_43 = arith.constant 0 : index
    %145 = vector.load %arg2[%c29, %c0_43] : memref<36x128xf32, #tpu.memory_space<vmem>>, vector<1x128xf32>
    %146 = vector.broadcast %145 : vector<1x128xf32> to vector<16x128xf32>
    %147 = arith.mulf %4, %146 : vector<16x128xf32>
    %148 = arith.addf %144, %147 : vector<16x128xf32>
    %c30 = arith.constant 30 : index
    %c0_44 = arith.constant 0 : index
    %149 = vector.load %arg2[%c30, %c0_44] : memref<36x128xf32, #tpu.memory_space<vmem>>, vector<1x128xf32>
    %150 = vector.broadcast %149 : vector<1x128xf32> to vector<16x128xf32>
    %151 = arith.mulf %5, %150 : vector<16x128xf32>
    %152 = arith.addf %148, %151 : vector<16x128xf32>
    %c31 = arith.constant 31 : index
    %c0_45 = arith.constant 0 : index
    %153 = vector.load %arg2[%c31, %c0_45] : memref<36x128xf32, #tpu.memory_space<vmem>>, vector<1x128xf32>
    %154 = vector.broadcast %153 : vector<1x128xf32> to vector<16x128xf32>
    %155 = arith.mulf %6, %154 : vector<16x128xf32>
    %156 = arith.addf %152, %155 : vector<16x128xf32>
    %c32 = arith.constant 32 : index
    %c0_46 = arith.constant 0 : index
    %157 = vector.load %arg2[%c32, %c0_46] : memref<36x128xf32, #tpu.memory_space<vmem>>, vector<1x128xf32>
    %158 = vector.broadcast %157 : vector<1x128xf32> to vector<16x128xf32>
    %159 = arith.mulf %7, %158 : vector<16x128xf32>
    %160 = arith.addf %156, %159 : vector<16x128xf32>
    %c33 = arith.constant 33 : index
    %c0_47 = arith.constant 0 : index
    %161 = vector.load %arg2[%c33, %c0_47] : memref<36x128xf32, #tpu.memory_space<vmem>>, vector<1x128xf32>
    %162 = vector.broadcast %161 : vector<1x128xf32> to vector<16x128xf32>
    %163 = arith.mulf %8, %162 : vector<16x128xf32>
    %164 = arith.addf %160, %163 : vector<16x128xf32>
    %c34 = arith.constant 34 : index
    %c0_48 = arith.constant 0 : index
    %165 = vector.load %arg2[%c34, %c0_48] : memref<36x128xf32, #tpu.memory_space<vmem>>, vector<1x128xf32>
    %166 = vector.broadcast %165 : vector<1x128xf32> to vector<16x128xf32>
    %167 = arith.mulf %9, %166 : vector<16x128xf32>
    %168 = arith.addf %164, %167 : vector<16x128xf32>
    %c35 = arith.constant 35 : index
    %c0_49 = arith.constant 0 : index
    %169 = vector.load %arg2[%c35, %c0_49] : memref<36x128xf32, #tpu.memory_space<vmem>>, vector<1x128xf32>
    %170 = vector.broadcast %169 : vector<1x128xf32> to vector<16x128xf32>
    %171 = arith.mulf %10, %170 : vector<16x128xf32>
    %172 = arith.addf %168, %171 : vector<16x128xf32>
    %173 = arith.maximumf %132, %172 : vector<16x128xf32>
    %cst_50 = arith.constant 0.000000e+00 : f32
    %174 = vector.broadcast %cst_50 : f32 to vector<16x128xf32>
    %c0_51 = arith.constant 0 : index
    %c0_52 = arith.constant 0 : index
    %175 = vector.load %arg5[%c0_51, %c0_52] : memref<4x128xf32, #tpu.memory_space<vmem>>, vector<1x128xf32>
    %176 = vector.broadcast %175 : vector<1x128xf32> to vector<16x128xf32>
    %177 = arith.addf %174, %176 : vector<16x128xf32>
    %c0_53 = arith.constant 0 : index
    %c0_54 = arith.constant 0 : index
    %178 = vector.load %arg4[%c0_53, %c0_54] : memref<36x128xf32, #tpu.memory_space<vmem>>, vector<1x128xf32>
    %179 = vector.broadcast %178 : vector<1x128xf32> to vector<16x128xf32>
    %180 = arith.mulf %2, %179 : vector<16x128xf32>
    %181 = arith.addf %177, %180 : vector<16x128xf32>
    %c1_55 = arith.constant 1 : index
    %c0_56 = arith.constant 0 : index
    %182 = vector.load %arg4[%c1_55, %c0_56] : memref<36x128xf32, #tpu.memory_space<vmem>>, vector<1x128xf32>
    %183 = vector.broadcast %182 : vector<1x128xf32> to vector<16x128xf32>
    %184 = arith.mulf %3, %183 : vector<16x128xf32>
    %185 = arith.addf %181, %184 : vector<16x128xf32>
    %c2_57 = arith.constant 2 : index
    %c0_58 = arith.constant 0 : index
    %186 = vector.load %arg4[%c2_57, %c0_58] : memref<36x128xf32, #tpu.memory_space<vmem>>, vector<1x128xf32>
    %187 = vector.broadcast %186 : vector<1x128xf32> to vector<16x128xf32>
    %188 = arith.mulf %4, %187 : vector<16x128xf32>
    %189 = arith.addf %185, %188 : vector<16x128xf32>
    %c3_59 = arith.constant 3 : index
    %c0_60 = arith.constant 0 : index
    %190 = vector.load %arg4[%c3_59, %c0_60] : memref<36x128xf32, #tpu.memory_space<vmem>>, vector<1x128xf32>
    %191 = vector.broadcast %190 : vector<1x128xf32> to vector<16x128xf32>
    %192 = arith.mulf %5, %191 : vector<16x128xf32>
    %193 = arith.addf %189, %192 : vector<16x128xf32>
    %c4_61 = arith.constant 4 : index
    %c0_62 = arith.constant 0 : index
    %194 = vector.load %arg4[%c4_61, %c0_62] : memref<36x128xf32, #tpu.memory_space<vmem>>, vector<1x128xf32>
    %195 = vector.broadcast %194 : vector<1x128xf32> to vector<16x128xf32>
    %196 = arith.mulf %6, %195 : vector<16x128xf32>
    %197 = arith.addf %193, %196 : vector<16x128xf32>
    %c5_63 = arith.constant 5 : index
    %c0_64 = arith.constant 0 : index
    %198 = vector.load %arg4[%c5_63, %c0_64] : memref<36x128xf32, #tpu.memory_space<vmem>>, vector<1x128xf32>
    %199 = vector.broadcast %198 : vector<1x128xf32> to vector<16x128xf32>
    %200 = arith.mulf %7, %199 : vector<16x128xf32>
    %201 = arith.addf %197, %200 : vector<16x128xf32>
    %c6_65 = arith.constant 6 : index
    %c0_66 = arith.constant 0 : index
    %202 = vector.load %arg4[%c6_65, %c0_66] : memref<36x128xf32, #tpu.memory_space<vmem>>, vector<1x128xf32>
    %203 = vector.broadcast %202 : vector<1x128xf32> to vector<16x128xf32>
    %204 = arith.mulf %8, %203 : vector<16x128xf32>
    %205 = arith.addf %201, %204 : vector<16x128xf32>
    %c7_67 = arith.constant 7 : index
    %c0_68 = arith.constant 0 : index
    %206 = vector.load %arg4[%c7_67, %c0_68] : memref<36x128xf32, #tpu.memory_space<vmem>>, vector<1x128xf32>
    %207 = vector.broadcast %206 : vector<1x128xf32> to vector<16x128xf32>
    %208 = arith.mulf %9, %207 : vector<16x128xf32>
    %209 = arith.addf %205, %208 : vector<16x128xf32>
    %c8_69 = arith.constant 8 : index
    %c0_70 = arith.constant 0 : index
    %210 = vector.load %arg4[%c8_69, %c0_70] : memref<36x128xf32, #tpu.memory_space<vmem>>, vector<1x128xf32>
    %211 = vector.broadcast %210 : vector<1x128xf32> to vector<16x128xf32>
    %212 = arith.mulf %10, %211 : vector<16x128xf32>
    %213 = arith.addf %209, %212 : vector<16x128xf32>
    %cst_71 = arith.constant 0.000000e+00 : f32
    %214 = vector.broadcast %cst_71 : f32 to vector<16x128xf32>
    %c1_72 = arith.constant 1 : index
    %c0_73 = arith.constant 0 : index
    %215 = vector.load %arg5[%c1_72, %c0_73] : memref<4x128xf32, #tpu.memory_space<vmem>>, vector<1x128xf32>
    %216 = vector.broadcast %215 : vector<1x128xf32> to vector<16x128xf32>
    %217 = arith.addf %214, %216 : vector<16x128xf32>
    %c9_74 = arith.constant 9 : index
    %c0_75 = arith.constant 0 : index
    %218 = vector.load %arg4[%c9_74, %c0_75] : memref<36x128xf32, #tpu.memory_space<vmem>>, vector<1x128xf32>
    %219 = vector.broadcast %218 : vector<1x128xf32> to vector<16x128xf32>
    %220 = arith.mulf %2, %219 : vector<16x128xf32>
    %221 = arith.addf %217, %220 : vector<16x128xf32>
    %c10_76 = arith.constant 10 : index
    %c0_77 = arith.constant 0 : index
    %222 = vector.load %arg4[%c10_76, %c0_77] : memref<36x128xf32, #tpu.memory_space<vmem>>, vector<1x128xf32>
    %223 = vector.broadcast %222 : vector<1x128xf32> to vector<16x128xf32>
    %224 = arith.mulf %3, %223 : vector<16x128xf32>
    %225 = arith.addf %221, %224 : vector<16x128xf32>
    %c11_78 = arith.constant 11 : index
    %c0_79 = arith.constant 0 : index
    %226 = vector.load %arg4[%c11_78, %c0_79] : memref<36x128xf32, #tpu.memory_space<vmem>>, vector<1x128xf32>
    %227 = vector.broadcast %226 : vector<1x128xf32> to vector<16x128xf32>
    %228 = arith.mulf %4, %227 : vector<16x128xf32>
    %229 = arith.addf %225, %228 : vector<16x128xf32>
    %c12_80 = arith.constant 12 : index
    %c0_81 = arith.constant 0 : index
    %230 = vector.load %arg4[%c12_80, %c0_81] : memref<36x128xf32, #tpu.memory_space<vmem>>, vector<1x128xf32>
    %231 = vector.broadcast %230 : vector<1x128xf32> to vector<16x128xf32>
    %232 = arith.mulf %5, %231 : vector<16x128xf32>
    %233 = arith.addf %229, %232 : vector<16x128xf32>
    %c13_82 = arith.constant 13 : index
    %c0_83 = arith.constant 0 : index
    %234 = vector.load %arg4[%c13_82, %c0_83] : memref<36x128xf32, #tpu.memory_space<vmem>>, vector<1x128xf32>
    %235 = vector.broadcast %234 : vector<1x128xf32> to vector<16x128xf32>
    %236 = arith.mulf %6, %235 : vector<16x128xf32>
    %237 = arith.addf %233, %236 : vector<16x128xf32>
    %c14_84 = arith.constant 14 : index
    %c0_85 = arith.constant 0 : index
    %238 = vector.load %arg4[%c14_84, %c0_85] : memref<36x128xf32, #tpu.memory_space<vmem>>, vector<1x128xf32>
    %239 = vector.broadcast %238 : vector<1x128xf32> to vector<16x128xf32>
    %240 = arith.mulf %7, %239 : vector<16x128xf32>
    %241 = arith.addf %237, %240 : vector<16x128xf32>
    %c15_86 = arith.constant 15 : index
    %c0_87 = arith.constant 0 : index
    %242 = vector.load %arg4[%c15_86, %c0_87] : memref<36x128xf32, #tpu.memory_space<vmem>>, vector<1x128xf32>
    %243 = vector.broadcast %242 : vector<1x128xf32> to vector<16x128xf32>
    %244 = arith.mulf %8, %243 : vector<16x128xf32>
    %245 = arith.addf %241, %244 : vector<16x128xf32>
    %c16_88 = arith.constant 16 : index
    %c0_89 = arith.constant 0 : index
    %246 = vector.load %arg4[%c16_88, %c0_89] : memref<36x128xf32, #tpu.memory_space<vmem>>, vector<1x128xf32>
    %247 = vector.broadcast %246 : vector<1x128xf32> to vector<16x128xf32>
    %248 = arith.mulf %9, %247 : vector<16x128xf32>
    %249 = arith.addf %245, %248 : vector<16x128xf32>
    %c17_90 = arith.constant 17 : index
    %c0_91 = arith.constant 0 : index
    %250 = vector.load %arg4[%c17_90, %c0_91] : memref<36x128xf32, #tpu.memory_space<vmem>>, vector<1x128xf32>
    %251 = vector.broadcast %250 : vector<1x128xf32> to vector<16x128xf32>
    %252 = arith.mulf %10, %251 : vector<16x128xf32>
    %253 = arith.addf %249, %252 : vector<16x128xf32>
    %254 = arith.maximumf %213, %253 : vector<16x128xf32>
    %cst_92 = arith.constant 0.000000e+00 : f32
    %255 = vector.broadcast %cst_92 : f32 to vector<16x128xf32>
    %c2_93 = arith.constant 2 : index
    %c0_94 = arith.constant 0 : index
    %256 = vector.load %arg5[%c2_93, %c0_94] : memref<4x128xf32, #tpu.memory_space<vmem>>, vector<1x128xf32>
    %257 = vector.broadcast %256 : vector<1x128xf32> to vector<16x128xf32>
    %258 = arith.addf %255, %257 : vector<16x128xf32>
    %c18_95 = arith.constant 18 : index
    %c0_96 = arith.constant 0 : index
    %259 = vector.load %arg4[%c18_95, %c0_96] : memref<36x128xf32, #tpu.memory_space<vmem>>, vector<1x128xf32>
    %260 = vector.broadcast %259 : vector<1x128xf32> to vector<16x128xf32>
    %261 = arith.mulf %2, %260 : vector<16x128xf32>
    %262 = arith.addf %258, %261 : vector<16x128xf32>
    %c19_97 = arith.constant 19 : index
    %c0_98 = arith.constant 0 : index
    %263 = vector.load %arg4[%c19_97, %c0_98] : memref<36x128xf32, #tpu.memory_space<vmem>>, vector<1x128xf32>
    %264 = vector.broadcast %263 : vector<1x128xf32> to vector<16x128xf32>
    %265 = arith.mulf %3, %264 : vector<16x128xf32>
    %266 = arith.addf %262, %265 : vector<16x128xf32>
    %c20_99 = arith.constant 20 : index
    %c0_100 = arith.constant 0 : index
    %267 = vector.load %arg4[%c20_99, %c0_100] : memref<36x128xf32, #tpu.memory_space<vmem>>, vector<1x128xf32>
    %268 = vector.broadcast %267 : vector<1x128xf32> to vector<16x128xf32>
    %269 = arith.mulf %4, %268 : vector<16x128xf32>
    %270 = arith.addf %266, %269 : vector<16x128xf32>
    %c21_101 = arith.constant 21 : index
    %c0_102 = arith.constant 0 : index
    %271 = vector.load %arg4[%c21_101, %c0_102] : memref<36x128xf32, #tpu.memory_space<vmem>>, vector<1x128xf32>
    %272 = vector.broadcast %271 : vector<1x128xf32> to vector<16x128xf32>
    %273 = arith.mulf %5, %272 : vector<16x128xf32>
    %274 = arith.addf %270, %273 : vector<16x128xf32>
    %c22_103 = arith.constant 22 : index
    %c0_104 = arith.constant 0 : index
    %275 = vector.load %arg4[%c22_103, %c0_104] : memref<36x128xf32, #tpu.memory_space<vmem>>, vector<1x128xf32>
    %276 = vector.broadcast %275 : vector<1x128xf32> to vector<16x128xf32>
    %277 = arith.mulf %6, %276 : vector<16x128xf32>
    %278 = arith.addf %274, %277 : vector<16x128xf32>
    %c23_105 = arith.constant 23 : index
    %c0_106 = arith.constant 0 : index
    %279 = vector.load %arg4[%c23_105, %c0_106] : memref<36x128xf32, #tpu.memory_space<vmem>>, vector<1x128xf32>
    %280 = vector.broadcast %279 : vector<1x128xf32> to vector<16x128xf32>
    %281 = arith.mulf %7, %280 : vector<16x128xf32>
    %282 = arith.addf %278, %281 : vector<16x128xf32>
    %c24_107 = arith.constant 24 : index
    %c0_108 = arith.constant 0 : index
    %283 = vector.load %arg4[%c24_107, %c0_108] : memref<36x128xf32, #tpu.memory_space<vmem>>, vector<1x128xf32>
    %284 = vector.broadcast %283 : vector<1x128xf32> to vector<16x128xf32>
    %285 = arith.mulf %8, %284 : vector<16x128xf32>
    %286 = arith.addf %282, %285 : vector<16x128xf32>
    %c25_109 = arith.constant 25 : index
    %c0_110 = arith.constant 0 : index
    %287 = vector.load %arg4[%c25_109, %c0_110] : memref<36x128xf32, #tpu.memory_space<vmem>>, vector<1x128xf32>
    %288 = vector.broadcast %287 : vector<1x128xf32> to vector<16x128xf32>
    %289 = arith.mulf %9, %288 : vector<16x128xf32>
    %290 = arith.addf %286, %289 : vector<16x128xf32>
    %c26_111 = arith.constant 26 : index
    %c0_112 = arith.constant 0 : index
    %291 = vector.load %arg4[%c26_111, %c0_112] : memref<36x128xf32, #tpu.memory_space<vmem>>, vector<1x128xf32>
    %292 = vector.broadcast %291 : vector<1x128xf32> to vector<16x128xf32>
    %293 = arith.mulf %10, %292 : vector<16x128xf32>
    %294 = arith.addf %290, %293 : vector<16x128xf32>
    %295 = arith.maximumf %254, %294 : vector<16x128xf32>
    %cst_113 = arith.constant 0.000000e+00 : f32
    %296 = vector.broadcast %cst_113 : f32 to vector<16x128xf32>
    %c3_114 = arith.constant 3 : index
    %c0_115 = arith.constant 0 : index
    %297 = vector.load %arg5[%c3_114, %c0_115] : memref<4x128xf32, #tpu.memory_space<vmem>>, vector<1x128xf32>
    %298 = vector.broadcast %297 : vector<1x128xf32> to vector<16x128xf32>
    %299 = arith.addf %296, %298 : vector<16x128xf32>
    %c27_116 = arith.constant 27 : index
    %c0_117 = arith.constant 0 : index
    %300 = vector.load %arg4[%c27_116, %c0_117] : memref<36x128xf32, #tpu.memory_space<vmem>>, vector<1x128xf32>
    %301 = vector.broadcast %300 : vector<1x128xf32> to vector<16x128xf32>
    %302 = arith.mulf %2, %301 : vector<16x128xf32>
    %303 = arith.addf %299, %302 : vector<16x128xf32>
    %c28_118 = arith.constant 28 : index
    %c0_119 = arith.constant 0 : index
    %304 = vector.load %arg4[%c28_118, %c0_119] : memref<36x128xf32, #tpu.memory_space<vmem>>, vector<1x128xf32>
    %305 = vector.broadcast %304 : vector<1x128xf32> to vector<16x128xf32>
    %306 = arith.mulf %3, %305 : vector<16x128xf32>
    %307 = arith.addf %303, %306 : vector<16x128xf32>
    %c29_120 = arith.constant 29 : index
    %c0_121 = arith.constant 0 : index
    %308 = vector.load %arg4[%c29_120, %c0_121] : memref<36x128xf32, #tpu.memory_space<vmem>>, vector<1x128xf32>
    %309 = vector.broadcast %308 : vector<1x128xf32> to vector<16x128xf32>
    %310 = arith.mulf %4, %309 : vector<16x128xf32>
    %311 = arith.addf %307, %310 : vector<16x128xf32>
    %c30_122 = arith.constant 30 : index
    %c0_123 = arith.constant 0 : index
    %312 = vector.load %arg4[%c30_122, %c0_123] : memref<36x128xf32, #tpu.memory_space<vmem>>, vector<1x128xf32>
    %313 = vector.broadcast %312 : vector<1x128xf32> to vector<16x128xf32>
    %314 = arith.mulf %5, %313 : vector<16x128xf32>
    %315 = arith.addf %311, %314 : vector<16x128xf32>
    %c31_124 = arith.constant 31 : index
    %c0_125 = arith.constant 0 : index
    %316 = vector.load %arg4[%c31_124, %c0_125] : memref<36x128xf32, #tpu.memory_space<vmem>>, vector<1x128xf32>
    %317 = vector.broadcast %316 : vector<1x128xf32> to vector<16x128xf32>
    %318 = arith.mulf %6, %317 : vector<16x128xf32>
    %319 = arith.addf %315, %318 : vector<16x128xf32>
    %c32_126 = arith.constant 32 : index
    %c0_127 = arith.constant 0 : index
    %320 = vector.load %arg4[%c32_126, %c0_127] : memref<36x128xf32, #tpu.memory_space<vmem>>, vector<1x128xf32>
    %321 = vector.broadcast %320 : vector<1x128xf32> to vector<16x128xf32>
    %322 = arith.mulf %7, %321 : vector<16x128xf32>
    %323 = arith.addf %319, %322 : vector<16x128xf32>
    %c33_128 = arith.constant 33 : index
    %c0_129 = arith.constant 0 : index
    %324 = vector.load %arg4[%c33_128, %c0_129] : memref<36x128xf32, #tpu.memory_space<vmem>>, vector<1x128xf32>
    %325 = vector.broadcast %324 : vector<1x128xf32> to vector<16x128xf32>
    %326 = arith.mulf %8, %325 : vector<16x128xf32>
    %327 = arith.addf %323, %326 : vector<16x128xf32>
    %c34_130 = arith.constant 34 : index
    %c0_131 = arith.constant 0 : index
    %328 = vector.load %arg4[%c34_130, %c0_131] : memref<36x128xf32, #tpu.memory_space<vmem>>, vector<1x128xf32>
    %329 = vector.broadcast %328 : vector<1x128xf32> to vector<16x128xf32>
    %330 = arith.mulf %9, %329 : vector<16x128xf32>
    %331 = arith.addf %327, %330 : vector<16x128xf32>
    %c35_132 = arith.constant 35 : index
    %c0_133 = arith.constant 0 : index
    %332 = vector.load %arg4[%c35_132, %c0_133] : memref<36x128xf32, #tpu.memory_space<vmem>>, vector<1x128xf32>
    %333 = vector.broadcast %332 : vector<1x128xf32> to vector<16x128xf32>
    %334 = arith.mulf %10, %333 : vector<16x128xf32>
    %335 = arith.addf %331, %334 : vector<16x128xf32>
    %336 = arith.maximumf %295, %335 : vector<16x128xf32>
    %337 = arith.subf %173, %336 : vector<16x128xf32>
    %c0_134 = arith.constant 0 : index
    %c0_135 = arith.constant 0 : index
    %c0_136 = arith.constant 0 : index
    %338 = vector.load %arg6[%c0_134, %c0_135, %c0_136] : memref<1x16x128xf32, #tpu.memory_space<vmem>>, vector<1x16x128xf32>
    %339 = vector.shape_cast %338 : vector<1x16x128xf32> to vector<16x128xf32>
    %340 = vector.shape_cast %337 : vector<16x128xf32> to vector<1x16x128xf32>
    tpu.vector_store %arg6[%c0_134, %c0_135, %c0_136], %340 {strides = array<i32>} : memref<1x16x128xf32, #tpu.memory_space<vmem>>, vector<1x16x128xf32>,
    return
  }
  func.func @transform_0(%arg0: i32) -> (i32, i32, i32) {
    %c0_i32 = arith.constant 0 : i32
    %c0_i32_0 = arith.constant 0 : i32
    %c0_i32_1 = arith.constant 0 : i32
    return %arg0, %c0_i32, %c0_i32_0 : i32, i32, i32
  }
  func.func @transform_1(%arg0: i32) -> (i32, i32) {
    %c0_i32 = arith.constant 0 : i32
    %c0_i32_0 = arith.constant 0 : i32
    %c0_i32_1 = arith.constant 0 : i32
    return %c0_i32, %c0_i32_0 : i32, i32
  }
  func.func @transform_2(%arg0: i32) -> (i32, i32) {
    %c0_i32 = arith.constant 0 : i32
    %c0_i32_0 = arith.constant 0 : i32
    %c0_i32_1 = arith.constant 0 : i32
    return %c0_i32, %c0_i32_0 : i32, i32
  }
  func.func @transform_3(%arg0: i32) -> (i32, i32) {
    %c0_i32 = arith.constant 0 : i32
    %c0_i32_0 = arith.constant 0 : i32
    %c0_i32_1 = arith.constant 0 : i32
    return %c0_i32, %c0_i32_0 : i32, i32
  }
  func.func @transform_4(%arg0: i32) -> (i32, i32) {
    %c0_i32 = arith.constant 0 : i32
    %c0_i32_0 = arith.constant 0 : i32
    %c0_i32_1 = arith.constant 0 : i32
    return %c0_i32, %c0_i32_0 : i32, i32
  }
  func.func @transform_5(%arg0: i32) -> (i32, i32, i32) {
    %c0_i32 = arith.constant 0 : i32
    %c0_i32_0 = arith.constant 0 : i32
    %c0_i32_1 = arith.constant 0 : i32
    return %arg0, %c0_i32, %c0_i32_0 : i32, i32, i32
  }
}

</mosaic_0001>

<bundles_post_ra>
// kernel: _lambda_.1
= control target key start
LH: loop header
LB: loop body
LE: loop exit
PB: predicated region body
PF: predicated region fallthrough
CT: control target
= control target key end

     0   :  { %s2840_s18 = smov 0   ;;  %s4513_s0 = inlined_call_operand.vmem [shape: f32[2,18,144], index: 0, kind: input, shape index: {}]   ;;  %s4514_s1 = inlined_call_operand.vmem [shape: f32[36,128], index: 1, kind: input, shape index: {}]   ;;  %s4515_s2 = inlined_call_operand.vmem [shape: f32[4,128], index: 2, kind: input, shape index: {}]   ;;  %s4516_s3 = inlined_call_operand.vmem [shape: f32[36,128], index: 3, kind: input, shape index: {}]   ;;  %s4517_s4 = inlined_call_operand.vmem [shape: f32[4,128], index: 4, kind: input, shape index: {}]   ;;  %s4518_s5 = inlined_call_operand.vmem [shape: f32[2,16,128], index: 5, kind: output, shape index: {}]  }
   0x1 LB: > { %s2682_s19 = sadd.s32 4294967295, %s2804_s18   ;;  %p2686_p0 = scmp.ge.s32.totalorder %s2804_s18, 1  ;;  %s2804_s18 = sphi %s2840_s18, %s15_s18  }
   0x2   : > { %p187_p1 = scmp.lt.s32.totalorder %s2804_s18, 3 }
   0x4   : > { %p188_p2 = pnand %p2686_p0, %p187_p1 }
   0x6   : > { %191 = sbr.rel (%p188_p2) target bundleno = 3265 (0xcc1), region = 40 }
   0xd   : > { %v2692_v0 = vld [vmem:[%s4514_s1 + $0x1] ss:$0 sm:$0xff]  ;;  %v2693_v1 = vld [vmem:[%s4514_s1 + $0x2] ss:$0 sm:$0xff]  ;;  %s2806_s24 = smov 8   ;;  %s2807_s25 = smov 16  }
   0xe   : > { %252 = vrot.lane.b32.xlu0 %v2692_v0, %s2806_s24  ;;  %284 = vrot.lane.b32.xlu1 %v2693_v1, %s2807_s25  ;;  %v2695_v2 = vld [vmem:[%s4514_s1 + $0x4] ss:$0 sm:$0xff]  ;;  %v2696_v3 = vld [vmem:[%s4514_s1 + $0x5] ss:$0 sm:$0xff]  ;;  %p215_p3 = scmp.lt.s32.totalorder %s2682_s19, 1  ;;  %s2808_s6 = smov 120  }
   0xf   : > { %v2698_v4 = vld [vmem:[%s4514_s1 + $0x7] ss:$0 sm:$0xff]  ;;  %v2699_v5 = vld [vmem:[%s4514_s1 + $0x8] ss:$0 sm:$0xff]  ;;  %v2702_v6 = vld [vmem:[%s4514_s1 + $0xa] ss:$0 sm:$0xff] }
  0x10   : > { %v2703_v7 = vld [vmem:[%s4514_s1 + $0xb] ss:$0 sm:$0xff]  ;;  %v2705_v8 = vld [vmem:[%s4514_s1 + $0xd] ss:$0 sm:$0xff]  ;;  %v2706_v9 = vld [vmem:[%s4514_s1 + $0xe] ss:$0 sm:$0xff] }
  0x11   : > { %v2708_v10 = vld [vmem:[%s4514_s1 + $0x10] ss:$0 sm:$0xff]  ;;  %v2709_v11 = vld [vmem:[%s4514_s1 + $0x11] ss:$0 sm:$0xff]  ;;  %v2712_v12 = vld [vmem:[%s4514_s1 + $0x13] ss:$0 sm:$0xff] }
  0x12   : > { %337 = vrot.lane.b32.xlu0 %v2695_v2, %s2806_s24  ;;  %382 = vrot.lane.b32.xlu1 %v2696_v3, %s2807_s25  ;;  %s4681_s19 = smov (!%p215_p3, %s2682_s19), 1  ;;  %s2809_s7 = smov 112   ;;  %vm321_vm0 = vcmask 1046528   ;;  %vm432_vm1 = vcmask 1045504   ;;  %vm271_vm2 = vcmask 982016   ;;  %vm303_vm3 = vcmask 916480  }
  0x13   : > { %s2773_s27 = smul.u32 48, %s4681_s19 }
  0x15   : > { %s2910_s30 = scalar_lea.vmem %s4513_s0, %s2773_s27 }
  0x16   : > { %448 = vrot.lane.b32.xlu0 %v2698_v4, %s2806_s24  ;;  %493 = vrot.lane.b32.xlu1 %v2699_v5, %s2807_s25  ;;  %v2913_v13 = vld [vmem:[%s2910_s30 + $0x8] sm:$0xff]  ;;  %v2916_v14 = vld [vmem:[%s2910_s30] sm:$0xff] }
  0x17   : > { %v2921_v18 = vld [vmem:[%s2910_s30 + $0x10] sm:$0xff]  ;;  %v2924_v19 = vld [vmem:[%s2910_s30 + $0x18] sm:$0xff]  ;;  %v2965_v43 = vld [vmem:[%s2910_s30 + $0x28] sm:$0x3] }
  0x18   : > { %v2975_v52 = vld [vmem:[%s2910_s30 + $0x20] sm:$0x3] }
  0x1a   : > { %553 = vrot.lane.b32.xlu0 %v2702_v6, %s2806_s24  ;;  %584 = vrot.lane.b32.xlu1 %v2703_v7, %s2807_s25 }
  0x1e   : > { %635 = vrot.lane.b32.xlu0 %v2705_v8, %s2806_s24  ;;  %680 = vrot.lane.b32.xlu1 %v2706_v9, %s2807_s25 }
  0x22   : > { %745 = vrot.lane.b32.xlu0 %v2708_v10, %s2806_s24  ;;  %790 = vrot.lane.b32.xlu1 %v2709_v11, %s2807_s25 }
  0x26   : > { %852 = vrot.lane.b32.xlu0 %v2712_v12, %s2806_s24 }
  0x80   : > { %v253_v15 = vpop.permute.xlu0 %252  ;;  %v285_v20 = vpop.permute.xlu1 %284 }
  0x81   : > { %v256_v16 = vmul.f32 %v253_v15, %v2913_v13  ;;  %v255_v17 = vmul.f32 %v253_v15, %v2916_v14  ;;  %v257_v22 = vmul.f32 %v253_v15, %v2921_v18  ;;  %v258_v23 = vmul.f32 %v253_v15, %v2924_v19 }
  0x82   : > { %v288_v24 = vmul.f32 %v285_v20, %v2913_v13  ;;  %v287_v25 = vmul.f32 %v285_v20, %v2916_v14  ;;  %v290_v29 = vmul.f32 %v285_v20, %v2924_v19  ;;  %v289_v30 = vmul.f32 %v285_v20, %v2921_v18 }
  0x83   : > { %265 = vrot.lane.b32.xlu1 %v256_v16, %s2808_s6  ;;  %263 = vrot.lane.b32.xlu0 %v255_v17, %s2808_s6 }
  0x84   : > { %v338_v21 = vpop.permute.xlu0 %337  ;;  %v2936_v27 = vpop.permute.xlu1 %382 }
  0x85   : > { %v341_v41 = vmul.f32 %v338_v21, %v2913_v13  ;;  %v343_v42 = vmul.f32 %v338_v21, %v2924_v19  ;;  %v340_v47 = vmul.f32 %v338_v21, %v2916_v14  ;;  %v342_v50 = vmul.f32 %v338_v21, %v2921_v18 }
  0x86   : > { %v345_v51 = vmul.f32 %v338_v21, %v2965_v43  ;;  %v344_v54 = vmul.f32 %v338_v21, %v2975_v52  ;;  %v385_v55 = vmul.f32 %v2936_v27, %v2916_v14  ;;  %v387_v56 = vmul.f32 %v2936_v27, %v2921_v18 }
  0x87   : > { %267 = vrot.lane.b32.xlu1 %v257_v22, %s2808_s6  ;;  %269 = vrot.lane.b32.xlu0 %v258_v23, %s2808_s6  ;;  %v355_v48 = vrot.slane %v341_v41, 1  ;;  %v356_v49 = vrot.slane %v343_v42, 1  ;;  %v352_v58 = vrot.slane %v340_v47, 1  ;;  %v353_v59 = vrot.slane %v342_v50, 1 }
  0x88   : > { %v2934_v26 = vpop.permute.xlu0 %448  ;;  %v2942_v31 = vpop.permute.xlu1 %493  ;;  %v360_v60 = vrot.slane %v345_v51, 1  ;;  %v358_v61 = vrot.slane %v344_v54, 1  ;;  %v397_v62 = vrot.slane %v385_v55, 1  ;;  %v386_v63 = vmul.f32 %v2936_v27, %v2913_v13 }
  0x89   : > { %v357_v57 = vsel %vm321_vm0, %v355_v48, %v356_v49  ;;  %v388_v0 = vmul.f32 %v2936_v27, %v2924_v19  ;;  %v354_v1 = vsel %vm321_vm0, %v352_v58, %v353_v59  ;;  %v398_v3 = vrot.slane %v387_v56, 1 }
  0x8a   : > { %v361_v2 = vsel %vm321_vm0, %v356_v49, %v360_v60  ;;  %v389_v4 = vmul.f32 %v2936_v27, %v2975_v52  ;;  %v359_v5 = vsel %vm321_vm0, %v353_v59, %v358_v61  ;;  %v400_v6 = vrot.slane %v386_v63, 1 }
  0x8b   : > { %297 = vrot.lane.b32.xlu1 %v288_v24, %s2809_s7  ;;  %295 = vrot.lane.b32.xlu0 %v287_v25, %s2809_s7  ;;  %v401_v7 = vrot.slane %v388_v0, 1  ;;  %v390_v8 = vmul.f32 %v2936_v27, %v2965_v43  ;;  %v399_v9 = vsel %vm321_vm0, %v397_v62, %v398_v3  ;;  %v452_v11 = vmul.f32 %v2934_v26, %v2913_v13 }
  0x8c   : > { %v554_v28 = vpop.permute.xlu0 %553  ;;  %v585_v35 = vpop.permute.xlu1 %584  ;;  %v403_v10 = vrot.slane %v389_v4, 1  ;;  %v454_v12 = vmul.f32 %v2934_v26, %v2924_v19  ;;  %v451_v17 = vmul.f32 %v2934_v26, %v2916_v14  ;;  %v453_v20 = vmul.f32 %v2934_v26, %v2921_v18 }
  0x8d   : > { %v556_v32 = vmul.f32 %v554_v28, %v2916_v14  ;;  %v557_v33 = vmul.f32 %v554_v28, %v2913_v13  ;;  %v558_v36 = vmul.f32 %v554_v28, %v2921_v18  ;;  %v559_v37 = vmul.f32 %v554_v28, %v2924_v19 }
  0x8e   : > { %v588_v39 = vmul.f32 %v585_v35, %v2913_v13  ;;  %v587_v40 = vmul.f32 %v585_v35, %v2916_v14  ;;  %v590_v45 = vmul.f32 %v585_v35, %v2924_v19  ;;  %v589_v46 = vmul.f32 %v585_v35, %v2921_v18 }
  0x8f   : > { %301 = vrot.lane.b32.xlu1 %v290_v29, %s2809_s7  ;;  %299 = vrot.lane.b32.xlu0 %v289_v30, %s2809_s7  ;;  %v402_v15 = vsel %vm321_vm0, %v400_v6, %v401_v7  ;;  %v405_v16 = vrot.slane %v390_v8, 1  ;;  %v404_v21 = vsel %vm321_vm0, %v398_v3, %v403_v10  ;;  %v466_v22 = vrot.slane %v452_v11, 2 }
  0x90   : > { %v2948_v34 = vpop.permute.xlu0 %635  ;;  %v467_v23 = vrot.slane %v454_v12, 2  ;;  %v456_v24 = vmul.f32 %v2934_v26, %v2965_v43  ;;  %v463_v27 = vrot.slane %v451_v17, 2  ;;  %v464_v28 = vrot.slane %v453_v20, 2 }
  0x91   : > { %v406_v25 = vsel %vm321_vm0, %v401_v7, %v405_v16  ;;  %v455_v29 = vmul.f32 %v2934_v26, %v2975_v52  ;;  %v498_v35 = vmul.f32 %v2942_v31, %v2921_v18  ;;  %v499_v26 = vmul.f32 %v2942_v31, %v2924_v19 }
  0x92   : > { %v468_v30 = vsel %vm432_vm1, %v466_v22, %v467_v23  ;;  %v501_v48 = vmul.f32 %v2942_v31, %v2965_v43  ;;  %v639_v49 = vmul.f32 %v2948_v34, %v2913_v13  ;;  %v641_v54 = vmul.f32 %v2948_v34, %v2924_v19 }
  0x93   : > { %564 = vrot.lane.b32.xlu1 %v556_v32, %s2808_s6  ;;  %566 = vrot.lane.b32.xlu0 %v557_v33, %s2808_s6  ;;  %v471_v32 = vrot.slane %v456_v24, 2  ;;  %v496_v33 = vmul.f32 %v2942_v31, %v2916_v14  ;;  %v509_v42 = vrot.slane %v498_v35, 2  ;;  %v512_v47 = vrot.slane %v499_v26, 2 }
  0x94   : > { %v2954_v38 = vpop.permute.xlu0 %745  ;;  %v516_v56 = vrot.slane %v501_v48, 2  ;;  %v638_v58 = vmul.f32 %v2948_v34, %v2916_v14  ;;  %v654_v60 = vrot.slane %v641_v54, 1  ;;  %v640_v61 = vmul.f32 %v2948_v34, %v2921_v18 }
  0x95   : > { %v508_v41 = vrot.slane %v496_v33, 2  ;;  %v643_v62 = vmul.f32 %v2948_v34, %v2965_v43  ;;  %v642_v6 = vmul.f32 %v2948_v34, %v2975_v52  ;;  %v749_v24 = vmul.f32 %v2954_v38, %v2913_v13 }
  0x96   : > { %v651_v4 = vrot.slane %v640_v61, 1 }
  0x97   : > { %568 = vrot.lane.b32.xlu1 %v558_v36, %s2808_s6  ;;  %570 = vrot.lane.b32.xlu0 %v559_v37, %s2808_s6  ;;  %v465_v36 = vsel %vm432_vm1, %v463_v27, %v464_v28  ;;  %v469_v37 = vrot.slane %v455_v29, 2  ;;  %v510_v51 = vsel %vm432_vm1, %v508_v41, %v509_v42  ;;  %v656_v16 = vrot.slane %v642_v6, 1 }
  0x98   : > { %v2967_v44 = vpop.permute.xlu0 %852  ;;  %v763_v33 = vrot.slane %v749_v24, 2 }
  0x99   : > { %v855_v53 = vmul.f32 %v2967_v44, %v2916_v14  ;;  %v470_v50 = vsel %vm432_vm1, %v464_v28, %v469_v37  ;;  %v753_v37 = vmul.f32 %v2954_v38, %v2965_v43 }
  0x9b   : > { %597 = vrot.lane.b32.xlu1 %v588_v39, %s2809_s7  ;;  %595 = vrot.lane.b32.xlu0 %v587_v40, %s2809_s7  ;;  %v497_v39 = vmul.f32 %v2942_v31, %v2913_v13  ;;  %v472_v40 = vsel %vm432_vm1, %v467_v23, %v471_v32  ;;  %v657_v23 = vsel %vm321_vm0, %v651_v4, %v656_v16 }
  0x9c   : > { %v748_v32 = vmul.f32 %v2954_v38, %v2916_v14 }
  0x9e   : > { %v760_v41 = vrot.slane %v748_v32, 2 }
  0x9f   : > { %601 = vrot.lane.b32.xlu1 %v590_v45, %s2809_s7  ;;  %599 = vrot.lane.b32.xlu0 %v589_v46, %s2809_s7  ;;  %v500_v45 = vmul.f32 %v2942_v31, %v2975_v52  ;;  %v511_v46 = vrot.slane %v497_v39, 2  ;;  %v681_v31 = vpop.permute.xlu1 %680 }
  0xa0   : > { %v683_v63 = vmul.f32 %v681_v31, %v2916_v14  ;;  %v685_v0 = vmul.f32 %v681_v31, %v2921_v18  ;;  %v684_v7 = vmul.f32 %v681_v31, %v2913_v13  ;;  %v686_v10 = vmul.f32 %v681_v31, %v2924_v19 }
  0xa1   : > { %v513_v55 = vsel %vm432_vm1, %v511_v46, %v512_v47  ;;  %v687_v11 = vmul.f32 %v681_v31, %v2975_v52  ;;  %v688_v22 = vmul.f32 %v681_v31, %v2965_v43  ;;  %v768_v46 = vrot.slane %v753_v37, 2 }
  0xa2   : > { %v695_v8 = vrot.slane %v683_v63, 1  ;;  %v698_v17 = vrot.slane %v684_v7, 1  ;;  %v699_v20 = vrot.slane %v686_v10, 1 }
  0xa3   : > { %863 = vrot.lane.b32.xlu1 %v855_v53, %s2808_s6  ;;  %364 = vrot.lane.b32.xlu0 %v357_v57, %s2808_s6  ;;  %v514_v53 = vrot.slane %v500_v45, 2  ;;  %v653_v57 = vrot.slane %v639_v49, 1  ;;  %v703_v29 = vrot.slane %v688_v22, 1 }
  0xa4   : > { %v700_v27 = vsel %vm321_vm0, %v698_v17, %v699_v20 }
  0xa5   : > { %v515_v59 = vsel %vm432_vm1, %v509_v42, %v514_v53  ;;  %v655_v3 = vsel %vm321_vm0, %v653_v57, %v654_v60 }
  0xa7   : > { %362 = vrot.lane.b32.xlu1 %v354_v1, %s2808_s6  ;;  %368 = vrot.lane.b32.xlu0 %v361_v2, %s2808_s6  ;;  %v517_v1 = vsel %vm432_vm1, %v512_v47, %v516_v56  ;;  %v650_v2 = vrot.slane %v638_v58, 1  ;;  %v752_v47 = vmul.f32 %v2954_v38, %v2975_v52 }
  0xa9   : > { %v652_v12 = vsel %vm321_vm0, %v650_v2, %v651_v4  ;;  %v766_v56 = vrot.slane %v752_v47, 2  ;;  %v857_v2 = vmul.f32 %v2967_v44, %v2921_v18  ;;  %v2713_v4 = vld [vmem:[%s4514_s1 + $0x14] ss:$0 sm:$0xff] }
  0xab   : > { %366 = vrot.lane.b32.xlu1 %v359_v5, %s2808_s6  ;;  %407 = vrot.lane.b32.xlu0 %v399_v9, %s2809_s7  ;;  %v658_v5 = vrot.slane %v643_v62, 1  ;;  %v696_v9 = vrot.slane %v685_v0, 1  ;;  %v856_v0 = vmul.f32 %v2967_v44, %v2913_v13 }
  0xad   : > { %v697_v34 = vsel %vm321_vm0, %v695_v8, %v696_v9 }
  0xaf   : > { %409 = vrot.lane.b32.xlu1 %v402_v15, %s2809_s7  ;;  %411 = vrot.lane.b32.xlu0 %v404_v21, %s2809_s7  ;;  %v659_v15 = vsel %vm321_vm0, %v654_v60, %v658_v5  ;;  %v701_v21 = vrot.slane %v687_v11, 1 }
  0xb1   : > { %v702_v28 = vsel %vm321_vm0, %v696_v9, %v701_v21 }
  0xb3   : > { %413 = vrot.lane.b32.xlu1 %v406_v25, %s2809_s7  ;;  %475 = vrot.lane.b32.xlu0 %v468_v30, %s2808_s6  ;;  %v751_v25 = vmul.f32 %v2954_v38, %v2924_v19  ;;  %v791_v30 = vpop.permute.xlu1 %790 }
  0xb4   : > { %v793_v39 = vmul.f32 %v791_v30, %v2916_v14  ;;  %v795_v26 = vmul.f32 %v791_v30, %v2921_v18  ;;  %v794_v48 = vmul.f32 %v791_v30, %v2913_v13  ;;  %v797_v53 = vmul.f32 %v791_v30, %v2975_v52 }
  0xb5   : > { %v764_v35 = vrot.slane %v751_v25, 2  ;;  %v798_v60 = vmul.f32 %v791_v30, %v2965_v43 }
  0xb6   : > { %v805_v49 = vrot.slane %v793_v39, 2  ;;  %v808_v57 = vrot.slane %v794_v48, 2  ;;  %v811_v58 = vrot.slane %v797_v53, 2 }
  0xb7   : > { %473 = vrot.lane.b32.xlu1 %v465_v36, %s2808_s6  ;;  %479 = vrot.lane.b32.xlu0 %v472_v40, %s2808_s6  ;;  %v750_v36 = vmul.f32 %v2954_v38, %v2921_v18  ;;  %v704_v40 = vsel %vm321_vm0, %v699_v20, %v703_v29  ;;  %v765_v42 = vsel %vm432_vm1, %v763_v33, %v764_v35  ;;  %v813_v63 = vrot.slane %v798_v60, 2 }
  0xb9   : > { %v761_v45 = vrot.slane %v750_v36, 2 }
  0xbb   : > { %477 = vrot.lane.b32.xlu1 %v470_v50, %s2808_s6  ;;  %518 = vrot.lane.b32.xlu0 %v510_v51, %s2809_s7  ;;  %v806_v50 = vrot.slane %v795_v26, 2  ;;  %v796_v51 = vmul.f32 %v791_v30, %v2924_v19  ;;  %v762_v54 = vsel %vm432_vm1, %v760_v41, %v761_v45 }
  0xbd   : > { %v807_v38 = vsel %vm432_vm1, %v805_v49, %v806_v50  ;;  %v809_v31 = vrot.slane %v796_v51, 2  ;;  %v812_v62 = vsel %vm432_vm1, %v806_v50, %v811_v58  ;;  %v2715_v51 = vld [vmem:[%s4514_s1 + $0x16] ss:$0 sm:$0xff] }
  0xbf   : > { %520 = vrot.lane.b32.xlu1 %v513_v55, %s2809_s7  ;;  %522 = vrot.lane.b32.xlu0 %v515_v59, %s2809_s7  ;;  %v769_v55 = vsel %vm432_vm1, %v764_v35, %v768_v46  ;;  %v767_v59 = vsel %vm432_vm1, %v761_v45, %v766_v56  ;;  %v810_v61 = vsel %vm432_vm1, %v808_v57, %v809_v31 }
  0xc3   : > { %524 = vrot.lane.b32.xlu1 %v517_v1, %s2809_s7  ;;  %662 = vrot.lane.b32.xlu0 %v655_v3, %s2808_s6  ;;  %v814_v1 = vsel %vm432_vm1, %v809_v31, %v813_v63  ;;  %v858_v3 = vmul.f32 %v2967_v44, %v2924_v19 }
  0xc7   : > { %660 = vrot.lane.b32.xlu1 %v652_v12, %s2808_s6  ;;  %666 = vrot.lane.b32.xlu0 %v659_v15, %s2808_s6 }
  0xcb   : > { %664 = vrot.lane.b32.xlu1 %v657_v23, %s2808_s6  ;;  %705 = vrot.lane.b32.xlu0 %v697_v34, %s2809_s7 }
  0xcf   : > { %707 = vrot.lane.b32.xlu1 %v700_v27, %s2809_s7  ;;  %709 = vrot.lane.b32.xlu0 %v702_v28, %s2809_s7 }
  0xd3   : > { %711 = vrot.lane.b32.xlu1 %v704_v40, %s2809_s7  ;;  %772 = vrot.lane.b32.xlu0 %v765_v42, %s2808_s6 }
  0xd7   : > { %770 = vrot.lane.b32.xlu1 %v762_v54, %s2808_s6  ;;  %776 = vrot.lane.b32.xlu0 %v769_v55, %s2808_s6 }
  0xdb   : > { %774 = vrot.lane.b32.xlu1 %v767_v59, %s2808_s6  ;;  %815 = vrot.lane.b32.xlu0 %v807_v38, %s2809_s7 }
  0xdf   : > { %817 = vrot.lane.b32.xlu1 %v810_v61, %s2809_s7  ;;  %819 = vrot.lane.b32.xlu0 %v812_v62, %s2809_s7 }
  0xe3   : > { %821 = vrot.lane.b32.xlu1 %v814_v1, %s2809_s7  ;;  %865 = vrot.lane.b32.xlu0 %v856_v0, %s2808_s6 }
  0xe7   : > { %867 = vrot.lane.b32.xlu1 %v857_v2, %s2808_s6  ;;  %869 = vrot.lane.b32.xlu0 %v858_v3, %s2808_s6 }
  0xeb   : > { %883 = vrot.lane.b32.xlu1 %v2713_v4, %s2807_s25 }
  0xf5   : > { %v3132_v5 = vpop.permute.xlu1 %265  ;;  %v3166_v24 = vpop.permute.xlu0 %263 }
  0xf9   : > { %v3134_v6 = vpop.permute.xlu1 %267  ;;  %v3172_v28 = vpop.permute.xlu0 %269 }
  0xfd   : > { %v3136_v7 = vpop.permute.xlu1 %297  ;;  %v3176_v30 = vpop.permute.xlu0 %295 }
 0x101   : > { %v3138_v8 = vpop.permute.xlu1 %301  ;;  %v3182_v35 = vpop.permute.xlu0 %299 }
 0x105   : > { %v3140_v9 = vpop.permute.xlu1 %564  ;;  %v3186_v37 = vpop.permute.xlu0 %566 }
 0x109   : > { %v3142_v44 = vpop.permute.xlu1 %568  ;;  %v3192_v40 = vpop.permute.xlu0 %570 }
 0x10d   : > { %v3144_v10 = vpop.permute.xlu1 %597  ;;  %v3196_v42 = vpop.permute.xlu0 %595 }
 0x111   : > { %v3146_v11 = vpop.permute.xlu1 %601  ;;  %v3202_v48 = vpop.permute.xlu0 %599 }
 0x115   : > { %v3148_v12 = vpop.permute.xlu1 %863  ;;  %v3211_v53 = vpop.permute.xlu0 %364 }
 0x116   : > { %4521 = vst [vmem:[#allocation2_spill] sm:$0xff] %v3148_v12 }
 0x119   : > { %v3150_v15 = vpop.permute.xlu1 %362  ;;  %v3214_v54 = vpop.permute.xlu0 %368 }
 0x11d   : > { %v3152_v16 = vpop.permute.xlu1 %366  ;;  %v3216_v55 = vpop.permute.xlu0 %407 }
 0x11e   : > { %4522 = vst [vmem:[#allocation3_spill] sm:$0xff] %v3152_v16 }
 0x121   : > { %v3154_v34 = vpop.permute.xlu1 %409  ;;  %v3218_v56 = vpop.permute.xlu0 %411 }
 0x122   : > { %4536 = vst [vmem:[#allocation17_spill] sm:$0xff] %v3218_v56 }
 0x125   : > { %v3156_v17 = vpop.permute.xlu1 %413  ;;  %v3220_v38 = vpop.permute.xlu0 %475 }
 0x126   : > { %4523 = vst [vmem:[#allocation4_spill] sm:$0xff] %v3156_v17  ;;  %4537 = vst [vmem:[#allocation18_spill] sm:$0xff] %v3220_v38 }
 0x129   : > { %v3158_v20 = vpop.permute.xlu1 %473  ;;  %v3222_v57 = vpop.permute.xlu0 %479 }
 0x12a   : > { %4524 = vst [vmem:[#allocation5_spill] sm:$0xff] %v3158_v20  ;;  %4538 = vst [vmem:[#allocation19_spill] sm:$0xff] %v3222_v57 }
 0x12d   : > { %v3160_v21 = vpop.permute.xlu1 %477  ;;  %v3224_v31 = vpop.permute.xlu0 %518 }
 0x12e   : > { %4525 = vst [vmem:[#allocation6_spill] sm:$0xff] %v3160_v21  ;;  %4539 = vst [vmem:[#allocation20_spill] sm:$0xff] %v3224_v31 }
 0x131   : > { %v3162_v22 = vpop.permute.xlu1 %520  ;;  %v3226_v58 = vpop.permute.xlu0 %522 }
 0x132   : > { %4526 = vst [vmem:[#allocation7_spill] sm:$0xff] %v3162_v22  ;;  %4540 = vst [vmem:[#allocation21_spill] sm:$0xff] %v3226_v58 }
 0x135   : > { %v3164_v23 = vpop.permute.xlu1 %524  ;;  %v3228_v59 = vpop.permute.xlu0 %662 }
 0x136   : > { %4527 = vst [vmem:[#allocation8_spill] sm:$0xff] %v3164_v23 }
 0x139   : > { %v3168_v25 = vpop.permute.xlu1 %660  ;;  %v3230_v60 = vpop.permute.xlu0 %666 }
 0x13a   : > { %4541 = vst [vmem:[#allocation22_spill] sm:$0xff] %v3230_v60 }
 0x13d   : > { %v3170_v27 = vpop.permute.xlu1 %664  ;;  %v3232_v61 = vpop.permute.xlu0 %705 }
 0x13e   : > { %4528 = vst [vmem:[#allocation9_spill] sm:$0xff] %v3170_v27  ;;  %4542 = vst [vmem:[#allocation23_spill] sm:$0xff] %v3232_v61 }
 0x141   : > { %v3174_v29 = vpop.permute.xlu1 %707  ;;  %v3234_v62 = vpop.permute.xlu0 %709 }
 0x142   : > { %4529 = vst [vmem:[#allocation10_spill] sm:$0xff] %v3174_v29  ;;  %4543 = vst [vmem:[#allocation24_spill] sm:$0xff] %v3234_v62 }
 0x145   : > { %v3178_v32 = vpop.permute.xlu1 %711  ;;  %v3236_v63 = vpop.permute.xlu0 %772 }
 0x146   : > { %4530 = vst [vmem:[#allocation11_spill] sm:$0xff] %v3178_v32  ;;  %4544 = vst [vmem:[#allocation25_spill] sm:$0xff] %v3236_v63 }
 0x149   : > { %v3180_v33 = vpop.permute.xlu1 %770  ;;  %v3238_v0 = vpop.permute.xlu0 %776 }
 0x14a   : > { %4531 = vst [vmem:[#allocation12_spill] sm:$0xff] %v3180_v33  ;;  %4545 = vst [vmem:[#allocation26_spill] sm:$0xff] %v3238_v0 }
 0x14d   : > { %v3184_v36 = vpop.permute.xlu1 %774  ;;  %v3240_v1 = vpop.permute.xlu0 %815 }
 0x14e   : > { %4532 = vst [vmem:[#allocation13_spill] sm:$0xff] %v3184_v36  ;;  %4546 = vst [vmem:[#allocation27_spill] sm:$0xff] %v3240_v1 }
 0x151   : > { %v3188_v39 = vpop.permute.xlu1 %817  ;;  %v3242_v2 = vpop.permute.xlu0 %819 }
 0x152   : > { %4533 = vst [vmem:[#allocation14_spill] sm:$0xff] %v3188_v39  ;;  %4547 = vst [vmem:[#allocation28_spill] sm:$0xff] %v3242_v2 }
 0x155   : > { %v3190_v26 = vpop.permute.xlu1 %821  ;;  %v3244_v3 = vpop.permute.xlu0 %865 }
 0x156   : > { %4534 = vst [vmem:[#allocation15_spill] sm:$0xff] %v3190_v26  ;;  %4548 = vst [vmem:[#allocation29_spill] sm:$0xff] %v3244_v3 }
 0x159   : > { %v3194_v41 = vpop.permute.xlu1 %867  ;;  %v3246_v4 = vpop.permute.xlu0 %869 }
 0x15a   : > { %4535 = vst [vmem:[#allocation16_spill] sm:$0xff] %v3194_v41  ;;  %4549 = vst [vmem:[#allocation30_spill] sm:$0xff] %v3246_v4 }
 0x15d   : > { %v884_v45 = vpop.permute.xlu1 %883 }
 0x15e   : > { %v887_v46 = vmul.f32 %v884_v45, %v2913_v13  ;;  %v886_v47 = vmul.f32 %v884_v45, %v2916_v14  ;;  %v889_v49 = vmul.f32 %v884_v45, %v2924_v19  ;;  %v888_v50 = vmul.f32 %v884_v45, %v2921_v18 }
 0x160   : > { %896 = vrot.lane.b32.xlu1 %v887_v46, %s2809_s7  ;;  %894 = vrot.lane.b32.xlu0 %v886_v47, %s2809_s7 }
 0x164   : > { %900 = vrot.lane.b32.xlu1 %v889_v49, %s2809_s7  ;;  %898 = vrot.lane.b32.xlu0 %v888_v50, %s2809_s7 }
 0x168   : > { %934 = vrot.lane.b32.xlu0 %v2715_v51, %s2806_s24 }
 0x1d2   : > { %v3248_v45 = vpop.permute.xlu0 %894 }
 0x1d3   : > { %4550 = vst [vmem:[#allocation31_spill] sm:$0xff] %v3248_v45 }
 0x1d6   : > { %v3250_v46 = vpop.permute.xlu0 %898 }
 0x1d7   : > { %4551 = vst [vmem:[#allocation32_spill] sm:$0xff] %v3250_v46 }
 0x1da   : > { %v935_v47 = vpop.permute.xlu0 %934 }
 0x1db   : > { %v938_v49 = vmul.f32 %v935_v47, %v2913_v13  ;;  %v940_v50 = vmul.f32 %v935_v47, %v2924_v19  ;;  %v937_v51 = vmul.f32 %v935_v47, %v2916_v14  ;;  %v939_v26 = vmul.f32 %v935_v47, %v2921_v18 }
 0x1dc   : > { %v942_v36 = vmul.f32 %v935_v47, %v2965_v43  ;;  %v941_v2 = vmul.f32 %v935_v47, %v2975_v52 }
 0x1dd   : > { %v952_v0 = vrot.slane %v938_v49, 1  ;;  %v953_v58 = vrot.slane %v940_v50, 1  ;;  %v949_v23 = vrot.slane %v937_v51, 1  ;;  %v950_v41 = vrot.slane %v939_v26, 1  ;;  %v2716_v26 = vld [vmem:[%s4514_s1 + $0x17] ss:$0 sm:$0xff] }
 0x1de   : > { %v957_v31 = vrot.slane %v942_v36, 1  ;;  %v955_v22 = vrot.slane %v941_v2, 1 }
 0x1df   : > { %v954_v4 = vsel %vm321_vm0, %v952_v0, %v953_v58  ;;  %v951_v46 = vsel %vm321_vm0, %v949_v23, %v950_v41  ;;  %v3270_v23 = vpop.permute.xlu1 %896 }
 0x1e0   : > { %961 = vrot.lane.b32.xlu0 %v954_v4, %s2808_s6  ;;  %959 = vrot.lane.b32.xlu1 %v951_v46, %s2808_s6  ;;  %v958_v1 = vsel %vm321_vm0, %v953_v58, %v957_v31  ;;  %v956_v39 = vsel %vm321_vm0, %v950_v41, %v955_v22  ;;  %4552 = vst [vmem:[#allocation33_spill] sm:$0xff] %v3270_v23 }
 0x1e3   : > { %v3272_v36 = vpop.permute.xlu1 %900 }
 0x1e4   : > { %965 = vrot.lane.b32.xlu0 %v958_v1, %s2808_s6  ;;  %963 = vrot.lane.b32.xlu1 %v956_v39, %s2808_s6  ;;  %4553 = vst [vmem:[#allocation34_spill] sm:$0xff] %v3272_v36 }
 0x1e8   : > { %979 = vrot.lane.b32.xlu1 %v2716_v26, %s2807_s25 }
 0x252   : > { %v3274_v0 = vpop.permute.xlu1 %959 }
 0x253   : > { %4554 = vst [vmem:[#allocation35_spill] sm:$0xff] %v3274_v0 }
 0x256   : > { %v3276_v2 = vpop.permute.xlu1 %963 }
 0x257   : > { %4555 = vst [vmem:[#allocation36_spill] sm:$0xff] %v3276_v2 }
 0x25a   : > { %v980_v31 = vpop.permute.xlu1 %979 }
 0x25b   : > { %v983_v22 = vmul.f32 %v980_v31, %v2913_v13  ;;  %v985_v41 = vmul.f32 %v980_v31, %v2924_v19  ;;  %v982_v39 = vmul.f32 %v980_v31, %v2916_v14  ;;  %v984_v58 = vmul.f32 %v980_v31, %v2921_v18 }
 0x25c   : > { %v987_v1 = vmul.f32 %v980_v31, %v2965_v43  ;;  %v986_v4 = vmul.f32 %v980_v31, %v2975_v52  ;;  %v2718_v31 = vld [vmem:[%s4514_s1 + $0x19] ss:$0 sm:$0xff] }
 0x25d   : > { %v997_v46 = vrot.slane %v983_v22, 1  ;;  %v998_v47 = vrot.slane %v985_v41, 1  ;;  %v994_v49 = vrot.slane %v982_v39, 1  ;;  %v995_v50 = vrot.slane %v984_v58, 1  ;;  %v3296_v22 = vpop.permute.xlu0 %961 }
 0x25e   : > { %v1002_v2 = vrot.slane %v987_v1, 1  ;;  %v1000_v0 = vrot.slane %v986_v4, 1  ;;  %4556 = vst [vmem:[#allocation37_spill] sm:$0xff] %v3296_v22 }
 0x25f   : > { %v999_v51 = vsel %vm321_vm0, %v997_v46, %v998_v47  ;;  %v996_v26 = vsel %vm321_vm0, %v994_v49, %v995_v50 }
 0x260   : > { %1006 = vrot.lane.b32.xlu1 %v999_v51, %s2809_s7  ;;  %1004 = vrot.lane.b32.xlu0 %v996_v26, %s2809_s7  ;;  %v1003_v36 = vsel %vm321_vm0, %v998_v47, %v1002_v2  ;;  %v1001_v45 = vsel %vm321_vm0, %v995_v50, %v1000_v0 }
 0x261   : > { %v3298_v41 = vpop.permute.xlu0 %965 }
 0x262   : > { %4557 = vst [vmem:[#allocation38_spill] sm:$0xff] %v3298_v41 }
 0x264   : > { %1010 = vrot.lane.b32.xlu1 %v1003_v36, %s2809_s7  ;;  %1008 = vrot.lane.b32.xlu0 %v1001_v45, %s2809_s7 }
 0x268   : > { %1044 = vrot.lane.b32.xlu0 %v2718_v31, %s2806_s24 }
 0x2d2   : > { %v3300_v39 = vpop.permute.xlu0 %1004 }
 0x2d3   : > { %4558 = vst [vmem:[#allocation39_spill] sm:$0xff] %v3300_v39 }
 0x2d6   : > { %v3302_v58 = vpop.permute.xlu0 %1008 }
 0x2d7   : > { %4559 = vst [vmem:[#allocation40_spill] sm:$0xff] %v3302_v58 }
 0x2da   : > { %v1045_v2 = vpop.permute.xlu0 %1044 }
 0x2db   : > { %v1048_v0 = vmul.f32 %v1045_v2, %v2913_v13  ;;  %v1050_v36 = vmul.f32 %v1045_v2, %v2924_v19  ;;  %v1047_v45 = vmul.f32 %v1045_v2, %v2916_v14  ;;  %v1049_v1 = vmul.f32 %v1045_v2, %v2921_v18 }
 0x2dc   : > { %v1052_v4 = vmul.f32 %v1045_v2, %v2965_v43  ;;  %v1051_v46 = vmul.f32 %v1045_v2, %v2975_v52  ;;  %v2719_v2 = vld [vmem:[%s4514_s1 + $0x1a] ss:$0 sm:$0xff] }
 0x2dd   : > { %v1062_v47 = vrot.slane %v1048_v0, 2  ;;  %v1063_v49 = vrot.slane %v1050_v36, 2  ;;  %v1059_v50 = vrot.slane %v1047_v45, 2  ;;  %v1060_v51 = vrot.slane %v1049_v1, 2  ;;  %v3322_v0 = vpop.permute.xlu1 %1006 }
 0x2de   : > { %v1067_v58 = vrot.slane %v1052_v4, 2  ;;  %v1065_v41 = vrot.slane %v1051_v46, 2  ;;  %4560 = vst [vmem:[#allocation41_spill] sm:$0xff] %v3322_v0 }
 0x2df   : > { %v1064_v26 = vsel %vm432_vm1, %v1062_v47, %v1063_v49  ;;  %v1061_v31 = vsel %vm432_vm1, %v1059_v50, %v1060_v51 }
 0x2e0   : > { %1071 = vrot.lane.b32.xlu0 %v1064_v26, %s2808_s6  ;;  %1069 = vrot.lane.b32.xlu1 %v1061_v31, %s2808_s6  ;;  %v1068_v39 = vsel %vm432_vm1, %v1063_v49, %v1067_v58  ;;  %v1066_v22 = vsel %vm432_vm1, %v1060_v51, %v1065_v41 }
 0x2e1   : > { %v3324_v36 = vpop.permute.xlu1 %1010 }
 0x2e2   : > { %4561 = vst [vmem:[#allocation42_spill] sm:$0xff] %v3324_v36 }
 0x2e4   : > { %1075 = vrot.lane.b32.xlu0 %v1068_v39, %s2808_s6  ;;  %1073 = vrot.lane.b32.xlu1 %v1066_v22, %s2808_s6 }
 0x2e8   : > { %1089 = vrot.lane.b32.xlu1 %v2719_v2, %s2807_s25 }
 0x352   : > { %v3326_v45 = vpop.permute.xlu1 %1069 }
 0x353   : > { %4562 = vst [vmem:[#allocation43_spill] sm:$0xff] %v3326_v45 }
 0x356   : > { %v3328_v1 = vpop.permute.xlu1 %1073 }
 0x357   : > { %4563 = vst [vmem:[#allocation44_spill] sm:$0xff] %v3328_v1 }
 0x35a   : > { %v1090_v58 = vpop.permute.xlu1 %1089 }
 0x35b   : > { %v1093_v41 = vmul.f32 %v1090_v58, %v2913_v13  ;;  %v1095_v39 = vmul.f32 %v1090_v58, %v2924_v19  ;;  %v1092_v22 = vmul.f32 %v1090_v58, %v2916_v14  ;;  %v1094_v4 = vmul.f32 %v1090_v58, %v2921_v18 }
 0x35c   : > { %v1097_v46 = vmul.f32 %v1090_v58, %v2965_v43  ;;  %v1096_v47 = vmul.f32 %v1090_v58, %v2975_v52  ;;  %v2722_v58 = vld [vmem:[%s4514_s1 + $0x1c] ss:$0 sm:$0xff] }
 0x35d   : > { %v1107_v49 = vrot.slane %v1093_v41, 2  ;;  %v1108_v50 = vrot.slane %v1095_v39, 2  ;;  %v1104_v51 = vrot.slane %v1092_v22, 2  ;;  %v1105_v26 = vrot.slane %v1094_v4, 2  ;;  %v3348_v41 = vpop.permute.xlu0 %1071 }
 0x35e   : > { %v1112_v1 = vrot.slane %v1097_v46, 2  ;;  %v1110_v45 = vrot.slane %v1096_v47, 2  ;;  %4564 = vst [vmem:[#allocation45_spill] sm:$0xff] %v3348_v41  ;;  %v2723_v47 = vld [vmem:[%s4514_s1 + $0x1d] ss:$0 sm:$0xff] }
 0x35f   : > { %v1109_v31 = vsel %vm432_vm1, %v1107_v49, %v1108_v50  ;;  %v1106_v2 = vsel %vm432_vm1, %v1104_v51, %v1105_v26 }
 0x360   : > { %1116 = vrot.lane.b32.xlu1 %v1109_v31, %s2809_s7  ;;  %1114 = vrot.lane.b32.xlu0 %v1106_v2, %s2809_s7  ;;  %v1113_v36 = vsel %vm432_vm1, %v1108_v50, %v1112_v1  ;;  %v1111_v0 = vsel %vm432_vm1, %v1105_v26, %v1110_v45 }
 0x361   : > { %v3350_v39 = vpop.permute.xlu0 %1075 }
 0x362   : > { %4565 = vst [vmem:[#allocation46_spill] sm:$0xff] %v3350_v39 }
 0x364   : > { %1120 = vrot.lane.b32.xlu1 %v1113_v36, %s2809_s7  ;;  %1118 = vrot.lane.b32.xlu0 %v1111_v0, %s2809_s7 }
 0x368   : > { %1151 = vrot.lane.b32.xlu0 %v2722_v58, %s2806_s24 }
 0x3d2   : > { %v3352_v22 = vpop.permute.xlu0 %1114  ;;  %v3368_v49 = vpop.permute.xlu1 %1116 }
 0x3d3   : > { %4566 = vst [vmem:[#allocation47_spill] sm:$0xff] %v3352_v22  ;;  %4568 = vst [vmem:[#allocation49_spill] sm:$0xff] %v3368_v49 }
 0x3d6   : > { %v3354_v4 = vpop.permute.xlu0 %1118  ;;  %v3370_v50 = vpop.permute.xlu1 %1120 }
 0x3d7   : > { %4567 = vst [vmem:[#allocation48_spill] sm:$0xff] %v3354_v4  ;;  %4569 = vst [vmem:[#allocation50_spill] sm:$0xff] %v3370_v50 }
 0x3da   : > { %v1152_v1 = vpop.permute.xlu0 %1151 }
 0x3db   : > { %v1155_v45 = vmul.f32 %v1152_v1, %v2913_v13  ;;  %v1154_v36 = vmul.f32 %v1152_v1, %v2916_v14  ;;  %v1157_v0 = vmul.f32 %v1152_v1, %v2924_v19  ;;  %v1156_v46 = vmul.f32 %v1152_v1, %v2921_v18 }
 0x3dd   : > { %1164 = vrot.lane.b32.xlu0 %v1155_v45, %s2808_s6  ;;  %1162 = vrot.lane.b32.xlu1 %v1154_v36, %s2808_s6  ;;  %v2725_v36 = vld [vmem:[%s4514_s1 + $0x1f] ss:$0 sm:$0xff] }
 0x3e1   : > { %1168 = vrot.lane.b32.xlu0 %v1157_v0, %s2808_s6  ;;  %1166 = vrot.lane.b32.xlu1 %v1156_v46, %s2808_s6 }
 0x3e5   : > { %1182 = vrot.lane.b32.xlu1 %v2723_v47, %s2807_s25 }
 0x44f   : > { %v3372_v51 = vpop.permute.xlu1 %1162  ;;  %v3388_v0 = vpop.permute.xlu0 %1164 }
 0x450   : > { %4570 = vst [vmem:[#allocation51_spill] sm:$0xff] %v3372_v51  ;;  %4572 = vst [vmem:[#allocation53_spill] sm:$0xff] %v3388_v0 }
 0x453   : > { %v3374_v26 = vpop.permute.xlu1 %1166  ;;  %v3390_v46 = vpop.permute.xlu0 %1168 }
 0x454   : > { %4571 = vst [vmem:[#allocation52_spill] sm:$0xff] %v3374_v26  ;;  %4573 = vst [vmem:[#allocation54_spill] sm:$0xff] %v3390_v46 }
 0x457   : > { %v1183_v31 = vpop.permute.xlu1 %1182 }
 0x458   : > { %v1186_v2 = vmul.f32 %v1183_v31, %v2913_v13  ;;  %v1185_v58 = vmul.f32 %v1183_v31, %v2916_v14  ;;  %v1188_v1 = vmul.f32 %v1183_v31, %v2924_v19  ;;  %v1187_v45 = vmul.f32 %v1183_v31, %v2921_v18 }
 0x45a   : > { %1195 = vrot.lane.b32.xlu1 %v1186_v2, %s2809_s7  ;;  %1193 = vrot.lane.b32.xlu0 %v1185_v58, %s2809_s7 }
 0x45e   : > { %1199 = vrot.lane.b32.xlu1 %v1188_v1, %s2809_s7  ;;  %1197 = vrot.lane.b32.xlu0 %v1187_v45, %s2809_s7 }
 0x462   : > { %1233 = vrot.lane.b32.xlu0 %v2725_v36, %s2806_s24 }
 0x4cc   : > { %v3392_v47 = vpop.permute.xlu0 %1193 }
 0x4cd   : > { %4574 = vst [vmem:[#allocation55_spill] sm:$0xff] %v3392_v47 }
 0x4d0   : > { %v3394_v2 = vpop.permute.xlu0 %1197 }
 0x4d1   : > { %4575 = vst [vmem:[#allocation56_spill] sm:$0xff] %v3394_v2 }
 0x4d4   : > { %v1234_v58 = vpop.permute.xlu0 %1233 }
 0x4d5   : > { %v1237_v31 = vmul.f32 %v1234_v58, %v2913_v13  ;;  %v1239_v1 = vmul.f32 %v1234_v58, %v2924_v19  ;;  %v1236_v45 = vmul.f32 %v1234_v58, %v2916_v14  ;;  %v1238_v4 = vmul.f32 %v1234_v58, %v2921_v18 }
 0x4d6   : > { %v1241_v50 = vmul.f32 %v1234_v58, %v2965_v43  ;;  %v1240_v36 = vmul.f32 %v1234_v58, %v2975_v52 }
 0x4d7   : > { %v1251_v39 = vrot.slane %v1237_v31, 1  ;;  %v1252_v22 = vrot.slane %v1239_v1, 1  ;;  %v1248_v49 = vrot.slane %v1236_v45, 1  ;;  %v1249_v26 = vrot.slane %v1238_v4, 1  ;;  %v3414_v4 = vpop.permute.xlu1 %1195 }
 0x4d8   : > { %v1256_v41 = vrot.slane %v1241_v50, 1  ;;  %v1254_v47 = vrot.slane %v1240_v36, 1  ;;  %4576 = vst [vmem:[#allocation57_spill] sm:$0xff] %v3414_v4 }
 0x4d9   : > { %v1253_v46 = vsel %vm321_vm0, %v1251_v39, %v1252_v22  ;;  %v1250_v2 = vsel %vm321_vm0, %v1248_v49, %v1249_v26  ;;  %v2726_v39 = vld [vmem:[%s4514_s1 + $0x20] ss:$0 sm:$0xff] }
 0x4da   : > { %1260 = vrot.lane.b32.xlu0 %v1253_v46, %s2808_s6  ;;  %1258 = vrot.lane.b32.xlu1 %v1250_v2, %s2808_s6  ;;  %v1257_v51 = vsel %vm321_vm0, %v1252_v22, %v1256_v41  ;;  %v1255_v0 = vsel %vm321_vm0, %v1249_v26, %v1254_v47 }
 0x4db   : > { %v3416_v49 = vpop.permute.xlu1 %1199 }
 0x4dc   : > { %4577 = vst [vmem:[#allocation58_spill] sm:$0xff] %v3416_v49 }
 0x4de   : > { %1264 = vrot.lane.b32.xlu0 %v1257_v51, %s2808_s6  ;;  %1262 = vrot.lane.b32.xlu1 %v1255_v0, %s2808_s6 }
 0x4e2   : > { %1278 = vrot.lane.b32.xlu1 %v2726_v39, %s2807_s25 }
 0x54c   : > { %v3418_v50 = vpop.permute.xlu1 %1258 }
 0x54d   : > { %4578 = vst [vmem:[#allocation59_spill] sm:$0xff] %v3418_v50 }
 0x550   : > { %v3420_v46 = vpop.permute.xlu1 %1262 }
 0x551   : > { %4579 = vst [vmem:[#allocation60_spill] sm:$0xff] %v3420_v46 }
 0x554   : > { %v1279_v41 = vpop.permute.xlu1 %1278 }
 0x555   : > { %v1282_v22 = vmul.f32 %v1279_v41, %v2913_v13  ;;  %v1284_v51 = vmul.f32 %v1279_v41, %v2924_v19  ;;  %v1281_v26 = vmul.f32 %v1279_v41, %v2916_v14  ;;  %v1283_v0 = vmul.f32 %v1279_v41, %v2921_v18 }
 0x556   : > { %v1286_v47 = vmul.f32 %v1279_v41, %v2965_v43  ;;  %v1285_v2 = vmul.f32 %v1279_v41, %v2975_v52  ;;  %v2728_v41 = vld [vmem:[%s4514_s1 + $0x22] ss:$0 sm:$0xff] }
 0x557   : > { %v1296_v58 = vrot.slane %v1282_v22, 1  ;;  %v1297_v31 = vrot.slane %v1284_v51, 1  ;;  %v1293_v1 = vrot.slane %v1281_v26, 1  ;;  %v1294_v45 = vrot.slane %v1283_v0, 1  ;;  %v3440_v22 = vpop.permute.xlu0 %1260 }
 0x558   : > { %v1301_v46 = vrot.slane %v1286_v47, 1  ;;  %v1299_v50 = vrot.slane %v1285_v2, 1  ;;  %4580 = vst [vmem:[#allocation61_spill] sm:$0xff] %v3440_v22 }
 0x559   : > { %v1298_v36 = vsel %vm321_vm0, %v1296_v58, %v1297_v31  ;;  %v1295_v39 = vsel %vm321_vm0, %v1293_v1, %v1294_v45 }
 0x55a   : > { %1305 = vrot.lane.b32.xlu1 %v1298_v36, %s2809_s7  ;;  %1303 = vrot.lane.b32.xlu0 %v1295_v39, %s2809_s7  ;;  %v1302_v49 = vsel %vm321_vm0, %v1297_v31, %v1301_v46  ;;  %v1300_v4 = vsel %vm321_vm0, %v1294_v45, %v1299_v50 }
 0x55b   : > { %v3442_v51 = vpop.permute.xlu0 %1264 }
 0x55c   : > { %4581 = vst [vmem:[#allocation62_spill] sm:$0xff] %v3442_v51 }
 0x55e   : > { %1309 = vrot.lane.b32.xlu1 %v1302_v49, %s2809_s7  ;;  %1307 = vrot.lane.b32.xlu0 %v1300_v4, %s2809_s7 }
 0x562   : > { %1343 = vrot.lane.b32.xlu0 %v2728_v41, %s2806_s24 }
 0x5cc   : > { %v3444_v26 = vpop.permute.xlu0 %1303 }
 0x5cd   : > { %4582 = vst [vmem:[#allocation63_spill] sm:$0xff] %v3444_v26 }
 0x5d0   : > { %v3446_v0 = vpop.permute.xlu0 %1307 }
 0x5d1   : > { %4583 = vst [vmem:[#allocation64_spill] sm:$0xff] %v3446_v0 }
 0x5d4   : > { %v1344_v46 = vpop.permute.xlu0 %1343 }
 0x5d5   : > { %v1347_v50 = vmul.f32 %v1344_v46, %v2913_v13  ;;  %v1349_v49 = vmul.f32 %v1344_v46, %v2924_v19  ;;  %v1346_v4 = vmul.f32 %v1344_v46, %v2916_v14  ;;  %v1348_v47 = vmul.f32 %v1344_v46, %v2921_v18 }
 0x5d6   : > { %v1351_v2 = vmul.f32 %v1344_v46, %v2965_v43  ;;  %v1350_v58 = vmul.f32 %v1344_v46, %v2975_v52  ;;  %v2729_v46 = vld [vmem:[%s4514_s1 + $0x23] ss:$0 sm:$0xff] }
 0x5d7   : > { %v1361_v31 = vrot.slane %v1347_v50, 2  ;;  %v1362_v1 = vrot.slane %v1349_v49, 2  ;;  %v1358_v45 = vrot.slane %v1346_v4, 2  ;;  %v1359_v36 = vrot.slane %v1348_v47, 2  ;;  %v3466_v50 = vpop.permute.xlu1 %1305 }
 0x5d8   : > { %v1366_v0 = vrot.slane %v1351_v2, 2  ;;  %v1364_v26 = vrot.slane %v1350_v58, 2  ;;  %4584 = vst [vmem:[#allocation65_spill] sm:$0xff] %v3466_v50 }
 0x5d9   : > { %v1363_v39 = vsel %vm432_vm1, %v1361_v31, %v1362_v1  ;;  %v1360_v41 = vsel %vm432_vm1, %v1358_v45, %v1359_v36 }
 0x5da   : > { %1370 = vrot.lane.b32.xlu0 %v1363_v39, %s2808_s6  ;;  %1368 = vrot.lane.b32.xlu1 %v1360_v41, %s2808_s6  ;;  %v1367_v51 = vsel %vm432_vm1, %v1362_v1, %v1366_v0  ;;  %v1365_v22 = vsel %vm432_vm1, %v1359_v36, %v1364_v26 }
 0x5db   : > { %v3468_v49 = vpop.permute.xlu1 %1309 }
 0x5dc   : > { %4585 = vst [vmem:[#allocation66_spill] sm:$0xff] %v3468_v49 }
 0x5de   : > { %1374 = vrot.lane.b32.xlu0 %v1367_v51, %s2808_s6  ;;  %1372 = vrot.lane.b32.xlu1 %v1365_v22, %s2808_s6 }
 0x5e2   : > { %1388 = vrot.lane.b32.xlu1 %v2729_v46, %s2807_s25 }
 0x64c   : > { %v3470_v4 = vpop.permute.xlu1 %1368 }
 0x64d   : > { %4586 = vst [vmem:[#allocation67_spill] sm:$0xff] %v3470_v4 }
 0x650   : > { %v3472_v47 = vpop.permute.xlu1 %1372 }
 0x651   : > { %4587 = vst [vmem:[#allocation68_spill] sm:$0xff] %v3472_v47 }
 0x654   : > { %v1389_v0 = vpop.permute.xlu1 %1388 }
 0x655   : > { %v1392_v26 = vmul.f32 %v1389_v0, %v2913_v13  ;;  %v1394_v51 = vmul.f32 %v1389_v0, %v2924_v19  ;;  %v1391_v22 = vmul.f32 %v1389_v0, %v2916_v14  ;;  %v1393_v2 = vmul.f32 %v1389_v0, %v2921_v18  ;;  %v2732_v19 = vld [vmem:[%s4516_s3 + $0x1] ss:$0 sm:$0xff] }
 0x656   : > { %v1396_v58 = vmul.f32 %v1389_v0, %v2965_v43  ;;  %v1395_v31 = vmul.f32 %v1389_v0, %v2975_v52  ;;  %v3492_v43 = vpop.permute.xlu0 %1370 }
 0x657   : > { %v1406_v1 = vrot.slane %v1392_v26, 2  ;;  %v1407_v45 = vrot.slane %v1394_v51, 2  ;;  %v1403_v36 = vrot.slane %v1391_v22, 2  ;;  %v1404_v39 = vrot.slane %v1393_v2, 2  ;;  %4588 = vst [vmem:[#allocation69_spill] sm:$0xff] %v3492_v43  ;;  %v3501_v51 = vld [vmem:[%s2910_s30 + $0x8] sm:$0xff] }
 0x658   : > { %v1411_v13 = vrot.slane %v1396_v58, 2  ;;  %v1409_v47 = vrot.slane %v1395_v31, 2  ;;  %v3505_v2 = vld [vmem:[%s2910_s30] sm:$0xff]  ;;  %v3511_v31 = vld [vmem:[%s2910_s30 + $0x18] sm:$0xff] }
 0x659   : > { %v1408_v41 = vsel %vm432_vm1, %v1406_v1, %v1407_v45  ;;  %v1405_v46 = vsel %vm432_vm1, %v1403_v36, %v1404_v39 }
 0x65a   : > { %1415 = vrot.lane.b32.xlu1 %v1408_v41, %s2809_s7  ;;  %1413 = vrot.lane.b32.xlu0 %v1405_v46, %s2809_s7  ;;  %v1412_v14 = vsel %vm432_vm1, %v1407_v45, %v1411_v13  ;;  %v1410_v18 = vsel %vm432_vm1, %v1404_v39, %v1409_v47  ;;  %v3494_v52 = vpop.permute.xlu0 %1374  ;;  %v3515_v45 = vld [vmem:[%s2910_s30 + $0x10] sm:$0xff]  ;;  %v2733_v39 = vld [vmem:[%s4516_s3 + $0x2] ss:$0 sm:$0xff] }
 0x65b   : > { %4589 = vst [vmem:[#allocation70_spill] sm:$0xff] %v3494_v52  ;;  %v3557_v52 = vld [vmem:[%s2910_s30 + $0x28] sm:$0x3] }
 0x65e   : > { %1419 = vrot.lane.b32.xlu1 %v1412_v14, %s2809_s7  ;;  %1417 = vrot.lane.b32.xlu0 %v1410_v18, %s2809_s7 }
 0x662   : > { %1450 = vrot.lane.b32.xlu0 %v2732_v19, %s2806_s24 }
 0x6cc   : > { %v3496_v0 = vpop.permute.xlu0 %1413  ;;  %v3524_v41 = vpop.permute.xlu1 %1415 }
 0x6cd   : > { %4590 = vst [vmem:[#allocation71_spill] sm:$0xff] %v3496_v0  ;;  %4592 = vst [vmem:[#allocation73_spill] sm:$0xff] %v3524_v41  ;;  %v3561_v0 = vld [vmem:[%s2910_s30 + $0x20] sm:$0x3] }
 0x6d0   : > { %v3498_v26 = vpop.permute.xlu0 %1417  ;;  %v3526_v46 = vpop.permute.xlu1 %1419 }
 0x6d1   : > { %4591 = vst [vmem:[#allocation72_spill] sm:$0xff] %v3498_v26  ;;  %4593 = vst [vmem:[#allocation74_spill] sm:$0xff] %v3526_v46 }
 0x6d4   : > { %v1451_v47 = vpop.permute.xlu0 %1450 }
 0x6d5   : > { %v1454_v22 = vmul.f32 %v3501_v51, %v1451_v47  ;;  %v1453_v58 = vmul.f32 %v3505_v2, %v1451_v47  ;;  %v1456_v1 = vmul.f32 %v3511_v31, %v1451_v47  ;;  %v1455_v36 = vmul.f32 %v3515_v45, %v1451_v47 }
 0x6d7   : > { %1463 = vrot.lane.b32.xlu0 %v1454_v22, %s2808_s6  ;;  %1461 = vrot.lane.b32.xlu1 %v1453_v58, %s2808_s6 }
 0x6db   : > { %1467 = vrot.lane.b32.xlu0 %v1456_v1, %s2808_s6  ;;  %1465 = vrot.lane.b32.xlu1 %v1455_v36, %s2808_s6  ;;  %v2735_v1 = vld [vmem:[%s4516_s3 + $0x4] ss:$0 sm:$0xff] }
 0x6df   : > { %1481 = vrot.lane.b32.xlu1 %v2733_v39, %s2807_s25 }
 0x749   : > { %v3528_v13 = vpop.permute.xlu1 %1461  ;;  %v3544_v36 = vpop.permute.xlu0 %1463 }
 0x74d   : > { %v3530_v14 = vpop.permute.xlu1 %1465  ;;  %v3546_v39 = vpop.permute.xlu0 %1467 }
 0x751   : > { %v1482_v18 = vpop.permute.xlu1 %1481 }
 0x752   : > { %v1485_v19 = vmul.f32 %v3501_v51, %v1482_v18  ;;  %v1484_v47 = vmul.f32 %v3505_v2, %v1482_v18  ;;  %v1487_v22 = vmul.f32 %v3511_v31, %v1482_v18  ;;  %v1486_v58 = vmul.f32 %v3515_v45, %v1482_v18 }
 0x754   : > { %1494 = vrot.lane.b32.xlu1 %v1485_v19, %s2809_s7  ;;  %1492 = vrot.lane.b32.xlu0 %v1484_v47, %s2809_s7 }
 0x758   : > { %1498 = vrot.lane.b32.xlu1 %v1487_v22, %s2809_s7  ;;  %1496 = vrot.lane.b32.xlu0 %v1486_v58, %s2809_s7 }
 0x75c   : > { %1532 = vrot.lane.b32.xlu0 %v2735_v1, %s2806_s24 }
 0x7c6   : > { %v3548_v19 = vpop.permute.xlu0 %1492 }
 0x7ca   : > { %v3550_v47 = vpop.permute.xlu0 %1496 }
 0x7ce   : > { %v1533_v18 = vpop.permute.xlu0 %1532 }
 0x7cf   : > { %v1536_v26 = vmul.f32 %v3501_v51, %v1533_v18  ;;  %v1538_v22 = vmul.f32 %v3511_v31, %v1533_v18  ;;  %v1535_v58 = vmul.f32 %v3505_v2, %v1533_v18  ;;  %v1537_v46 = vmul.f32 %v3515_v45, %v1533_v18 }
 0x7d0   : > { %v1540_v1 = vmul.f32 %v3557_v52, %v1533_v18  ;;  %v1539_v41 = vmul.f32 %v3561_v0, %v1533_v18 }
 0x7d1   : > { %v1550_v4 = vrot.slane %v1536_v26, 1  ;;  %v1551_v43 = vrot.slane %v1538_v22, 1  ;;  %v1547_v49 = vrot.slane %v1535_v58, 1  ;;  %v1548_v50 = vrot.slane %v1537_v46, 1 }
 0x7d2   : > { %v1555_v63 = vrot.slane %v1540_v1, 1  ;;  %v1553_v21 = vrot.slane %v1539_v41, 1 }
 0x7d3   : > { %v1552_v23 = vsel %vm321_vm0, %v1550_v4, %v1551_v43  ;;  %v1549_v33 = vsel %vm321_vm0, %v1547_v49, %v1548_v50  ;;  %v2736_v4 = vld [vmem:[%s4516_s3 + $0x5] ss:$0 sm:$0xff]  ;;  %v3576_v49 = vpop.permute.xlu1 %1494 }
 0x7d4   : > { %1559 = vrot.lane.b32.xlu0 %v1552_v23, %s2808_s6  ;;  %1557 = vrot.lane.b32.xlu1 %v1549_v33, %s2808_s6  ;;  %v1556_v57 = vsel %vm321_vm0, %v1551_v43, %v1555_v63  ;;  %v1554_v20 = vsel %vm321_vm0, %v1548_v50, %v1553_v21 }
 0x7d7   : > { %v3578_v26 = vpop.permute.xlu1 %1498 }
 0x7d8   : > { %1563 = vrot.lane.b32.xlu0 %v1556_v57, %s2808_s6  ;;  %1561 = vrot.lane.b32.xlu1 %v1554_v20, %s2808_s6 }
 0x7dc   : > { %1577 = vrot.lane.b32.xlu1 %v2736_v4, %s2807_s25 }
 0x846   : > { %v3580_v23 = vpop.permute.xlu1 %1557 }
 0x84a   : > { %v3582_v33 = vpop.permute.xlu1 %1561 }
 0x84e   : > { %v1578_v63 = vpop.permute.xlu1 %1577 }
 0x84f   : > { %v1581_v21 = vmul.f32 %v3501_v51, %v1578_v63  ;;  %v1583_v57 = vmul.f32 %v3511_v31, %v1578_v63  ;;  %v1580_v20 = vmul.f32 %v3505_v2, %v1578_v63  ;;  %v1582_v50 = vmul.f32 %v3515_v45, %v1578_v63 }
 0x850   : > { %v1585_v43 = vmul.f32 %v3557_v52, %v1578_v63  ;;  %v1584_v41 = vmul.f32 %v3561_v0, %v1578_v63  ;;  %v2738_v63 = vld [vmem:[%s4516_s3 + $0x7] ss:$0 sm:$0xff] }
 0x851   : > { %v1595_v46 = vrot.slane %v1581_v21, 1  ;;  %v1596_v18 = vrot.slane %v1583_v57, 1  ;;  %v1592_v22 = vrot.slane %v1580_v20, 1  ;;  %v1593_v58 = vrot.slane %v1582_v50, 1  ;;  %v3602_v21 = vpop.permute.xlu0 %1559 }
 0x852   : > { %v1600_v38 = vrot.slane %v1585_v43, 1  ;;  %v1598_v12 = vrot.slane %v1584_v41, 1 }
 0x853   : > { %v1597_v1 = vsel %vm321_vm0, %v1595_v46, %v1596_v18  ;;  %v1594_v4 = vsel %vm321_vm0, %v1592_v22, %v1593_v58 }
 0x854   : > { %1604 = vrot.lane.b32.xlu1 %v1597_v1, %s2809_s7  ;;  %1602 = vrot.lane.b32.xlu0 %v1594_v4, %s2809_s7  ;;  %v1601_v3 = vsel %vm321_vm0, %v1596_v18, %v1600_v38  ;;  %v1599_v62 = vsel %vm321_vm0, %v1593_v58, %v1598_v12 }
 0x855   : > { %v3604_v57 = vpop.permute.xlu0 %1563 }
 0x858   : > { %1608 = vrot.lane.b32.xlu1 %v1601_v3, %s2809_s7  ;;  %1606 = vrot.lane.b32.xlu0 %v1599_v62, %s2809_s7 }
 0x85c   : > { %1642 = vrot.lane.b32.xlu0 %v2738_v63, %s2806_s24 }
 0x8c6   : > { %v3606_v20 = vpop.permute.xlu0 %1602 }
 0x8ca   : > { %v3608_v50 = vpop.permute.xlu0 %1606 }
 0x8ce   : > { %v1643_v38 = vpop.permute.xlu0 %1642 }
 0x8cf   : > { %v1646_v12 = vmul.f32 %v3501_v51, %v1643_v38  ;;  %v1648_v3 = vmul.f32 %v3511_v31, %v1643_v38  ;;  %v1645_v62 = vmul.f32 %v3505_v2, %v1643_v38  ;;  %v1647_v43 = vmul.f32 %v3515_v45, %v1643_v38 }
 0x8d0   : > { %v1650_v41 = vmul.f32 %v3557_v52, %v1643_v38  ;;  %v1649_v46 = vmul.f32 %v3561_v0, %v1643_v38  ;;  %v2739_v38 = vld [vmem:[%s4516_s3 + $0x8] ss:$0 sm:$0xff] }
 0x8d1   : > { %v1660_v18 = vrot.slane %v1646_v12, 2  ;;  %v1661_v22 = vrot.slane %v1648_v3, 2  ;;  %v1657_v58 = vrot.slane %v1645_v62, 2  ;;  %v1658_v1 = vrot.slane %v1647_v43, 2  ;;  %v1605_v12 = vpop.permute.xlu1 %1604 }
 0x8d2   : > { %v1665_v32 = vrot.slane %v1650_v41, 2  ;;  %v1663_v27 = vrot.slane %v1649_v46, 2 }
 0x8d3   : > { %v1662_v4 = vsel %vm432_vm1, %v1660_v18, %v1661_v22  ;;  %v1659_v63 = vsel %vm432_vm1, %v1657_v58, %v1658_v1 }
 0x8d4   : > { %1669 = vrot.lane.b32.xlu0 %v1662_v4, %s2808_s6  ;;  %1667 = vrot.lane.b32.xlu1 %v1659_v63, %s2808_s6  ;;  %v1666_v60 = vsel %vm432_vm1, %v1661_v22, %v1665_v32  ;;  %v1664_v56 = vsel %vm432_vm1, %v1658_v1, %v1663_v27 }
 0x8d5   : > { %v3628_v3 = vpop.permute.xlu1 %1608 }
 0x8d8   : > { %1673 = vrot.lane.b32.xlu0 %v1666_v60, %s2808_s6  ;;  %1671 = vrot.lane.b32.xlu1 %v1664_v56, %s2808_s6 }
 0x8dc   : > { %1687 = vrot.lane.b32.xlu1 %v2739_v38, %s2807_s25 }
 0x946   : > { %v3630_v62 = vpop.permute.xlu1 %1667 }
 0x94a   : > { %v3632_v43 = vpop.permute.xlu1 %1671 }
 0x94e   : > { %v1688_v32 = vpop.permute.xlu1 %1687 }
 0x94f   : > { %v1691_v27 = vmul.f32 %v3501_v51, %v1688_v32  ;;  %v1693_v60 = vmul.f32 %v3511_v31, %v1688_v32  ;;  %v1690_v56 = vmul.f32 %v3505_v2, %v1688_v32  ;;  %v1692_v41 = vmul.f32 %v3515_v45, %v1688_v32 }
 0x950   : > { %v1695_v46 = vmul.f32 %v3557_v52, %v1688_v32  ;;  %v1694_v18 = vmul.f32 %v3561_v0, %v1688_v32  ;;  %v2742_v32 = vld [vmem:[%s4516_s3 + $0xa] ss:$0 sm:$0xff] }
 0x951   : > { %v1705_v22 = vrot.slane %v1691_v27, 2  ;;  %v1706_v58 = vrot.slane %v1693_v60, 2  ;;  %v1702_v1 = vrot.slane %v1690_v56, 2  ;;  %v1703_v4 = vrot.slane %v1692_v41, 2  ;;  %v2731_v27 = vld [vmem:[%s4516_s3] ss:$0 sm:$0xff] }
 0x952   : > { %v1710_v17 = vrot.slane %v1695_v46, 2  ;;  %v1708_v61 = vrot.slane %v1694_v18, 2  ;;  %v1440_v60 = vmul.f32 %v3505_v2, %v2731_v27  ;;  %v1441_v41 = vmul.f32 %v3515_v45, %v2731_v27 }
 0x953   : > { %v1707_v63 = vsel %vm432_vm1, %v1705_v22, %v1706_v58  ;;  %v1704_v38 = vsel %vm432_vm1, %v1702_v1, %v1703_v4  ;;  %v1469_v46 = vsel %vm271_vm2, %v3528_v13, %v3544_v36  ;;  %v1500_v22 = vsel %vm303_vm3, %v3548_v19, %v3576_v49 }
 0x954   : > { %1714 = vrot.lane.b32.xlu1 %v1707_v63, %s2809_s7  ;;  %1712 = vrot.lane.b32.xlu0 %v1704_v38, %s2809_s7  ;;  %v1711_v29 = vsel %vm432_vm1, %v1706_v58, %v1710_v17  ;;  %v1709_v16 = vsel %vm432_vm1, %v1703_v4, %v1708_v61  ;;  %v2734_v17 = vld [vmem:[%s4516_s3 + $0x3] ss:$0 sm:$0xff]  ;;  %v2737_v38 = vld [vmem:[%s4516_s3 + $0x6] ss:$0 sm:$0xff]  ;;  %v1501_v27 = vsel %vm303_vm3, %v3550_v47, %v3578_v26 }
 0x955   : > { %v1512_v61 = vmul.f32 %v3515_v45, %v2734_v17  ;;  %v1513_v18 = vmul.f32 %v3561_v0, %v2734_v17  ;;  %v1621_v49 = vmul.f32 %v3505_v2, %v2737_v38 }
 0x957   : > { %v1518_v1 = vrot.slane %v1512_v61, 1  ;;  %v1520_v36 = vrot.slane %v1513_v18, 1  ;;  %v1627_v47 = vrot.slane %v1621_v49, 2  ;;  %v1566_v18 = vsel %vm271_vm2, %v3582_v33, %v3604_v57 }
 0x958   : > { %1718 = vrot.lane.b32.xlu1 %v1711_v29, %s2809_s7  ;;  %1716 = vrot.lane.b32.xlu0 %v1709_v16, %s2809_s7  ;;  %v2730_v16 = vld [vmem:[%s4517_s4] ss:$0 sm:$0xff]  ;;  %v1511_v29 = vmul.f32 %v3505_v2, %v2734_v17 }
 0x959   : > { %v1442_v56 = vadd.f32 %v2730_v16, %v1440_v60  ;;  %v1443_v63 = vadd.f32 %v2730_v16, %v1441_v41  ;;  %v1622_v60 = vmul.f32 %v3515_v45, %v2737_v38  ;;  %v1565_v16 = vsel %vm271_vm2, %v3580_v23, %v3602_v21 }
 0x95a   : > { %v1517_v58 = vrot.slane %v1511_v29, 1  ;;  %v1623_v41 = vmul.f32 %v3561_v0, %v2737_v38  ;;  %v1611_v23 = vsel %vm303_vm3, %v3608_v50, %v3628_v3 }
 0x95b   : > { %v1473_v4 = vadd.f32 %v1469_v46, %v1442_v56  ;;  %v1610_v56 = vsel %vm303_vm3, %v3606_v20, %v1605_v12  ;;  %v1628_v26 = vrot.slane %v1622_v60, 2 }
 0x95c   : > { %1747 = vrot.lane.b32.xlu0 %v2742_v32, %s2806_s24  ;;  %v1470_v32 = vsel %vm271_vm2, %v3530_v14, %v3546_v39  ;;  %v1519_v19 = vsel %vm321_vm0, %v1517_v58, %v1518_v1  ;;  %v1521_v14 = vsel %vm321_vm0, %v1518_v1, %v1520_v36  ;;  %v1670_v39 = vpop.permute.xlu0 %1669  ;;  %v1630_v1 = vrot.slane %v1623_v41, 2 }
 0x95d   : > { %v1504_v13 = vadd.f32 %v1500_v22, %v1473_v4  ;;  %v1474_v17 = vadd.f32 %v1470_v32, %v1443_v63  ;;  %v1629_v21 = vsel %vm432_vm1, %v1627_v47, %v1628_v26  ;;  %v1675_v12 = vsel %vm271_vm2, %v3630_v62, %v1670_v39  ;;  %v2743_v39 = vld [vmem:[%s4516_s3 + $0xb] ss:$0 sm:$0xff] }
 0x95e   : > { %v1631_v32 = vsel %vm432_vm1, %v1628_v26, %v1630_v1  ;;  %v2741_v1 = vld [vmem:[%s4516_s3 + $0x9] ss:$0 sm:$0xff] }
 0x95f   : > { %v1505_v29 = vadd.f32 %v1501_v27, %v1474_v17  ;;  %v1524_v61 = vadd.f32 %v1519_v19, %v1504_v13 }
 0x960   : > { %v1674_v20 = vpop.permute.xlu0 %1673 }
 0x961   : > { %v1569_v46 = vadd.f32 %v1565_v16, %v1524_v61  ;;  %v1525_v22 = vadd.f32 %v1521_v14, %v1505_v29  ;;  %v1676_v36 = vsel %vm271_vm2, %v3632_v43, %v1674_v20  ;;  %v2740_v20 = vld [vmem:[%s4517_s4 + $0x1] ss:$0 sm:$0xff] }
 0x963   : > { %v1614_v58 = vadd.f32 %v1610_v56, %v1569_v46  ;;  %v1570_v4 = vadd.f32 %v1566_v18, %v1525_v22 }
 0x965   : > { %v1615_v63 = vadd.f32 %v1611_v23, %v1570_v4  ;;  %v1634_v38 = vadd.f32 %v1629_v21, %v1614_v58  ;;  %v2745_v21 = vld [vmem:[%s4516_s3 + $0xd] ss:$0 sm:$0xff]  ;;  %v1737_v4 = vmul.f32 %v3505_v2, %v2741_v1 }
 0x967   : > { %v1679_v13 = vadd.f32 %v1675_v12, %v1634_v38  ;;  %v1635_v3 = vadd.f32 %v1631_v32, %v1615_v63  ;;  %v1739_v12 = vadd.f32 %v2740_v20, %v1737_v4  ;;  %v1738_v38 = vmul.f32 %v3515_v45, %v2741_v1 }
 0x969   : > { %v1680_v19 = vadd.f32 %v1676_v36, %v1635_v3 }
 0x9c6   : > { %v1715_v33 = vpop.permute.xlu1 %1714  ;;  %v1713_v57 = vpop.permute.xlu0 %1712 }
 0x9c7   : > { %v1720_v50 = vsel %vm303_vm3, %v1713_v57, %v1715_v33 }
 0x9c8   : > { %v3704_v27 = vadd.f32 %v1720_v50, %v1679_v13  ;;  %v1740_v13 = vadd.f32 %v2740_v20, %v1738_v38  ;;  %v2746_v20 = vld [vmem:[%s4516_s3 + $0xe] ss:$0 sm:$0xff] }
 0x9ca   : > { %v1719_v49 = vpop.permute.xlu1 %1718  ;;  %v1717_v60 = vpop.permute.xlu0 %1716 }
 0x9cb   : > { %v1721_v62 = vsel %vm303_vm3, %v1717_v60, %v1719_v49 }
 0x9cc   : > { %v3707_v17 = vadd.f32 %v1721_v62, %v1680_v19 }
 0x9ce   : > { %v1748_v16 = vpop.permute.xlu0 %1747 }
 0x9cf   : > { %v1750_v29 = vmul.f32 %v3505_v2, %v1748_v16  ;;  %v1751_v61 = vmul.f32 %v3501_v51, %v1748_v16  ;;  %v1752_v43 = vmul.f32 %v3515_v45, %v1748_v16  ;;  %v1753_v14 = vmul.f32 %v3511_v31, %v1748_v16 }
 0x9d1   : > { %1760 = vrot.lane.b32.xlu0 %v1751_v61, %s2808_s6  ;;  %1758 = vrot.lane.b32.xlu1 %v1750_v29, %s2808_s6 }
 0x9d5   : > { %1764 = vrot.lane.b32.xlu0 %v1753_v14, %s2808_s6  ;;  %1762 = vrot.lane.b32.xlu1 %v1752_v43, %s2808_s6 }
 0x9d9   : > { %1778 = vrot.lane.b32.xlu1 %v2743_v39, %s2807_s25 }
 0xa43   : > { %v1761_v56 = vpop.permute.xlu0 %1760  ;;  %v1759_v47 = vpop.permute.xlu1 %1758 }
 0xa44   : > { %v1766_v26 = vsel %vm271_vm2, %v1759_v47, %v1761_v56 }
 0xa45   : > { %v1770_v32 = vadd.f32 %v1766_v26, %v1739_v12  ;;  %v2744_v12 = vld [vmem:[%s4516_s3 + $0xc] ss:$0 sm:$0xff] }
 0xa46   : > { %v1809_v38 = vmul.f32 %v3515_v45, %v2744_v12 }
 0xa47   : > { %v1763_v41 = vpop.permute.xlu1 %1762  ;;  %v1765_v63 = vpop.permute.xlu0 %1764 }
 0xa48   : > { %v1767_v36 = vsel %vm271_vm2, %v1763_v41, %v1765_v63  ;;  %v1808_v63 = vmul.f32 %v3505_v2, %v2744_v12 }
 0xa49   : > { %v1771_v19 = vadd.f32 %v1767_v36, %v1740_v13  ;;  %v1815_v13 = vrot.slane %v1809_v38, 1 }
 0xa4b   : > { %v1779_v46 = vpop.permute.xlu1 %1778 }
 0xa4c   : > { %v1781_v18 = vmul.f32 %v3505_v2, %v1779_v46  ;;  %v1782_v22 = vmul.f32 %v3501_v51, %v1779_v46  ;;  %v1783_v58 = vmul.f32 %v3515_v45, %v1779_v46  ;;  %v1784_v23 = vmul.f32 %v3511_v31, %v1779_v46 }
 0xa4e   : > { %1791 = vrot.lane.b32.xlu1 %v1782_v22, %s2809_s7  ;;  %1789 = vrot.lane.b32.xlu0 %v1781_v18, %s2809_s7 }
 0xa52   : > { %1795 = vrot.lane.b32.xlu1 %v1784_v23, %s2809_s7  ;;  %1793 = vrot.lane.b32.xlu0 %v1783_v58, %s2809_s7 }
 0xa56   : > { %1829 = vrot.lane.b32.xlu0 %v2745_v21, %s2806_s24 }
 0xac0   : > { %v1792_v33 = vpop.permute.xlu1 %1791  ;;  %v1790_v57 = vpop.permute.xlu0 %1789 }
 0xac1   : > { %v1797_v50 = vsel %vm303_vm3, %v1790_v57, %v1792_v33  ;;  %v1810_v33 = vmul.f32 %v3561_v0, %v2744_v12 }
 0xac2   : > { %v1801_v3 = vadd.f32 %v1797_v50, %v1770_v32  ;;  %v1814_v32 = vrot.slane %v1808_v63, 1 }
 0xac3   : > { %v1817_v36 = vrot.slane %v1810_v33, 1  ;;  %v2755_v33 = vld [vmem:[%s4516_s3 + $0x16] ss:$0 sm:$0xff] }
 0xac4   : > { %v1796_v49 = vpop.permute.xlu1 %1795  ;;  %v1794_v60 = vpop.permute.xlu0 %1793  ;;  %v1816_v57 = vsel %vm321_vm0, %v1814_v32, %v1815_v13  ;;  %v2753_v32 = vld [vmem:[%s4516_s3 + $0x14] ss:$0 sm:$0xff] }
 0xac5   : > { %v1798_v62 = vsel %vm303_vm3, %v1794_v60, %v1796_v49 }
 0xac6   : > { %v1802_v16 = vadd.f32 %v1798_v62, %v1771_v19  ;;  %v1821_v19 = vadd.f32 %v1816_v57, %v1801_v3  ;;  %v1818_v62 = vsel %vm321_vm0, %v1815_v13, %v1817_v36  ;;  %v2752_v13 = vld [vmem:[%s4516_s3 + $0x13] ss:$0 sm:$0xff]  ;;  %v2762_v57 = vld [vmem:[%s4516_s3 + $0x1c] ss:$0 sm:$0xff]  ;;  %v2756_v36 = vld [vmem:[%s4516_s3 + $0x17] ss:$0 sm:$0xff] }
 0xac8   : > { %v1830_v29 = vpop.permute.xlu0 %1829 }
 0xac9   : > { %v1833_v61 = vmul.f32 %v3501_v51, %v1830_v29  ;;  %v1835_v43 = vmul.f32 %v3511_v31, %v1830_v29  ;;  %v1832_v14 = vmul.f32 %v3505_v2, %v1830_v29  ;;  %v1834_v39 = vmul.f32 %v3515_v45, %v1830_v29 }
 0xaca   : > { %v1837_v56 = vmul.f32 %v3557_v52, %v1830_v29  ;;  %v1836_v47 = vmul.f32 %v3561_v0, %v1830_v29 }
 0xacb   : > { %v1847_v26 = vrot.slane %v1833_v61, 1  ;;  %v1848_v41 = vrot.slane %v1835_v43, 1  ;;  %v1844_v46 = vrot.slane %v1832_v14, 1  ;;  %v1845_v18 = vrot.slane %v1834_v39, 1 }
 0xacc   : > { %v1852_v23 = vrot.slane %v1837_v56, 1  ;;  %v1850_v21 = vrot.slane %v1836_v47, 1  ;;  %v1822_v43 = vadd.f32 %v1818_v62, %v1802_v16  ;;  %v2766_v62 = vld [vmem:[%s4516_s3 + $0x20] ss:$0 sm:$0xff] }
 0xacd   : > { %v1849_v22 = vsel %vm321_vm0, %v1847_v26, %v1848_v41  ;;  %v1846_v58 = vsel %vm321_vm0, %v1844_v46, %v1845_v18 }
 0xace   : > { %1856 = vrot.lane.b32.xlu0 %v1849_v22, %s2808_s6  ;;  %1854 = vrot.lane.b32.xlu1 %v1846_v58, %s2808_s6  ;;  %v1853_v1 = vsel %vm321_vm0, %v1848_v41, %v1852_v23  ;;  %v1851_v4 = vsel %vm321_vm0, %v1845_v18, %v1850_v21 }
 0xad2   : > { %1860 = vrot.lane.b32.xlu0 %v1853_v1, %s2808_s6  ;;  %1858 = vrot.lane.b32.xlu1 %v1851_v4, %s2808_s6 }
 0xad6   : > { %1874 = vrot.lane.b32.xlu1 %v2746_v20, %s2807_s25 }
 0xb40   : > { %v1857_v50 = vpop.permute.xlu0 %1856  ;;  %v1855_v49 = vpop.permute.xlu1 %1854 }
 0xb41   : > { %v1862_v60 = vsel %vm271_vm2, %v1855_v49, %v1857_v50  ;;  %v2763_v50 = vld [vmem:[%s4516_s3 + $0x1d] ss:$0 sm:$0xff]  ;;  %v2765_v49 = vld [vmem:[%s4516_s3 + $0x1f] ss:$0 sm:$0xff] }
 0xb42   : > { %v1866_v29 = vadd.f32 %v1862_v60, %v1821_v19  ;;  %v2748_v19 = vld [vmem:[%s4516_s3 + $0x10] ss:$0 sm:$0xff]  ;;  %v2749_v60 = vld [vmem:[%s4516_s3 + $0x11] ss:$0 sm:$0xff] }
 0xb44   : > { %v1861_v61 = vpop.permute.xlu0 %1860  ;;  %v1859_v14 = vpop.permute.xlu1 %1858 }
 0xb45   : > { %v1863_v39 = vsel %vm271_vm2, %v1859_v14, %v1861_v61  ;;  %v2758_v61 = vld [vmem:[%s4516_s3 + $0x19] ss:$0 sm:$0xff]  ;;  %v2768_v14 = vld [vmem:[%s4516_s3 + $0x22] ss:$0 sm:$0xff] }
 0xb46   : > { %v1867_v56 = vadd.f32 %v1863_v39, %v1822_v43  ;;  %v2759_v43 = vld [vmem:[%s4516_s3 + $0x1a] ss:$0 sm:$0xff]  ;;  %v2769_v39 = vld [vmem:[%s4516_s3 + $0x23] ss:$0 sm:$0xff] }
 0xb48   : > { %v1875_v47 = vpop.permute.xlu1 %1874 }
 0xb49   : > { %v1878_v26 = vmul.f32 %v3501_v51, %v1875_v47  ;;  %v1880_v41 = vmul.f32 %v3511_v31, %v1875_v47  ;;  %v1877_v46 = vmul.f32 %v3505_v2, %v1875_v47  ;;  %v1879_v3 = vmul.f32 %v3515_v45, %v1875_v47 }
 0xb4a   : > { %v1882_v18 = vmul.f32 %v3557_v52, %v1875_v47  ;;  %v1881_v22 = vmul.f32 %v3561_v0, %v1875_v47 }
 0xb4b   : > { %v1892_v58 = vrot.slane %v1878_v26, 1  ;;  %v1893_v23 = vrot.slane %v1880_v41, 1  ;;  %v1889_v16 = vrot.slane %v1877_v46, 1  ;;  %v1890_v21 = vrot.slane %v1879_v3, 1 }
 0xb4c   : > { %v1897_v20 = vrot.slane %v1882_v18, 1  ;;  %v1895_v12 = vrot.slane %v1881_v22, 1 }
 0xb4d   : > { %v1894_v1 = vsel %vm321_vm0, %v1892_v58, %v1893_v23  ;;  %v1891_v4 = vsel %vm321_vm0, %v1889_v16, %v1890_v21 }
 0xb4e   : > { %1901 = vrot.lane.b32.xlu1 %v1894_v1, %s2809_s7  ;;  %1899 = vrot.lane.b32.xlu0 %v1891_v4, %s2809_s7  ;;  %v1898_v63 = vsel %vm321_vm0, %v1893_v23, %v1897_v20  ;;  %v1896_v38 = vsel %vm321_vm0, %v1890_v21, %v1895_v12 }
 0xb52   : > { %1905 = vrot.lane.b32.xlu1 %v1898_v63, %s2809_s7  ;;  %1903 = vrot.lane.b32.xlu0 %v1896_v38, %s2809_s7 }
 0xb56   : > { %2077 = vrot.lane.b32.xlu1 %v2753_v32, %s2807_s25  ;;  %2046 = vrot.lane.b32.xlu0 %v2752_v13, %s2806_s24 }
 0xb5a   : > { %2128 = vrot.lane.b32.xlu1 %v2755_v33, %s2806_s24  ;;  %2345 = vrot.lane.b32.xlu0 %v2762_v57, %s2806_s24 }
 0xb5e   : > { %2173 = vrot.lane.b32.xlu1 %v2756_v36, %s2807_s25  ;;  %2376 = vrot.lane.b32.xlu0 %v2763_v50, %s2807_s25 }
 0xb62   : > { %1939 = vrot.lane.b32.xlu1 %v2748_v19, %s2806_s24  ;;  %2427 = vrot.lane.b32.xlu0 %v2765_v49, %s2806_s24 }
 0xb66   : > { %1984 = vrot.lane.b32.xlu1 %v2749_v60, %s2807_s25  ;;  %2472 = vrot.lane.b32.xlu0 %v2766_v62, %s2807_s25 }
 0xb6a   : > { %2238 = vrot.lane.b32.xlu0 %v2758_v61, %s2806_s24  ;;  %2283 = vrot.lane.b32.xlu1 %v2759_v43, %s2807_s25 }
 0xb6e   : > { %2537 = vrot.lane.b32.xlu0 %v2768_v14, %s2806_s24  ;;  %2582 = vrot.lane.b32.xlu1 %v2769_v39, %s2807_s25 }
 0xbc0   : > { %v1902_v47 = vpop.permute.xlu1 %1901  ;;  %v1900_v26 = vpop.permute.xlu0 %1899 }
 0xbc1   : > { %v1907_v41 = vsel %vm303_vm3, %v1900_v26, %v1902_v47 }
 0xbc2   : > { %v3844_v46 = vadd.f32 %v1907_v41, %v1866_v29 }
 0xbc4   : > { %v1906_v3 = vpop.permute.xlu1 %1905  ;;  %v1904_v18 = vpop.permute.xlu0 %1903 }
 0xbc5   : > { %v1908_v22 = vsel %vm303_vm3, %v1904_v18, %v1906_v3 }
 0xbc6   : > { %v3847_v58 = vadd.f32 %v1908_v22, %v1867_v56 }
 0xbc8   : > { %v2078_v23 = vpop.permute.xlu1 %2077 }
 0xbcc   : > { %v3849_v16 = vpop.permute.xlu1 %2128 }
 0xbd0   : > { %v3851_v21 = vpop.permute.xlu1 %2173 }
 0xbd4   : > { %v1940_v1 = vpop.permute.xlu1 %1939 }
 0xbd5   : > { %v1943_v4 = vmul.f32 %v3501_v51, %v1940_v1  ;;  %v1945_v20 = vmul.f32 %v3511_v31, %v1940_v1  ;;  %v1942_v12 = vmul.f32 %v3505_v2, %v1940_v1  ;;  %v1944_v29 = vmul.f32 %v3515_v45, %v1940_v1 }
 0xbd6   : > { %v1947_v63 = vmul.f32 %v3557_v52, %v1940_v1  ;;  %v1946_v38 = vmul.f32 %v3561_v0, %v1940_v1 }
 0xbd7   : > { %v1957_v56 = vrot.slane %v1943_v4, 2  ;;  %v1958_v32 = vrot.slane %v1945_v20, 2  ;;  %v1954_v13 = vrot.slane %v1942_v12, 2  ;;  %v1955_v33 = vrot.slane %v1944_v29, 2  ;;  %v2047_v29 = vpop.permute.xlu0 %2046 }
 0xbd8   : > { %v1985_v57 = vpop.permute.xlu1 %1984  ;;  %v1962_v36 = vrot.slane %v1947_v63, 2  ;;  %v1960_v50 = vrot.slane %v1946_v38, 2 }
 0xbd9   : > { %v1959_v19 = vsel %vm432_vm1, %v1957_v56, %v1958_v32  ;;  %v1956_v49 = vsel %vm432_vm1, %v1954_v13, %v1955_v33  ;;  %v1988_v60 = vmul.f32 %v3501_v51, %v1985_v57  ;;  %v1990_v62 = vmul.f32 %v3511_v31, %v1985_v57 }
 0xbda   : > { %1966 = vrot.lane.b32.xlu1 %v1959_v19, %s2808_s6  ;;  %1964 = vrot.lane.b32.xlu0 %v1956_v49, %s2808_s6  ;;  %v1987_v61 = vmul.f32 %v3505_v2, %v1985_v57  ;;  %v1989_v39 = vmul.f32 %v3515_v45, %v1985_v57  ;;  %v1963_v47 = vsel %vm432_vm1, %v1958_v32, %v1962_v36 }
 0xbdb   : > { %v2002_v43 = vrot.slane %v1988_v60, 2  ;;  %v2003_v14 = vrot.slane %v1990_v62, 2  ;;  %v1961_v41 = vsel %vm432_vm1, %v1955_v33, %v1960_v50  ;;  %v1992_v18 = vmul.f32 %v3557_v52, %v1985_v57  ;;  %v2346_v49 = vpop.permute.xlu0 %2345 }
 0xbdc   : > { %v1999_v26 = vrot.slane %v1987_v61, 2  ;;  %v2000_v3 = vrot.slane %v1989_v39, 2  ;;  %v1991_v22 = vmul.f32 %v3561_v0, %v1985_v57  ;;  %v2049_v56 = vmul.f32 %v3505_v2, %v2047_v29 }
 0xbdd   : > { %v2004_v1 = vsel %vm432_vm1, %v2002_v43, %v2003_v14  ;;  %v2007_v20 = vrot.slane %v1992_v18, 2  ;;  %v2050_v32 = vmul.f32 %v3501_v51, %v2047_v29  ;;  %v2051_v13 = vmul.f32 %v3515_v45, %v2047_v29 }
 0xbde   : > { %1970 = vrot.lane.b32.xlu1 %v1963_v47, %s2808_s6  ;;  %1968 = vrot.lane.b32.xlu0 %v1961_v41, %s2808_s6  ;;  %v2001_v4 = vsel %vm432_vm1, %v1999_v26, %v2000_v3  ;;  %v2005_v12 = vrot.slane %v1991_v22, 2  ;;  %v2052_v33 = vmul.f32 %v3511_v31, %v2047_v29  ;;  %v2080_v57 = vmul.f32 %v3505_v2, %v2078_v23 }
 0xbdf   : > { %v2008_v63 = vsel %vm432_vm1, %v2003_v14, %v2007_v20  ;;  %v2081_v36 = vmul.f32 %v3501_v51, %v2078_v23  ;;  %v2131_v50 = vmul.f32 %v3505_v2, %v3849_v16  ;;  %v2133_v19 = vmul.f32 %v3515_v45, %v3849_v16  ;;  %v2377_v47 = vpop.permute.xlu0 %2376 }
 0xbe0   : > { %v2006_v38 = vsel %vm432_vm1, %v2000_v3, %v2005_v12  ;;  %v2082_v60 = vmul.f32 %v3515_v45, %v2078_v23  ;;  %v2083_v62 = vmul.f32 %v3511_v31, %v2078_v23  ;;  %v2348_v14 = vmul.f32 %v3505_v2, %v2346_v49 }
 0xbe1   : > { %v2143_v61 = vrot.slane %v2131_v50, 1  ;;  %v2144_v43 = vrot.slane %v2133_v19, 1  ;;  %v2349_v26 = vmul.f32 %v3501_v51, %v2346_v49  ;;  %v2350_v41 = vmul.f32 %v3515_v45, %v2346_v49 }
 0xbe2   : > { %2011 = vrot.lane.b32.xlu1 %v2004_v1, %s2809_s7  ;;  %2009 = vrot.lane.b32.xlu0 %v2001_v4, %s2809_s7  ;;  %v2379_v23 = vmul.f32 %v3505_v2, %v2377_v47  ;;  %v2351_v3 = vmul.f32 %v3511_v31, %v2346_v49  ;;  %v2132_v18 = vmul.f32 %v3501_v51, %v3849_v16 }
 0xbe3   : > { %v2145_v39 = vsel %vm321_vm0, %v2143_v61, %v2144_v43  ;;  %v2134_v22 = vmul.f32 %v3511_v31, %v3849_v16  ;;  %v2135_v1 = vmul.f32 %v3561_v0, %v3849_v16  ;;  %v2136_v4 = vmul.f32 %v3557_v52, %v3849_v16  ;;  %v2428_v50 = vpop.permute.xlu0 %2427 }
 0xbe4   : > { %v2380_v20 = vmul.f32 %v3501_v51, %v2377_v47  ;;  %v2381_v12 = vmul.f32 %v3515_v45, %v2377_v47  ;;  %v2146_v29 = vrot.slane %v2132_v18, 1  ;;  %v2178_v16 = vmul.f32 %v3515_v45, %v3851_v21 }
 0xbe6   : > { %2015 = vrot.lane.b32.xlu1 %v2008_v63, %s2809_s7  ;;  %2013 = vrot.lane.b32.xlu0 %v2006_v38, %s2809_s7  ;;  %v2147_v63 = vrot.slane %v2134_v22, 1  ;;  %v2382_v38 = vmul.f32 %v3511_v31, %v2377_v47 }
 0xbea   : > { %2059 = vrot.lane.b32.xlu1 %v2050_v32, %s2808_s6  ;;  %2057 = vrot.lane.b32.xlu0 %v2049_v56, %s2808_s6  ;;  %v2148_v56 = vsel %vm321_vm0, %v2146_v29, %v2147_v63  ;;  %v2149_v32 = vrot.slane %v2135_v1, 1  ;;  %v2473_v29 = vpop.permute.xlu0 %2472 }
 0xbec   : > { %v2150_v19 = vsel %vm321_vm0, %v2144_v43, %v2149_v32  ;;  %v2433_v43 = vmul.f32 %v3511_v31, %v2428_v50  ;;  %v2434_v32 = vmul.f32 %v3561_v0, %v2428_v50 }
 0xbee   : > { %2063 = vrot.lane.b32.xlu1 %v2052_v33, %s2808_s6  ;;  %2061 = vrot.lane.b32.xlu0 %v2051_v13, %s2808_s6  ;;  %v2151_v13 = vrot.slane %v2136_v4, 1  ;;  %v2176_v33 = vmul.f32 %v3505_v2, %v3851_v21  ;;  %v2446_v4 = vrot.slane %v2433_v43, 1  ;;  %v2480_v43 = vmul.f32 %v3557_v52, %v2473_v29 }
 0xbf0   : > { %v2152_v49 = vsel %vm321_vm0, %v2147_v63, %v2151_v13  ;;  %v2188_v61 = vrot.slane %v2176_v33, 1  ;;  %v2476_v33 = vmul.f32 %v3501_v51, %v2473_v29 }
 0xbf2   : > { %2090 = vrot.lane.b32.xlu1 %v2081_v36, %s2809_s7  ;;  %2088 = vrot.lane.b32.xlu0 %v2080_v57, %s2809_s7  ;;  %v2177_v57 = vmul.f32 %v3501_v51, %v3851_v21  ;;  %v2179_v36 = vmul.f32 %v3511_v31, %v3851_v21 }
 0xbf4   : > { %v2192_v47 = vrot.slane %v2179_v36, 1  ;;  %v2475_v36 = vmul.f32 %v3505_v2, %v2473_v29 }
 0xbf6   : > { %2094 = vrot.lane.b32.xlu1 %v2083_v62, %s2809_s7  ;;  %2092 = vrot.lane.b32.xlu0 %v2082_v60, %s2809_s7  ;;  %v2180_v60 = vmul.f32 %v3561_v0, %v3851_v21  ;;  %v2181_v62 = vmul.f32 %v3557_v52, %v3851_v21 }
 0xbf8   : > { %v2194_v18 = vrot.slane %v2180_v60, 1  ;;  %v2196_v22 = vrot.slane %v2181_v62, 1  ;;  %v2448_v60 = vrot.slane %v2434_v32, 1 }
 0xbfa   : > { %2153 = vrot.lane.b32.xlu0 %v2145_v39, %s2808_s6  ;;  %2356 = vrot.lane.b32.xlu1 %v2348_v14, %s2808_s6  ;;  %v2189_v14 = vrot.slane %v2178_v16, 1  ;;  %v2191_v39 = vrot.slane %v2177_v57, 1  ;;  %v2478_v57 = vmul.f32 %v3511_v31, %v2473_v29 }
 0xbfc   : > { %v2193_v21 = vsel %vm321_vm0, %v2191_v39, %v2192_v47  ;;  %v2195_v63 = vsel %vm321_vm0, %v2189_v14, %v2194_v18  ;;  %v2491_v62 = vrot.slane %v2478_v57, 1  ;;  %v2239_v39 = vpop.permute.xlu0 %2238 }
 0xbfe   : > { %2358 = vrot.lane.b32.xlu0 %v2349_v26, %s2808_s6  ;;  %2360 = vrot.lane.b32.xlu1 %v2350_v41, %s2808_s6  ;;  %v2431_v26 = vmul.f32 %v3501_v51, %v2428_v50  ;;  %v2430_v41 = vmul.f32 %v3505_v2, %v2428_v50 }
 0xc00   : > { %v2445_v1 = vrot.slane %v2431_v26, 1 }
 0xc02   : > { %2362 = vrot.lane.b32.xlu0 %v2351_v3, %s2808_s6  ;;  %2387 = vrot.lane.b32.xlu1 %v2379_v23, %s2809_s7  ;;  %v2432_v23 = vmul.f32 %v3515_v45, %v2428_v50  ;;  %v2190_v3 = vsel %vm321_vm0, %v2188_v61, %v2189_v14  ;;  %v2447_v13 = vsel %vm321_vm0, %v2445_v1, %v2446_v4  ;;  %v2487_v61 = vrot.slane %v2475_v36, 1 }
 0xc03   : > { %v2243_v1 = vmul.f32 %v3515_v45, %v2239_v39 }
 0xc06   : > { %2389 = vrot.lane.b32.xlu0 %v2380_v20, %s2809_s7  ;;  %2391 = vrot.lane.b32.xlu1 %v2381_v12, %s2809_s7  ;;  %v2442_v20 = vrot.slane %v2430_v41, 1  ;;  %v2443_v12 = vrot.slane %v2432_v23, 1  ;;  %v2479_v41 = vmul.f32 %v3561_v0, %v2473_v29  ;;  %v2242_v23 = vmul.f32 %v3501_v51, %v2239_v39 }
 0xc08   : > { %v2444_v16 = vsel %vm321_vm0, %v2442_v20, %v2443_v12  ;;  %v2449_v26 = vsel %vm321_vm0, %v2443_v12, %v2448_v60  ;;  %v2493_v20 = vrot.slane %v2479_v41, 1  ;;  %v2256_v12 = vrot.slane %v2242_v23, 2  ;;  %v2793_v23 = vld [vmem:[%s2910_s30 + $0x8] sm:$0xff] }
 0xc0a   : > { %2393 = vrot.lane.b32.xlu0 %v2382_v38, %s2809_s7  ;;  %2155 = vrot.lane.b32.xlu1 %v2148_v56, %s2808_s6  ;;  %v2197_v38 = vsel %vm321_vm0, %v2192_v47, %v2196_v22  ;;  %v2435_v56 = vmul.f32 %v3557_v52, %v2428_v50  ;;  %v2490_v50 = vrot.slane %v2476_v33, 1  ;;  %v2241_v22 = vmul.f32 %v3505_v2, %v2239_v39 }
 0xc0b   : > { %v2246_v2 = vmul.f32 %v3557_v52, %v2239_v39  ;;  %v2245_v33 = vmul.f32 %v3561_v0, %v2239_v39 }
 0xc0e   : > { %2157 = vrot.lane.b32.xlu0 %v2150_v19, %s2808_s6  ;;  %2159 = vrot.lane.b32.xlu1 %v2152_v49, %s2808_s6  ;;  %v2477_v19 = vmul.f32 %v3515_v45, %v2473_v29  ;;  %v2450_v49 = vrot.slane %v2435_v56, 1  ;;  %v2284_v56 = vpop.permute.xlu1 %2283 }
 0xc0f   : > { %v2287_v57 = vmul.f32 %v3501_v51, %v2284_v56  ;;  %v2290_v41 = vmul.f32 %v3561_v0, %v2284_v56 }
 0xc10   : > { %v2488_v14 = vrot.slane %v2477_v19, 1  ;;  %v2451_v47 = vsel %vm321_vm0, %v2446_v4, %v2450_v49  ;;  %v2495_v4 = vrot.slane %v2480_v43, 1  ;;  %v2289_v19 = vmul.f32 %v3511_v31, %v2284_v56  ;;  %v3992_v49 = vld [vmem:[%s2910_s30] sm:$0xff] }
 0xc11   : > { %v2286_v60 = vmul.f32 %v3992_v49, %v2284_v56 }
 0xc12   : > { %2198 = vrot.lane.b32.xlu0 %v2190_v3, %s2809_s7  ;;  %2200 = vrot.lane.b32.xlu1 %v2193_v21, %s2809_s7  ;;  %v2244_v3 = vmul.f32 %v3511_v31, %v2239_v39  ;;  %v2492_v21 = vsel %vm321_vm0, %v2490_v50, %v2491_v62  ;;  %v2489_v18 = vsel %vm321_vm0, %v2487_v61, %v2488_v14  ;;  %v2259_v61 = vrot.slane %v2245_v33, 2  ;;  %v2538_v31 = vpop.permute.xlu0 %2537  ;;  %v2796_v33 = vld [vmem:[%s2910_s30 + $0x28] sm:$0x3] }
 0xc13   : > { %v2496_v32 = vsel %vm321_vm0, %v2491_v62, %v2495_v4  ;;  %v2288_v50 = vmul.f32 %v3515_v45, %v2284_v56  ;;  %v2261_v62 = vrot.slane %v2246_v2, 2  ;;  %v2302_v51 = vrot.slane %v2289_v19, 2 }
 0xc14   : > { %v2257_v29 = vrot.slane %v2244_v3, 2  ;;  %v2298_v39 = vrot.slane %v2286_v60, 2  ;;  %v2291_v45 = vmul.f32 %v3557_v52, %v2284_v56  ;;  %v2541_v3 = vmul.f32 %v2793_v23, %v2538_v31 }
 0xc15   : > { %v2540_v4 = vmul.f32 %v3992_v49, %v2538_v31 }
 0xc16   : > { %2202 = vrot.lane.b32.xlu0 %v2195_v63, %s2809_s7  ;;  %2204 = vrot.lane.b32.xlu1 %v2197_v38, %s2809_s7  ;;  %v2253_v63 = vrot.slane %v2241_v22, 2  ;;  %v2254_v38 = vrot.slane %v2243_v1, 2  ;;  %v2306_v0 = vrot.slane %v2291_v45, 2 }
 0xc18   : > { %v2255_v36 = vsel %vm432_vm1, %v2253_v63, %v2254_v38  ;;  %v2260_v43 = vsel %vm432_vm1, %v2254_v38, %v2259_v61  ;;  %v2552_v38 = vrot.slane %v2540_v4, 2 }
 0xc1a   : > { %2454 = vrot.lane.b32.xlu1 %v2447_v13, %s2808_s6  ;;  %2452 = vrot.lane.b32.xlu0 %v2444_v16, %s2808_s6  ;;  %v2494_v13 = vsel %vm321_vm0, %v2488_v14, %v2493_v20  ;;  %v2258_v16 = vsel %vm432_vm1, %v2256_v12, %v2257_v29  ;;  %v2301_v14 = vrot.slane %v2287_v57, 2  ;;  %v4010_v20 = vld [vmem:[%s2910_s30 + $0x10] sm:$0xff]  ;;  %v2304_v12 = vrot.slane %v2290_v41, 2  ;;  %v4019_v57 = vld [vmem:[%s2910_s30 + $0x20] sm:$0x3] }
 0xc1b   : > { %v2542_v52 = vmul.f32 %v4010_v20, %v2538_v31 }
 0xc1c   : > { %v2303_v22 = vsel %vm432_vm1, %v2301_v14, %v2302_v51 }
 0xc1d   : > { %v2553_v56 = vrot.slane %v2542_v52, 2 }
 0xc1e   : > { %2458 = vrot.lane.b32.xlu1 %v2451_v47, %s2808_s6  ;;  %2456 = vrot.lane.b32.xlu0 %v2449_v26, %s2808_s6  ;;  %v2299_v47 = vrot.slane %v2288_v50, 2  ;;  %v2262_v26 = vsel %vm432_vm1, %v2257_v29, %v2261_v62  ;;  %v2555_v29 = vrot.slane %v2541_v3, 2 }
 0xc1f   : > { %v2554_v50 = vsel %vm432_vm1, %v2552_v38, %v2553_v56 }
 0xc20   : > { %v2300_v1 = vsel %vm432_vm1, %v2298_v39, %v2299_v47  ;;  %v2305_v2 = vsel %vm432_vm1, %v2299_v47, %v2304_v12 }
 0xc22   : > { %2499 = vrot.lane.b32.xlu1 %v2492_v21, %s2809_s7  ;;  %2497 = vrot.lane.b32.xlu0 %v2489_v18, %s2809_s7  ;;  %v2794_v21 = vld [vmem:[%s2910_s30 + $0x18] sm:$0xff] }
 0xc23   : > { %v2543_v18 = vmul.f32 %v2794_v21, %v2538_v31 }
 0xc25   : > { %v2556_v63 = vrot.slane %v2543_v18, 2 }
 0xc26   : > { %2503 = vrot.lane.b32.xlu1 %v2496_v32, %s2809_s7  ;;  %2501 = vrot.lane.b32.xlu0 %v2494_v13, %s2809_s7  ;;  %v2583_v32 = vpop.permute.xlu1 %2582  ;;  %v2307_v13 = vsel %vm432_vm1, %v2302_v51, %v2306_v0 }
 0xc27   : > { %v2557_v19 = vsel %vm432_vm1, %v2555_v29, %v2556_v63  ;;  %v2586_v60 = vmul.f32 %v2793_v23, %v2583_v32  ;;  %v2588_v62 = vmul.f32 %v2794_v21, %v2583_v32  ;;  %v2585_v61 = vmul.f32 %v3992_v49, %v2583_v32  ;;  %v2747_v21 = vld [vmem:[%s4516_s3 + $0xf] ss:$0 sm:$0xff] }
 0xc28   : > { %v2587_v14 = vmul.f32 %v4010_v20, %v2583_v32  ;;  %v2590_v23 = vmul.f32 %v2796_v33, %v2583_v32  ;;  %v2589_v3 = vmul.f32 %v4019_v57, %v2583_v32  ;;  %v1919_v0 = vmul.f32 %v4010_v20, %v2747_v21 }
 0xc29   : > { %v2600_v47 = vrot.slane %v2586_v60, 2 }
 0xc2a   : > { %2265 = vrot.lane.b32.xlu1 %v2258_v16, %s2808_s6  ;;  %2263 = vrot.lane.b32.xlu0 %v2255_v36, %s2808_s6  ;;  %v2545_v16 = vmul.f32 %v2796_v33, %v2538_v31  ;;  %v2544_v36 = vmul.f32 %v4019_v57, %v2538_v31  ;;  %v2601_v31 = vrot.slane %v2588_v62, 2  ;;  %v2605_v4 = vrot.slane %v2590_v23, 2 }
 0xc2b   : > { %v2603_v52 = vrot.slane %v2589_v3, 2  ;;  %v1925_v38 = vrot.slane %v1919_v0, 2 }
 0xc2c   : > { %v2560_v51 = vrot.slane %v2545_v16, 2  ;;  %v2558_v39 = vrot.slane %v2544_v36, 2  ;;  %v2602_v18 = vsel %vm432_vm1, %v2600_v47, %v2601_v31  ;;  %v2606_v29 = vsel %vm432_vm1, %v2601_v31, %v2605_v4 }
 0xc2e   : > { %2269 = vrot.lane.b32.xlu1 %v2262_v26, %s2808_s6  ;;  %2267 = vrot.lane.b32.xlu0 %v2260_v43, %s2808_s6  ;;  %v2597_v26 = vrot.slane %v2585_v61, 2  ;;  %v2598_v43 = vrot.slane %v2587_v14, 2  ;;  %v2561_v45 = vsel %vm432_vm1, %v2556_v63, %v2560_v51  ;;  %v2559_v41 = vsel %vm432_vm1, %v2553_v56, %v2558_v39 }
 0xc2f   : > { %v1920_v56 = vmul.f32 %v4019_v57, %v2747_v21 }
 0xc30   : > { %v2604_v63 = vsel %vm432_vm1, %v2598_v43, %v2603_v52 }
 0xc32   : > { %2310 = vrot.lane.b32.xlu1 %v2303_v22, %s2809_s7  ;;  %2308 = vrot.lane.b32.xlu0 %v2300_v1, %s2809_s7  ;;  %v2599_v22 = vsel %vm432_vm1, %v2597_v26, %v2598_v43  ;;  %v1918_v1 = vmul.f32 %v3992_v49, %v2747_v21 }
 0xc34   : > { %v1924_v12 = vrot.slane %v1918_v1, 2  ;;  %v2750_v1 = vld [vmem:[%s4517_s4 + $0x2] ss:$0 sm:$0xff] }
 0xc36   : > { %2314 = vrot.lane.b32.xlu1 %v2307_v13, %s2809_s7  ;;  %2312 = vrot.lane.b32.xlu0 %v2305_v2, %s2809_s7  ;;  %v1926_v32 = vsel %vm432_vm1, %v1924_v12, %v1925_v38  ;;  %v1927_v13 = vrot.slane %v1920_v56, 2 }
 0xc37   : > { %v1931_v33 = vadd.f32 %v1926_v32, %v3844_v46 }
 0xc3a   : > { %2564 = vrot.lane.b32.xlu1 %v2557_v19, %s2808_s6  ;;  %2562 = vrot.lane.b32.xlu0 %v2554_v50, %s2808_s6  ;;  %v1928_v19 = vsel %vm432_vm1, %v1925_v38, %v1927_v13 }
 0xc3b   : > { %v1932_v62 = vadd.f32 %v1928_v19, %v3847_v58  ;;  %v2751_v58 = vld [vmem:[%s4516_s3 + $0x12] ss:$0 sm:$0xff] }
 0xc3c   : > { %v2037_v12 = vmul.f32 %v4010_v20, %v2751_v58 }
 0xc3e   : > { %2568 = vrot.lane.b32.xlu1 %v2561_v45, %s2808_s6  ;;  %2566 = vrot.lane.b32.xlu0 %v2559_v41, %s2808_s6  ;;  %v2039_v56 = vadd.f32 %v2750_v1, %v2037_v12  ;;  %v2704_v12 = vld [vmem:[%s4514_s1 + $0xc] ss:$0 sm:$0xff] }
 0xc42   : > { %2609 = vrot.lane.b32.xlu1 %v2602_v18, %s2809_s7  ;;  %2607 = vrot.lane.b32.xlu0 %v2599_v22, %s2809_s7  ;;  %v2036_v18 = vmul.f32 %v3992_v49, %v2751_v58 }
 0xc44   : > { %v2038_v52 = vadd.f32 %v2750_v1, %v2036_v18 }
 0xc46   : > { %2613 = vrot.lane.b32.xlu1 %v2606_v29, %s2809_s7  ;;  %2611 = vrot.lane.b32.xlu0 %v2604_v63, %s2809_s7  ;;  %s2772_s7 = sshll.u32 %s4681_s19, 4 }
 0xc47   : > { %s224_s26 = scalar_lea.vmem %s4518_s5, %s2772_s7 }
 0xc4c   : > { %v1967_v2 = vpop.permute.xlu1 %1966  ;;  %v1965_v16 = vpop.permute.xlu0 %1964 }
 0xc4d   : > { %v1972_v36 = vsel %vm271_vm2, %v1965_v16, %v1967_v2 }
 0xc4e   : > { %v1976_v60 = vadd.f32 %v1972_v36, %v1931_v33 }
 0xc50   : > { %v1971_v50 = vpop.permute.xlu1 %1970  ;;  %v1969_v61 = vpop.permute.xlu0 %1968 }
 0xc51   : > { %v1973_v14 = vsel %vm271_vm2, %v1969_v61, %v1971_v50 }
 0xc52   : > { %v1977_v51 = vadd.f32 %v1973_v14, %v1932_v62  ;;  %v2694_v62 = vld [vmem:[%s4514_s1 + $0x3] ss:$0 sm:$0xff] }
 0xc54   : > { %v2012_v39 = vpop.permute.xlu1 %2011  ;;  %v2010_v47 = vpop.permute.xlu0 %2009 }
 0xc55   : > { %v2017_v31 = vsel %vm303_vm3, %v2010_v47, %v2012_v39  ;;  %v2701_v39 = vld [vmem:[%s4514_s1 + $0x9] ss:$0 sm:$0xff]  ;;  %v316_v47 = vmul.f32 %v4010_v20, %v2694_v62 }
 0xc56   : > { %v4056_v26 = vadd.f32 %v2017_v31, %v1976_v60  ;;  %v315_v31 = vmul.f32 %v3992_v49, %v2694_v62  ;;  %v544_v1 = vmul.f32 %v4010_v20, %v2701_v39 }
 0xc58   : > { %v2016_v43 = vpop.permute.xlu1 %2015  ;;  %v2014_v45 = vpop.permute.xlu0 %2013 }
 0xc59   : > { %v2018_v41 = vsel %vm303_vm3, %v2014_v45, %v2016_v43  ;;  %v2697_v45 = vld [vmem:[%s4514_s1 + $0x6] ss:$0 sm:$0xff] }
 0xc5a   : > { %v4064_v23 = vadd.f32 %v2018_v41, %v1977_v51  ;;  %v2691_v51 = vld [vmem:[%s4514_s1] ss:$0 sm:$0xff] }
 0xc5b   : > { %v242_v43 = vmul.f32 %v3992_v49, %v2691_v51  ;;  %v243_v18 = vmul.f32 %v4010_v20, %v2691_v51 }
 0xc5c   : > { %v2060_v21 = vpop.permute.xlu1 %2059  ;;  %v2058_v22 = vpop.permute.xlu0 %2057 }
 0xc5d   : > { %v2065_v4 = vsel %vm271_vm2, %v2058_v22, %v2060_v21  ;;  %v2690_v21 = vld [vmem:[%s4515_s2] ss:$0 sm:$0xff]  ;;  %v543_v22 = vmul.f32 %v3992_v49, %v2701_v39 }
 0xc5e   : > { %v2069_v38 = vadd.f32 %v2065_v4, %v2038_v52  ;;  %v323_v4 = vrot.slane %v316_v47, 1  ;;  %v322_v52 = vrot.slane %v315_v31, 1  ;;  %v2707_v47 = vld [vmem:[%s4514_s1 + $0xf] ss:$0 sm:$0xff]  ;;  %v304_v31 = vsel %vm303_vm3, %v3176_v30, %v3136_v7 }
 0xc5f   : > { %v603_v7 = vsel %vm303_vm3, %v3196_v42, %v3144_v10  ;;  %v726_v10 = vmul.f32 %v4019_v57, %v2707_v47 }
 0xc60   : > { %v2064_v0 = vpop.permute.xlu1 %2063  ;;  %v2062_v29 = vpop.permute.xlu0 %2061  ;;  %v324_v51 = vsel %vm321_vm0, %v322_v52, %v323_v4 }
 0xc61   : > { %v2066_v63 = vsel %vm271_vm2, %v2062_v29, %v2064_v0  ;;  %v317_v0 = vmul.f32 %v4019_v57, %v2694_v62  ;;  %v2700_v29 = vld [vmem:[%s4515_s2 + $0x1] ss:$0 sm:$0xff] }
 0xc62   : > { %v2070_v16 = vadd.f32 %v2066_v63, %v2039_v56  ;;  %v426_v63 = vmul.f32 %v3992_v49, %v2697_v45  ;;  %v4119_v56 = vmul.f32 %v4010_v20, %v2697_v45  ;;  %v546_v62 = vadd.f32 %v2700_v29, %v544_v1 }
 0xc63   : > { %v325_v39 = vrot.slane %v317_v0, 1  ;;  %v616_v1 = vmul.f32 %v4019_v57, %v2704_v12 }
 0xc64   : > { %v2091_v32 = vpop.permute.xlu1 %2090  ;;  %v2089_v13 = vpop.permute.xlu0 %2088 }
 0xc65   : > { %v2096_v2 = vsel %vm303_vm3, %v2089_v13, %v2091_v32 }
 0xc66   : > { %v4076_v33 = vadd.f32 %v2096_v2, %v2069_v38  ;;  %v244_v38 = vadd.f32 %v2690_v21, %v242_v43  ;;  %v272_v2 = vsel %vm271_vm2, %v3166_v24, %v3132_v5  ;;  %v572_v5 = vsel %vm271_vm2, %v3140_v9, %v3186_v37 }
 0xc67   : > { %v433_v24 = vrot.slane %v426_v63, 2  ;;  %v428_v43 = vmul.f32 %v4019_v57, %v2697_v45  ;;  %v724_v37 = vmul.f32 %v3992_v49, %v2707_v47  ;;  %v573_v63 = vsel %vm271_vm2, %v3142_v44, %v3192_v40 }
 0xc68   : > { %v2095_v36 = vpop.permute.xlu1 %2094  ;;  %v2093_v19 = vpop.permute.xlu0 %2092  ;;  %v604_v44 = vsel %vm303_vm3, %v3202_v48, %v3146_v11  ;;  %v370_v40 = vsel %vm271_vm2, %v3150_v15, %v3211_v53  ;;  %v4594_v15 = vld [vmem:[#allocation3_spill] sm:$0xff] }
 0xc69   : > { %v2097_v60 = vsel %vm303_vm3, %v2093_v19, %v2095_v36  ;;  %v614_v36 = vmul.f32 %v3992_v49, %v2704_v12  ;;  %v615_v19 = vmul.f32 %v4010_v20, %v2704_v12  ;;  %v725_v12 = vmul.f32 %v4010_v20, %v2707_v47 }
 0xc6a   : > { %v4079_v50 = vadd.f32 %v2097_v60, %v2070_v16  ;;  %v245_v16 = vadd.f32 %v2690_v21, %v243_v18  ;;  %v545_v60 = vadd.f32 %v2700_v29, %v543_v22  ;;  %v276_v21 = vadd.f32 %v272_v2, %v244_v38 }
 0xc6b   : > { %v273_v18 = vsel %vm271_vm2, %v3134_v6, %v3172_v28  ;;  %v434_v22 = vrot.slane %v4119_v56, 2  ;;  %v620_v9 = vrot.slane %v614_v36, 1  ;;  %v621_v30 = vrot.slane %v615_v19, 1 }
 0xc6c   : > { %v4084_v61 = vpop.permute.xlu1 %2356  ;;  %v4086_v14 = vpop.permute.xlu0 %2153  ;;  %v308_v45 = vadd.f32 %v304_v31, %v276_v21  ;;  %v305_v6 = vsel %vm303_vm3, %v3182_v35, %v3138_v8  ;;  %v576_v28 = vadd.f32 %v572_v5, %v545_v60  ;;  %v277_v29 = vadd.f32 %v273_v18, %v245_v16  ;;  %v2711_v8 = vld [vmem:[%s4514_s1 + $0x12] ss:$0 sm:$0xff] }
 0xc6d   : > { %v326_v38 = vsel %vm321_vm0, %v323_v4, %v325_v39  ;;  %v435_v56 = vsel %vm432_vm1, %v433_v24, %v434_v22  ;;  %v436_v2 = vrot.slane %v428_v43, 2  ;;  %v623_v36 = vrot.slane %v616_v1, 1  ;;  %v4595_v1 = vld [vmem:[#allocation10_spill] sm:$0xff] }
 0xc6e   : > { %v607_v42 = vadd.f32 %v603_v7, %v576_v28  ;;  %v309_v19 = vadd.f32 %v305_v6, %v277_v29  ;;  %v622_v4 = vsel %vm321_vm0, %v620_v9, %v621_v30  ;;  %v577_v60 = vadd.f32 %v573_v63, %v546_v62  ;;  %v4596_v7 = vld [vmem:[#allocation23_spill] sm:$0xff]  ;;  %v4598_v6 = vld [vmem:[#allocation17_spill] sm:$0xff] }
 0xc6f   : > { %v329_v39 = vadd.f32 %v324_v51, %v308_v45  ;;  %v730_v47 = vrot.slane %v724_v37, 2  ;;  %v731_v31 = vrot.slane %v725_v12, 2  ;;  %v415_v5 = vsel %vm303_vm3, %v3216_v55, %v3154_v34  ;;  %v2714_v51 = vld [vmem:[%s4514_s1 + $0x15] ss:$0 sm:$0xff] }
 0xc70   : > { %v4100_v41 = vpop.permute.xlu1 %2360  ;;  %v4102_v58 = vpop.permute.xlu0 %2358  ;;  %v668_v24 = vsel %vm271_vm2, %v3168_v25, %v3228_v59  ;;  %v733_v43 = vrot.slane %v726_v10, 2  ;;  %v842_v11 = vmul.f32 %v3992_v49, %v2711_v8  ;;  %v608_v48 = vadd.f32 %v604_v44, %v577_v60  ;;  %v4597_v45 = vld [vmem:[#allocation4_spill] sm:$0xff] }
 0xc71   : > { %v374_v21 = vadd.f32 %v370_v40, %v329_v39  ;;  %v371_v53 = vsel %vm271_vm2, %v4594_v15, %v3214_v54  ;;  %v627_v62 = vadd.f32 %v622_v4, %v607_v42  ;;  %v330_v55 = vadd.f32 %v326_v38, %v309_v19  ;;  %v2710_v54 = vld [vmem:[%s4515_s2 + $0x2] ss:$0 sm:$0xff]  ;;  %v4600_v38 = vld [vmem:[#allocation9_spill] sm:$0xff]  ;;  %v4601_v39 = vld [vmem:[#allocation11_spill] sm:$0xff] }
 0xc72   : > { %v437_v25 = vsel %vm432_vm1, %v434_v22, %v436_v2  ;;  %v624_v59 = vsel %vm321_vm0, %v621_v30, %v623_v36  ;;  %v713_v9 = vsel %vm303_vm3, %v4596_v7, %v4595_v1  ;;  %v416_v28 = vsel %vm303_vm3, %v4598_v6, %v4597_v45  ;;  %v4599_v22 = vld [vmem:[#allocation22_spill] sm:$0xff]  ;;  %v4609_v7 = vld [vmem:[#allocation25_spill] sm:$0xff] }
 0xc73   : > { %v419_v37 = vadd.f32 %v415_v5, %v374_v21  ;;  %v672_v12 = vadd.f32 %v668_v24, %v627_v62  ;;  %v732_v29 = vsel %vm432_vm1, %v730_v47, %v731_v31  ;;  %v375_v63 = vadd.f32 %v371_v53, %v330_v55  ;;  %v4602_v47 = vld [vmem:[#allocation24_spill] sm:$0xff]  ;;  %v4603_v24 = vld [vmem:[#allocation29_spill] sm:$0xff]  ;;  %v4604_v21 = vld [vmem:[#allocation2_spill] sm:$0xff] }
 0xc74   : > { %v4121_v32 = vpop.permute.xlu1 %2387  ;;  %v4123_v13 = vpop.permute.xlu0 %2362  ;;  %v669_v30 = vsel %vm271_vm2, %v4600_v38, %v4599_v22  ;;  %v913_v10 = vmul.f32 %v3992_v49, %v2714_v51  ;;  %v4212_v42 = vmul.f32 %v4010_v20, %v2714_v51  ;;  %v628_v2 = vadd.f32 %v624_v59, %v608_v48  ;;  %v4605_v62 = vld [vmem:[#allocation18_spill] sm:$0xff]  ;;  %v4606_v55 = vld [vmem:[#allocation5_spill] sm:$0xff] }
 0xc75   : > { %v717_v36 = vadd.f32 %v713_v9, %v672_v12  ;;  %v734_v19 = vsel %vm432_vm1, %v731_v31, %v733_v43  ;;  %v844_v44 = vadd.f32 %v2710_v54, %v842_v11  ;;  %v420_v60 = vadd.f32 %v416_v28, %v375_v63  ;;  %v4607_v43 = vld [vmem:[#allocation19_spill] sm:$0xff]  ;;  %v4608_v11 = vld [vmem:[#allocation6_spill] sm:$0xff]  ;;  %v4610_v9 = vld [vmem:[#allocation12_spill] sm:$0xff] }
 0xc76   : > { %v714_v5 = vsel %vm303_vm3, %v4602_v47, %v4601_v39  ;;  %v871_v15 = vsel %vm271_vm2, %v4604_v21, %v4603_v24  ;;  %v843_v53 = vmul.f32 %v4010_v20, %v2711_v8  ;;  %v440_v48 = vadd.f32 %v435_v56, %v419_v37  ;;  %v4611_v6 = vld [vmem:[#allocation33_spill] sm:$0xff]  ;;  %v4612_v28 = vld [vmem:[#allocation31_spill] sm:$0xff]  ;;  %v4613_v24 = vld [vmem:[#allocation14_spill] sm:$0xff] }
 0xc77   : > { %v481_v31 = vsel %vm271_vm2, %v4606_v55, %v4605_v62  ;;  %v482_v59 = vsel %vm271_vm2, %v4608_v11, %v4607_v43  ;;  %v673_v1 = vadd.f32 %v669_v30, %v628_v2  ;;  %v778_v45 = vsel %vm271_vm2, %v4610_v9, %v4609_v7  ;;  %v4614_v21 = vld [vmem:[#allocation27_spill] sm:$0xff] }
 0xc78   : > { %v4146_v52 = vpop.permute.xlu1 %2391  ;;  %v4148_v0 = vpop.permute.xlu0 %2389  ;;  %v902_v12 = vsel %vm303_vm3, %v4612_v28, %v4611_v6  ;;  %v919_v63 = vrot.slane %v913_v10, 1  ;;  %v920_v56 = vrot.slane %v4212_v42, 1  ;;  %v737_v37 = vadd.f32 %v732_v29, %v717_v36  ;;  %v4615_v43 = vld [vmem:[#allocation7_spill] sm:$0xff]  ;;  %v4616_v10 = vld [vmem:[#allocation20_spill] sm:$0xff]  ;;  %v4617_v29 = vld [vmem:[#allocation30_spill] sm:$0xff] }
 0xc79   : > { %v718_v8 = vadd.f32 %v714_v5, %v673_v1  ;;  %v875_v22 = vadd.f32 %v871_v15, %v844_v44  ;;  %v915_v38 = vmul.f32 %v4019_v57, %v2714_v51  ;;  %v485_v30 = vadd.f32 %v481_v31, %v440_v48  ;;  %v4618_v36 = vld [vmem:[#allocation16_spill] sm:$0xff]  ;;  %v2717_v15 = vld [vmem:[%s4514_s1 + $0x18] ss:$0 sm:$0xff] }
 0xc7a   : > { %v441_v2 = vadd.f32 %v437_v25, %v420_v60  ;;  %v823_v62 = vsel %vm303_vm3, %v4614_v21, %v4613_v24  ;;  %v845_v55 = vadd.f32 %v2710_v54, %v843_v53  ;;  %v526_v42 = vsel %vm303_vm3, %v4616_v10, %v4615_v43  ;;  %v4619_v60 = vld [vmem:[#allocation8_spill] sm:$0xff]  ;;  %v4620_v48 = vld [vmem:[#allocation21_spill] sm:$0xff]  ;;  %v4621_v54 = vld [vmem:[#allocation26_spill] sm:$0xff] }
 0xc7b   : > { %v782_v5 = vadd.f32 %v778_v45, %v737_v37  ;;  %v872_v51 = vsel %vm271_vm2, %v4618_v36, %v4617_v29  ;;  %v906_v44 = vadd.f32 %v902_v12, %v875_v22  ;;  %v527_v31 = vsel %vm303_vm3, %v4620_v48, %v4619_v60  ;;  %v4622_v53 = vld [vmem:[#allocation13_spill] sm:$0xff]  ;;  %v4624_v45 = vld [vmem:[#allocation34_spill] sm:$0xff]  ;;  %v4625_v6 = vld [vmem:[#allocation32_spill] sm:$0xff] }
 0xc7c   : > { %v4167_v35 = vpop.permute.xlu1 %2155  ;;  %v4169_v16 = vpop.permute.xlu0 %2393  ;;  %v486_v25 = vadd.f32 %v482_v59, %v441_v2  ;;  %v779_v11 = vsel %vm271_vm2, %v4622_v53, %v4621_v54  ;;  %v921_v1 = vsel %vm321_vm0, %v919_v63, %v920_v56  ;;  %v738_v7 = vadd.f32 %v734_v19, %v718_v8  ;;  %v2721_v59 = vld [vmem:[%s4514_s1 + $0x1b] ss:$0 sm:$0xff]  ;;  %v2754_v37 = vld [vmem:[%s4516_s3 + $0x15] ss:$0 sm:$0xff]  ;;  %v4630_v10 = vld [vmem:[#allocation35_spill] sm:$0xff] }
 0xc7d   : > { %v4263_v9 = vadd.f32 %v823_v62, %v782_v5  ;;  %v903_v28 = vsel %vm303_vm3, %v4625_v6, %v4624_v45  ;;  %v922_v12 = vrot.slane %v915_v38, 1  ;;  %v4278_v19 = vadd.f32 %v526_v42, %v485_v30  ;;  %v4629_v43 = vld [vmem:[#allocation37_spill] sm:$0xff]  ;;  %v2720_v54 = vld [vmem:[%s4515_s2 + $0x3] ss:$0 sm:$0xff]  ;;  %v4635_v45 = vld [vmem:[#allocation39_spill] sm:$0xff] }
 0xc7e   : > { %v876_v63 = vadd.f32 %v872_v51, %v845_v55  ;;  %v1023_v8 = vmul.f32 %v3992_v49, %v2717_v15  ;;  %v1024_v24 = vmul.f32 %v4010_v20, %v2717_v15  ;;  %v4282_v38 = vadd.f32 %v527_v31, %v486_v25  ;;  %v2724_v30 = vld [vmem:[%s4514_s1 + $0x1e] ss:$0 sm:$0xff]  ;;  %v4631_v25 = vld [vmem:[#allocation15_spill] sm:$0xff] }
 0xc7f   : > { %4623 = vst [vmem:[#allocation3_spill] sm:$0xff] %v4263_v9  ;;  %4626 = vst [vmem:[#allocation10_spill] sm:$0xff] %v4278_v19  ;;  %v4284_v21 = vadd.f32 %v779_v11, %v738_v7  ;;  %v926_v62 = vadd.f32 %v921_v1, %v906_v44  ;;  %v967_v5 = vsel %vm271_vm2, %v4630_v10, %v4629_v43  ;;  %v4632_v44 = vld [vmem:[#allocation28_spill] sm:$0xff]  ;;  %v4634_v7 = vld [vmem:[#allocation41_spill] sm:$0xff] }
 0xc80   : > { %v4191_v18 = vpop.permute.xlu1 %2159  ;;  %v4193_v34 = vpop.permute.xlu0 %2157  ;;  %4627 = vst [vmem:[#allocation23_spill] sm:$0xff] %v4282_v38  ;;  %v907_v29 = vadd.f32 %v903_v28, %v876_v63  ;;  %v1141_v36 = vmul.f32 %v3992_v49, %v2721_v59  ;;  %v2107_v55 = vmul.f32 %v3992_v49, %v2754_v37  ;;  %v2108_v42 = vmul.f32 %v4010_v20, %v2754_v37  ;;  %v4636_v43 = vld [vmem:[#allocation38_spill] sm:$0xff]  ;;  %v4637_v10 = vld [vmem:[#allocation36_spill] sm:$0xff]  ;;  %v4638_v38 = vld [vmem:[#allocation53_spill] sm:$0xff] }
 0xc81   : > { %4628 = vst [vmem:[#allocation4_spill] sm:$0xff] %v4284_v21  ;;  %v4300_v60 = vsel %vm303_vm3, %v4632_v44, %v4631_v25  ;;  %v923_v48 = vsel %vm321_vm0, %v920_v56, %v922_v12  ;;  %v1025_v31 = vmul.f32 %v4019_v57, %v2717_v15  ;;  %v971_v1 = vadd.f32 %v967_v5, %v926_v62 }
 0xc82   : > { %4633 = vst [vmem:[#allocation17_spill] sm:$0xff] %v4300_v60  ;;  %v1012_v6 = vsel %vm303_vm3, %v4635_v45, %v4634_v7  ;;  %v1029_v28 = vrot.slane %v1023_v8, 2  ;;  %v1030_v63 = vrot.slane %v1024_v24, 2  ;;  %v968_v56 = vsel %vm271_vm2, %v4637_v10, %v4636_v43  ;;  %v4639_v7 = vld [vmem:[#allocation51_spill] sm:$0xff] }
 0xc83   : > { %v1212_v15 = vmul.f32 %v3992_v49, %v2724_v30  ;;  %v1213_v12 = vmul.f32 %v4010_v20, %v2724_v30  ;;  %v2109_v25 = vmul.f32 %v4019_v57, %v2754_v37  ;;  %v927_v44 = vadd.f32 %v923_v48, %v907_v29  ;;  %v2757_v37 = vld [vmem:[%s4516_s3 + $0x18] ss:$0 sm:$0xff] }
 0xc84   : > { %v4215_v40 = vpop.permute.xlu1 %2200  ;;  %v4217_v4 = vpop.permute.xlu0 %2198  ;;  %v1143_v51 = vadd.f32 %v2720_v54, %v1141_v36  ;;  %v2113_v3 = vrot.slane %v2107_v55, 1  ;;  %v2114_v62 = vrot.slane %v2108_v42, 1  ;;  %v1016_v5 = vadd.f32 %v1012_v6, %v971_v1  ;;  %v4640_v36 = vld [vmem:[#allocation42_spill] sm:$0xff]  ;;  %v4641_v55 = vld [vmem:[#allocation40_spill] sm:$0xff]  ;;  %v4643_v1 = vld [vmem:[#allocation55_spill] sm:$0xff] }
 0xc85   : > { %v1032_v46 = vrot.slane %v1025_v31, 2  ;;  %v1170_v8 = vsel %vm271_vm2, %v4639_v7, %v4638_v38  ;;  %v1142_v24 = vmul.f32 %v4010_v20, %v2721_v59  ;;  %v972_v29 = vadd.f32 %v968_v56, %v927_v44  ;;  %v4642_v38 = vld [vmem:[#allocation57_spill] sm:$0xff] }
 0xc86   : > { %v1013_v42 = vsel %vm303_vm3, %v4641_v55, %v4640_v36  ;;  %v1031_v48 = vsel %vm432_vm1, %v1029_v28, %v1030_v63  ;;  %v1214_v31 = vmul.f32 %v4019_v57, %v2724_v30  ;;  %v1201_v59 = vsel %vm303_vm3, %v4643_v1, %v4642_v38  ;;  %v4644_v36 = vld [vmem:[#allocation45_spill] sm:$0xff]  ;;  %v4645_v55 = vld [vmem:[#allocation43_spill] sm:$0xff] }
 0xc87   : > { %v1218_v6 = vrot.slane %v1212_v15, 1  ;;  %v1219_v10 = vrot.slane %v1213_v12, 1  ;;  %v2116_v7 = vrot.slane %v2109_v25, 1  ;;  %v1174_v9 = vadd.f32 %v1170_v8, %v1143_v51  ;;  %v4646_v51 = vld [vmem:[#allocation54_spill] sm:$0xff]  ;;  %v4647_v12 = vld [vmem:[#allocation52_spill] sm:$0xff] }
 0xc88   : > { %v4240_v39 = vpop.permute.xlu1 %2204  ;;  %v4242_v47 = vpop.permute.xlu0 %2202  ;;  %v2115_v19 = vsel %vm321_vm0, %v2113_v3, %v2114_v62  ;;  %v2217_v56 = vmul.f32 %v3992_v49, %v2757_v37  ;;  %v2218_v44 = vmul.f32 %v4010_v20, %v2757_v37  ;;  %v1036_v60 = vadd.f32 %v1031_v48, %v1016_v5  ;;  %v2761_v5 = vld [vmem:[%s4516_s3 + $0x1b] ss:$0 sm:$0xff] }
 0xc89   : > { %v1077_v28 = vsel %vm271_vm2, %v4645_v55, %v4644_v36  ;;  %v4346_v30 = vsel %vm432_vm1, %v1030_v63, %v1032_v46  ;;  %v1144_v21 = vadd.f32 %v2720_v54, %v1142_v24  ;;  %v1171_v3 = vsel %vm271_vm2, %v4647_v12, %v4646_v51  ;;  %v2727_v55 = vld [vmem:[%s4514_s1 + $0x21] ss:$0 sm:$0xff] }
 0xc8a   : > { %v1205_v25 = vadd.f32 %v1201_v59, %v1174_v9  ;;  %v1221_v8 = vrot.slane %v1214_v31, 1  ;;  %v2161_v46 = vsel %vm271_vm2, %v4086_v14, %v4167_v35  ;;  %v4361_v63 = vadd.f32 %v1013_v42, %v972_v29  ;;  %v2764_v31 = vld [vmem:[%s4516_s3 + $0x1e] ss:$0 sm:$0xff] }
 0xc8b   : > { %v1220_v54 = vsel %vm321_vm0, %v1218_v6, %v1219_v10  ;;  %v2120_v24 = vadd.f32 %v2115_v19, %v4076_v33  ;;  %v2117_v48 = vsel %vm321_vm0, %v2114_v62, %v2116_v7  ;;  %v2206_v9 = vsel %vm303_vm3, %v4217_v4, %v4215_v40  ;;  %v4648_v6 = vld [vmem:[#allocation58_spill] sm:$0xff]  ;;  %v4649_v7 = vld [vmem:[#allocation56_spill] sm:$0xff] }
 0xc8c   : > { %v4274_v22 = vpop.permute.xlu1 %2454  ;;  %v4276_v2 = vpop.permute.xlu0 %2452  ;;  %v2223_v1 = vrot.slane %v2217_v56, 2  ;;  %v2224_v59 = vrot.slane %v2218_v44, 2  ;;  %v2219_v14 = vmul.f32 %v4019_v57, %v2757_v37  ;;  %v4373_v35 = vadd.f32 %v1077_v28, %v1036_v60  ;;  %v2760_v37 = vld [vmem:[%s4517_s4 + $0x3] ss:$0 sm:$0xff]  ;;  %v4650_v60 = vld [vmem:[#allocation61_spill] sm:$0xff]  ;;  %v4651_v56 = vld [vmem:[#allocation59_spill] sm:$0xff] }
 0xc8d   : > { %v1175_v29 = vadd.f32 %v1171_v3, %v1144_v21  ;;  %v2335_v42 = vmul.f32 %v3992_v49, %v2761_v5  ;;  %v2165_v33 = vadd.f32 %v2161_v46, %v2120_v24  ;;  %v1202_v40 = vsel %vm303_vm3, %v4649_v7, %v4648_v6 }
 0xc8e   : > { %v1225_v4 = vadd.f32 %v1220_v54, %v1205_v25  ;;  %v4380_v36 = vsel %vm321_vm0, %v1219_v10, %v1221_v8  ;;  %v2162_v21 = vsel %vm271_vm2, %v4193_v34, %v4191_v18  ;;  %v1266_v44 = vsel %vm271_vm2, %v4651_v56, %v4650_v60 }
 0xc8f   : > { %v2121_v28 = vadd.f32 %v2117_v48, %v4079_v50  ;;  %v2210_v10 = vadd.f32 %v2206_v9, %v2165_v33  ;;  %v2406_v51 = vmul.f32 %v3992_v49, %v2764_v31  ;;  %v2207_v12 = vsel %vm303_vm3, %v4242_v47, %v4240_v39 }
 0xc90   : > { %v4307_v53 = vpop.permute.xlu1 %2458  ;;  %v4309_v11 = vpop.permute.xlu0 %2456  ;;  %v2407_v3 = vmul.f32 %v4010_v20, %v2764_v31  ;;  %v2225_v18 = vsel %vm432_vm1, %v2223_v1, %v2224_v59  ;;  %v2226_v34 = vrot.slane %v2219_v14, 2  ;;  %v1206_v25 = vadd.f32 %v1202_v40, %v1175_v29  ;;  %v4652_v40 = vld [vmem:[#allocation62_spill] sm:$0xff] }
 0xc91   : > { %v2337_v8 = vadd.f32 %v2760_v37, %v2335_v42  ;;  %v2336_v46 = vmul.f32 %v4010_v20, %v2761_v5  ;;  %v2166_v54 = vadd.f32 %v2162_v21, %v2121_v28  ;;  %v1270_v50 = vadd.f32 %v1266_v44, %v1225_v4  ;;  %v4653_v4 = vld [vmem:[#allocation60_spill] sm:$0xff] }
 0xc92   : > { %v1322_v48 = vmul.f32 %v3992_v49, %v2727_v55  ;;  %v2364_v9 = vsel %vm271_vm2, %v4084_v61, %v4102_v58  ;;  %v4408_v47 = vmul.f32 %v4010_v20, %v2727_v55  ;;  %v2408_v14 = vmul.f32 %v4019_v57, %v2764_v31  ;;  %v2767_v31 = vld [vmem:[%s4516_s3 + $0x21] ss:$0 sm:$0xff] }
 0xc93   : > { %v2211_v1 = vadd.f32 %v2207_v12, %v2166_v54  ;;  %v2230_v29 = vadd.f32 %v2225_v18, %v2210_v10  ;;  %v2395_v5 = vsel %vm303_vm3, %v4121_v32, %v4148_v0  ;;  %v2412_v42 = vrot.slane %v2406_v51, 1 }
 0xc94   : > { %v4324_v45 = vpop.permute.xlu1 %2499  ;;  %v4326_v43 = vpop.permute.xlu0 %2497  ;;  %v2413_v33 = vrot.slane %v2407_v3, 1  ;;  %v2227_v7 = vsel %vm432_vm1, %v2224_v59, %v2226_v34  ;;  %v1267_v61 = vsel %vm271_vm2, %v4653_v4, %v4652_v40  ;;  %v2368_v58 = vadd.f32 %v2364_v9, %v2337_v8  ;;  %v4658_v40 = vld [vmem:[#allocation66_spill] sm:$0xff]  ;;  %v4659_v4 = vld [vmem:[#allocation64_spill] sm:$0xff] }
 0xc95   : > { %v1328_v56 = vrot.slane %v1322_v48, 2  ;;  %v2365_v32 = vsel %vm271_vm2, %v4100_v41, %v4123_v13  ;;  %v2415_v28 = vrot.slane %v2408_v14, 1  ;;  %v2231_v10 = vadd.f32 %v2227_v7, %v2211_v1  ;;  %v4656_v48 = vld [vmem:[#allocation63_spill] sm:$0xff] }
 0xc96   : > { %v2399_v44 = vadd.f32 %v2395_v5, %v2368_v58  ;;  %v2396_v51 = vsel %vm303_vm3, %v4146_v52, %v4169_v16  ;;  %v2414_v12 = vsel %vm321_vm0, %v2412_v42, %v2413_v33  ;;  %v2516_v3 = vmul.f32 %v3992_v49, %v2767_v31 }
 0xc97   : > { %v2517_v18 = vmul.f32 %v4010_v20, %v2767_v31  ;;  %v1329_v41 = vrot.slane %v4408_v47, 2  ;;  %v4654_v8 = vmax.f32 %v3704_v27, %v4056_v26  ;;  %v1324_v16 = vmul.f32 %v4019_v57, %v2727_v55 }
 0xc98   : > { %v4348_v38 = vpop.permute.xlu1 %2503  ;;  %v4350_v15 = vpop.permute.xlu0 %2501  ;;  %v2460_v49 = vsel %vm271_vm2, %v4276_v2, %v4274_v22  ;;  %v2416_v27 = vsel %vm321_vm0, %v2413_v33, %v2415_v28  ;;  %v2505_v47 = vsel %vm303_vm3, %v4326_v43, %v4324_v45  ;;  %v2522_v1 = vrot.slane %v2516_v3, 2  ;;  %v4667_v3 = vld [vmem:[#allocation71_spill] sm:$0xff] }
 0xc99   : > { %v2523_v14 = vrot.slane %v2517_v18, 2  ;;  %v1226_v55 = vadd.f32 %v4380_v36, %v1206_v25  ;;  %v4657_v22 = vmax.f32 %v3707_v17, %v4064_v23  ;;  %v1312_v58 = vsel %vm303_vm3, %v4659_v4, %v4658_v40  ;;  %v4660_v36 = vld [vmem:[#allocation49_spill] sm:$0xff]  ;;  %v4661_v25 = vld [vmem:[#allocation47_spill] sm:$0xff] }
 0xc9a   : > { %v1330_v45 = vsel %vm432_vm1, %v1328_v56, %v1329_v41  ;;  %v1331_v43 = vrot.slane %v1324_v16, 2  ;;  %v1037_v18 = vadd.f32 %v4346_v30, %v4361_v63  ;;  %v4673_v16 = vld [vmem:[#allocation68_spill] sm:$0xff] }
 0xc9b   : > { %v1271_v17 = vadd.f32 %v1267_v61, %v1226_v55  ;;  %v2524_v56 = vsel %vm432_vm1, %v2522_v1, %v2523_v14  ;;  %v4675_v1 = vld [vmem:[#allocation3_spill] sm:$0xff] }
 0xc9c   : > { %v2266_v19 = vpop.permute.xlu1 %2265  ;;  %v2264_v62 = vpop.permute.xlu0 %2263 }
 0xc9d   : > { %v2271_v39 = vsel %vm271_vm2, %v2264_v62, %v2266_v19  ;;  %v2338_v19 = vadd.f32 %v2760_v37, %v2336_v46 }
 0xc9e   : > { %v2275_v62 = vadd.f32 %v2271_v39, %v2230_v29  ;;  %v2419_v39 = vadd.f32 %v2414_v12, %v2399_v44  ;;  %v2518_v29 = vmul.f32 %v4019_v57, %v2767_v31  ;;  %v2461_v57 = vsel %vm271_vm2, %v4309_v11, %v4307_v53  ;;  %v4665_v53 = vld [vmem:[#allocation44_spill] sm:$0xff]  ;;  %v4666_v12 = vld [vmem:[#allocation73_spill] sm:$0xff] }
 0xc9f   : > { %v2369_v13 = vadd.f32 %v2365_v32, %v2338_v19  ;;  %v2506_v31 = vsel %vm303_vm3, %v4350_v15, %v4348_v38  ;;  %v1421_v38 = vsel %vm303_vm3, %v4667_v3, %v4666_v12 }
 0xca0   : > { %v2270_v24 = vpop.permute.xlu1 %2269  ;;  %v2268_v6 = vpop.permute.xlu0 %2267  ;;  %v2464_v42 = vadd.f32 %v2460_v49, %v2419_v39  ;;  %v2525_v32 = vrot.slane %v2518_v29, 2 }
 0xca1   : > { %v2272_v0 = vsel %vm271_vm2, %v2268_v6, %v2270_v24  ;;  %v4655_v6 = vld [vmem:[#allocation65_spill] sm:$0xff]  ;;  %v2400_v9 = vadd.f32 %v2396_v51, %v2369_v13  ;;  %v1332_v51 = vsel %vm432_vm1, %v1329_v41, %v1331_v43  ;;  %v4672_v41 = vld [vmem:[#allocation70_spill] sm:$0xff] }
 0xca2   : > { %v2276_v34 = vadd.f32 %v2272_v0, %v2231_v10  ;;  %v1311_v52 = vsel %vm303_vm3, %v4656_v48, %v4655_v6  ;;  %v2509_v19 = vadd.f32 %v2505_v47, %v2464_v42  ;;  %v4664_v0 = vld [vmem:[#allocation46_spill] sm:$0xff]  ;;  %v1377_v49 = vsel %vm271_vm2, %v4673_v16, %v4672_v41  ;;  %v4678_v42 = vld [vmem:[#allocation72_spill] sm:$0xff] }
 0xca3   : > { %v1315_v5 = vadd.f32 %v1311_v52, %v1270_v50  ;;  %v1122_v50 = vsel %vm303_vm3, %v4661_v25, %v4660_v36  ;;  %v2420_v23 = vadd.f32 %v2416_v27, %v2400_v9  ;;  %v1078_v11 = vsel %vm271_vm2, %v4665_v53, %v4664_v0  ;;  %v4670_v48 = vld [vmem:[#allocation50_spill] sm:$0xff]  ;;  %v4671_v52 = vld [vmem:[#allocation48_spill] sm:$0xff] }
 0xca4   : > { %v2311_v21 = vpop.permute.xlu1 %2310  ;;  %v2309_v60 = vpop.permute.xlu0 %2308  ;;  %v1082_v9 = vadd.f32 %v1078_v11, %v1037_v18  ;;  %v4674_v47 = vld [vmem:[#allocation10_spill] sm:$0xff] }
 0xca5   : > { %v2316_v59 = vsel %vm303_vm3, %v2309_v60, %v2311_v21  ;;  %v4663_v21 = vld [vmem:[#allocation67_spill] sm:$0xff]  ;;  %v1335_v44 = vadd.f32 %v1330_v45, %v1315_v5  ;;  %v2465_v61 = vadd.f32 %v2461_v57, %v2420_v23  ;;  %v4676_v29 = vmax.f32 %v4674_v47, %v4675_v1  ;;  %v4677_v5 = vld [vmem:[#allocation74_spill] sm:$0xff] }
 0xca6   : > { %v2320_v37 = vadd.f32 %v2316_v59, %v2275_v62  ;;  %v4662_v62 = vld [vmem:[#allocation69_spill] sm:$0xff]  ;;  %v1316_v59 = vadd.f32 %v1312_v58, %v1271_v17  ;;  %v4679_v45 = vld [vmem:[#allocation23_spill] sm:$0xff] }
 0xca7   : > { %v1376_v60 = vsel %vm271_vm2, %v4663_v21, %v4662_v62 }
 0xca8   : > { %v4436_v46 = vmax.f32 %v4654_v8, %v2320_v37  ;;  %v2315_v54 = vpop.permute.xlu1 %2314  ;;  %v2313_v24 = vpop.permute.xlu0 %2312  ;;  %v1126_v37 = vadd.f32 %v1122_v50, %v4373_v35  ;;  %v1380_v13 = vadd.f32 %v1376_v60, %v1335_v44  ;;  %v2529_v8 = vadd.f32 %v2524_v56, %v2509_v19 }
 0xca9   : > { %v2317_v20 = vsel %vm303_vm3, %v2313_v24, %v2315_v54  ;;  %v4668_v54 = vld [vmem:[#allocation4_spill] sm:$0xff]  ;;  %v4669_v24 = vld [vmem:[#allocation17_spill] sm:$0xff]  ;;  %v1123_v35 = vsel %vm303_vm3, %v4671_v52, %v4670_v48  ;;  %v1336_v39 = vadd.f32 %v1332_v51, %v1316_v59 }
 0xcaa   : > { %v2321_v26 = vadd.f32 %v2317_v20, %v2276_v34  ;;  %v2510_v34 = vadd.f32 %v2506_v31, %v2465_v61  ;;  %v828_v6 = vadd.f32 %v4669_v24, %v4668_v54  ;;  %v2526_v20 = vsel %vm432_vm1, %v2523_v14, %v2525_v32 }
 0xcab   : > { %v1425_v30 = vadd.f32 %v1421_v38, %v1380_v13  ;;  %v1128_v55 = vmax.f32 %v4676_v29, %v1126_v37  ;;  %v1127_v40 = vadd.f32 %v1123_v35, %v1082_v9  ;;  %v1381_v14 = vadd.f32 %v1377_v49, %v1336_v39 }
 0xcac   : > { %v4455_v2 = vmax.f32 %v4657_v22, %v2321_v26  ;;  %v2565_v7 = vpop.permute.xlu1 %2564  ;;  %v2563_v33 = vpop.permute.xlu0 %2562  ;;  %v1422_v22 = vsel %vm303_vm3, %v4678_v42, %v4677_v5  ;;  %v2530_v4 = vadd.f32 %v2526_v20, %v2510_v34  ;;  %v830_v43 = vmax.f32 %v4679_v45, %v828_v6 }
 0xcad   : > { %v2570_v15 = vsel %vm271_vm2, %v2563_v33, %v2565_v7  ;;  %v1427_v57 = vmax.f32 %v1128_v55, %v1425_v30  ;;  %v1426_v36 = vadd.f32 %v1422_v22, %v1381_v14 }
 0xcae   : > { %v2574_v63 = vadd.f32 %v2570_v15, %v2529_v8  ;;  %v1129_v62 = vmax.f32 %v830_v43, %v1127_v40 }
 0xcb0   : > { %v2569_v28 = vpop.permute.xlu1 %2568  ;;  %v2567_v10 = vpop.permute.xlu0 %2566  ;;  %v1428_v31 = vmax.f32 %v1129_v62, %v1426_v36 }
 0xcb1   : > { %v2571_v7 = vsel %vm271_vm2, %v2567_v10, %v2569_v28 }
 0xcb2   : > { %v2575_v25 = vadd.f32 %v2571_v7, %v2530_v4 }
 0xcb4   : > { %v2610_v27 = vpop.permute.xlu1 %2609  ;;  %v2608_v26 = vpop.permute.xlu0 %2607 }
 0xcb5   : > { %v2615_v33 = vsel %vm303_vm3, %v2608_v26, %v2610_v27 }
 0xcb6   : > { %v2619_v58 = vadd.f32 %v2615_v33, %v2574_v63 }
 0xcb8   : > { %v2621_v50 = vmax.f32 %v4436_v46, %v2619_v58  ;;  %v2614_v17 = vpop.permute.xlu1 %2613  ;;  %v2612_v23 = vpop.permute.xlu0 %2611 }
 0xcb9   : > { %v2616_v19 = vsel %vm303_vm3, %v2612_v23, %v2614_v17 }
 0xcba   : > { %v2623_v21 = vsub.f32 %v1427_v57, %v2621_v50  ;;  %v2620_v60 = vadd.f32 %v2616_v19, %v2575_v25 }
 0xcbc   : > { %2625 = vst [vmem:[%s224_s26] sm:$0xff] %v2623_v21  ;;  %v2622_v56 = vmax.f32 %v4455_v2, %v2620_v60 }
 0xcbe   : > { %v2624_v32 = vsub.f32 %v1428_v31, %v2622_v56 }
 0xcc0   : > { %2626 = vst [vmem:[%s224_s26 + $0x8] sm:$0xff] %v2624_v32 }
 0xcc1 PF: > { %s15_s18 = sadd.s32 1, %s2804_s18  }
 0xcc2   : > { %p12_p4 = scmp.ge.s32.totalorder %s15_s18, 4  }
 0xcc4   :  { %14 = sbr.rel (!%p12_p4) target bundleno = 1 (0x1), region = 70 }

</bundles_post_ra>
